<compile_context>
chip_gen: v6e
topology: v6e:2x2x1
jax: 0.10.0
libtpu: 0.0.40
codegen_flags: <defaults>
</compile_context>

<pallas_src>
import functools
import math

import numpy as np
import jax
import jax.numpy as jnp
from jax import lax
from jax.experimental import pallas as pl
from jax.experimental.pallas import tpu as pltpu

# scipy.constants values hard-coded (no file / network access)
_E = 1.602176634e-19
_EPS0 = 8.8541878128e-12
COULOMB_FACTOR = 1.0e10 * _E / (4.0 * math.pi * _EPS0)   # ~14.39964 eV*Angstrom

_EPS = 1e-8
_EPS2 = _EPS * _EPS
_COORD_PAD = 128     # xyz zero-padded to 128 -> fully aligned MXU matmul
_OUT_LANES = 128     # lane-dense per-tile partial output


def _round_up(x, m):
    return ((x + m - 1) // m) * m


# ----------------------------- Pallas kernel --------------------------------
def _erfc_approx(x):
    # Abramowitz & Stegun 7.1.26 (x >= 0), |abs err| < 1.5e-7 (plus a small
    # extra error from the approximate EUP reciprocal; within test tolerance).
    p = 0.3275911
    a1, a2, a3, a4, a5 = (0.254829592, -0.284496736, 1.421413741,
                          -1.453152027, 1.061405429)
    t = pl.reciprocal(1.0 + p * x, approx=True)          # single EUP op, no Newton divide
    poly = t * (a1 + t * (a2 + t * (a3 + t * (a4 + t * a5))))
    return poly * jnp.exp(-x * x)


def _ewald_kernel(half_over_scale,
                  scal_ref, disp_ref, invg_ref, selfd_ref, qq_ref,
                  shift_ref, kvec_ref, kw_ref, pos_ref, q_ref, out_ref):
    b = pl.program_id(0)
    t = pl.program_id(1)
    inv_s2eta = scal_ref[b, 0]          # 1 / (sqrt(2) * eta_b)
    cut2 = scal_ref[b, 1]               # cutoff_real_b ** 2

    disp = disp_ref[...]                # (128, TILE_P)  rows 0..2 = dx,dy,dz (rest 0)
    shift = shift_ref[...]              # (S, 128)       cols 0..2 = lattice shift (rest 0)
    invg = invg_ref[...]                # (1, TILE_P)    1 / (sqrt(2) * gamma_ij)

    # |shift + disp|^2 = |shift|^2 + 2 shift.disp + |disp|^2 ; cross term on the MXU.
    s2 = jnp.sum(shift * shift, axis=1, keepdims=True)            # (S, 1)
    d2 = jnp.sum(disp * disp, axis=0, keepdims=True)              # (1, TILE_P)
    cross = jnp.dot(shift + shift, disp,
                    preferred_element_type=jnp.float32)           # (S, TILE_P)
    r2 = (cross + s2) + d2

    mask = (r2 > _EPS2) & (r2 < cut2)
    r2s = jnp.where(mask, r2, 1.0)
    inv_d = lax.rsqrt(r2s)              # one EUP rsqrt instead of sqrt + divide
    dist = r2s * inv_d

    term = (_erfc_approx(dist * inv_s2eta) - _erfc_approx(dist * invg)) * inv_d
    term = jnp.where(mask, term, 0.0)
    rowsum = jnp.sum(term, axis=0, keepdims=True)                 # (1, TILE_P)

    # charge-weighted (real + self) contribution of this pair tile
    base = jnp.sum((COULOMB_FACTOR * rowsum + selfd_ref[...]) * qq_ref[...])

    @pl.when(t == 0)
    def _():
        # reciprocal space via structure factors: O(K*N) transcendentals.
        kvec = kvec_ref[...]            # (K, 3)
        posm = pos_ref[...]             # (3, Np)
        qrow = q_ref[...]               # (1, Np)  (0 for padded atoms)
        ph = (kvec[:, 0:1] * posm[0:1, :]
              + kvec[:, 1:2] * posm[1:2, :]
              + kvec[:, 2:3] * posm[2:3, :])                      # (K, Np)
        sre = jnp.sum(jnp.cos(ph) * qrow, axis=1, keepdims=True)  # (K, 1)
        sim = jnp.sum(jnp.sin(ph) * qrow, axis=1, keepdims=True)  # (K, 1)
        # kw already contains COULOMB * 4*pi/V * exp(-0.5 (eta|k|)^2) / |k|^2
        erec = jnp.sum(kw_ref[...] * (sre * sre + sim * sim))
        out_ref[...] = jnp.full((1, _OUT_LANES),
                                half_over_scale * (base + erec), jnp.float32)

    @pl.when(t != 0)
    def _():
        out_ref[...] = jnp.full((1, _OUT_LANES),
                                half_over_scale * base, jnp.float32)


@functools.lru_cache(maxsize=None)
def _build_ewald_call(B, T, tile_p, S, K, Np, scale):
    kernel = functools.partial(_ewald_kernel, 0.5 / float(scale))
    return pl.pallas_call(
        kernel,
        out_shape=jax.ShapeDtypeStruct((B, T, 1, _OUT_LANES), jnp.float32),
        grid=(B, T),
        in_specs=[
            pl.BlockSpec(memory_space=pltpu.MemorySpace.SMEM),                  # scal (B, 2)
            pl.BlockSpec((None, _COORD_PAD, tile_p), lambda b, t: (b, 0, t)),   # disp
            pl.BlockSpec((None, 1, tile_p), lambda b, t: (b, 0, t)),            # 1/(sqrt2*gamma)
            pl.BlockSpec((None, 1, tile_p), lambda b, t: (b, 0, t)),            # self diag
            pl.BlockSpec((None, 1, tile_p), lambda b, t: (b, 0, t)),            # q_i * q_j
            pl.BlockSpec((None, S, _COORD_PAD), lambda b, t: (b, 0, 0)),        # lattice shifts
            pl.BlockSpec((None, K, 3), lambda b, t: (b, 0, 0)),                 # k vectors
            pl.BlockSpec((None, K, 1), lambda b, t: (b, 0, 0)),                 # scaled k weights
            pl.BlockSpec((None, 3, Np), lambda b, t: (b, 0, 0)),                # positions
            pl.BlockSpec((None, 1, Np), lambda b, t: (b, 0, 0)),                # charges
        ],
        out_specs=pl.BlockSpec((None, None, 1, _OUT_LANES),
                               lambda b, t: (b, t, 0, 0)),
        compiler_params=pltpu.CompilerParams(
            dimension_semantics=("parallel", "parallel"),
            vmem_limit_bytes=32 * 1024 * 1024),
    )


# ------------------------------ host glue -----------------------------------
# TODO(synk): the data-dependent-size lattice-shift / k-vector enumeration has no
# clean Pallas equivalent; it stays host-side (numpy) and is padded for the kernel.
def _shift_grid(cell, cutoff):
    """All integer lattice shifts needed to cover `cutoff` (numpy, host-side)."""
    nx = np.cross(cell[1], cell[2])
    ny = np.cross(cell[2], cell[0])
    nz = np.cross(cell[0], cell[1])
    proj = np.array([np.dot(cell[0], nx / np.linalg.norm(nx)),
                     np.dot(cell[1], ny / np.linalg.norm(ny)),
                     np.dot(cell[2], nz / np.linalg.norm(nz))])
    s = np.ceil(cutoff / np.abs(proj)).astype(int)
    ax = [np.arange(-s[i], s[i] + 1, dtype=np.float64) for i in range(3)]
    g = np.stack(np.meshgrid(ax[0], ax[1], ax[2], indexing="ij"), axis=-1)
    return g.reshape(-1, 3)


def _prepare_structure(cell, pos, sigmas, charges, accuracy, eps):
    """Per-structure geometry setup (numpy float64, host-side)."""
    n = pos.shape[0]
    volume = abs(np.dot(cell[0], np.cross(cell[1], cell[2])))
    eta = (volume ** 2 / n) ** (1.0 / 6.0) / math.sqrt(2.0 * math.pi)
    cutoff_real = math.sqrt(-2.0 * math.log(accuracy)) * eta
    cutoff_recip = math.sqrt(-2.0 * math.log(accuracy)) / eta

    shifts_cart = _shift_grid(cell, cutoff_real) @ cell                 # (S, 3)

    recip = 2.0 * math.pi * np.linalg.inv(cell).T
    ks = _shift_grid(recip, cutoff_recip) @ recip
    klen = np.linalg.norm(ks, axis=-1)
    keep = (klen > eps) & (klen < cutoff_recip)
    ks, klen = ks[keep], klen[keep]
    kw = (COULOMB_FACTOR * 4.0 * math.pi / volume
          * np.exp(-0.5 * (eta * klen) ** 2) / (klen ** 2))             # (K,)

    disp3 = (pos[None, :, :] - pos[:, None, :]).reshape(n * n, 3).T     # (3, n^2)
    gamma = np.sqrt(sigmas[:, None] ** 2 + sigmas[None, :] ** 2)
    invg = (1.0 / (math.sqrt(2.0) * gamma)).reshape(n * n)
    selfd = np.zeros((n, n))
    np.fill_diagonal(selfd, COULOMB_FACTOR * (-math.sqrt(2.0 / math.pi) / eta
                                              + 1.0 / (math.sqrt(math.pi) * sigmas)))
    selfd = selfd.reshape(n * n)
    qq = (charges[:, None] * charges[None, :]).reshape(n * n)

    return dict(n=n, disp3=disp3, invg=invg, selfd=selfd, qq=qq,
                shifts=shifts_cart, kvec=ks, kw=kw, pos3=pos.T, q=charges,
                scal=np.array([1.0 / (math.sqrt(2.0) * eta), cutoff_real ** 2]))


def ewald_forward(cell, pos, species_idx, charges, ptr, sigma_table,
                  scale=1.0, accuracy=1e-8, eps=1e-8):
    """Mirror of Ewald.forward: returns (batch_size, 1) electrostatic energies."""
    cell = np.asarray(cell, np.float64)
    pos = np.asarray(pos, np.float64)
    charges = np.asarray(charges, np.float64)
    if charges.ndim == 2:
        charges = charges[:, 0]
    sigmas_all = np.asarray(sigma_table, np.float64)[np.asarray(species_idx)]
    ptr = np.asarray(ptr, np.int64)
    B = len(ptr) - 1

    per = []
    for bi in range(B):
        s, e = int(ptr[bi]), int(ptr[bi + 1])
        per.append(_prepare_structure(cell[bi], pos[s:e], sigmas_all[s:e],
                                      charges[s:e], accuracy, eps))

    # shared padded sizes across the batch -> single compile, single launch
    P_raw = max(d["n"] ** 2 for d in per)
    S_pad = max(8, _round_up(max(d["shifts"].shape[0] for d in per), 8))
    K_pad = max(8, _round_up(max(d["kvec"].shape[0] for d in per), 8))
    N_pad = max(8, _round_up(max(d["n"] for d in per), 8))

    # pair-tile size: keep ~6 live (S_pad, TILE_P) f32 temps within ~8 MiB so the
    # working set fits the scoped-VMEM budget on v5e/v6e/v7x with headroom.
    P128 = max(128, _round_up(P_raw, 128))
    cap = max(128, ((8 * 1024 * 1024) // (6 * 4 * S_pad)) // 128 * 128)
    tile_p = int(min(1024, cap, P128))
    P_pad = _round_up(P128, tile_p)
    T = P_pad // tile_p

    disp = np.zeros((B, _COORD_PAD, P_pad), np.float32)
    invg = np.ones((B, 1, P_pad), np.float32)
    selfd = np.zeros((B, 1, P_pad), np.float32)
    qq = np.zeros((B, 1, P_pad), np.float32)
    shifts = np.zeros((B, S_pad, _COORD_PAD), np.float32)
    shifts[:, :, 0] = 1.0e6          # sentinel: padded shift rows land outside cutoff
    kvec = np.zeros((B, K_pad, 3), np.float32)
    kw = np.zeros((B, K_pad, 1), np.float32)
    posm = np.zeros((B, 3, N_pad), np.float32)
    qrow = np.zeros((B, 1, N_pad), np.float32)
    scal = np.zeros((B, 2), np.float32)

    for bi, d in enumerate(per):
        p = d["n"] ** 2
        disp[bi, :3, :p] = d["disp3"]
        invg[bi, 0, :p] = d["invg"]
        selfd[bi, 0, :p] = d["selfd"]
        qq[bi, 0, :p] = d["qq"]
        s = d["shifts"].shape[0]
        shifts[bi, :s, :3] = d["shifts"]
        k = d["kvec"].shape[0]
        kvec[bi, :k, :] = d["kvec"]
        kw[bi, :k, 0] = d["kw"]
        n = d["n"]
        posm[bi, :, :n] = d["pos3"]
        qrow[bi, 0, :n] = d["q"]
        scal[bi] = d["scal"]

    call = _build_ewald_call(int(B), int(T), int(tile_p),
                             int(S_pad), int(K_pad), int(N_pad), float(scale))
    out = call(jnp.asarray(scal), jnp.asarray(disp), jnp.asarray(invg),
               jnp.asarray(selfd), jnp.asarray(qq), jnp.asarray(shifts),
               jnp.asarray(kvec), jnp.asarray(kw), jnp.asarray(posm),
               jnp.asarray(qrow))
    return jnp.sum(out[:, :, 0, 0], axis=1, keepdims=True)     # (B, 1)


# -------------------------- float64 numpy reference --------------------------
_np_erfc = np.vectorize(math.erfc)


def ewald_energy_reference(cell, pos, sigmas, charges, scale=1.0,
                           accuracy=1e-8, eps=1e-8):
    cell = np.asarray(cell, np.float64)
    pos = np.asarray(pos, np.float64)
    sigmas = np.asarray(sigmas, np.float64)
    charges = np.asarray(charges, np.float64)
    n = pos.shape[0]
    volume = abs(np.dot(cell[0], np.cross(cell[1], cell[2])))
    eta = (volume ** 2 / n) ** (1.0 / 6.0) / math.sqrt(2.0 * math.pi)
    cutoff_real = math.sqrt(-2.0 * math.log(accuracy)) * eta
    cutoff_recip = math.sqrt(-2.0 * math.log(accuracy)) / eta

    shifts = _shift_grid(cell, cutoff_real) @ cell
    disp_ij = pos[None, :, :] - pos[:, None, :]
    disps = disp_ij[None] + shifts[:, None, None, :]
    dist = np.linalg.norm(disps, axis=-1)
    mask = (dist > eps) & (dist < cutoff_real)
    gam = np.sqrt(sigmas[:, None] ** 2 + sigmas[None, :] ** 2)
    e_aug = np.zeros_like(dist)
    e_aug[mask] = (_np_erfc(dist[mask] / (math.sqrt(2.0) * eta))
                   - _np_erfc((dist / (math.sqrt(2.0) * gam[None]))[mask])) / dist[mask]
    e_real = COULOMB_FACTOR * e_aug.sum(0)

    recip = 2.0 * math.pi * np.linalg.inv(cell).T
    ks = _shift_grid(recip, cutoff_recip) @ recip
    klen = np.linalg.norm(ks, axis=-1)
    keep = (klen > eps) & (klen < cutoff_recip)
    ks, klen = ks[keep], klen[keep]
    ph = np.einsum('kc,ijc->kij', ks, disp_ij)
    w = np.exp(-0.5 * (eta * klen) ** 2) / klen ** 2
    e_recip = COULOMB_FACTOR * 4.0 * math.pi / volume * (np.cos(ph) * w[:, None, None]).sum(0)

    diag = -math.sqrt(2.0 / math.pi) / eta + 1.0 / (math.sqrt(math.pi) * sigmas)
    e_self = COULOMB_FACTOR * np.diag(diag)

    E = e_real + e_recip + e_self
    return 0.5 * np.sum(E * charges[:, None] * charges[None, :]) / scale


# ----------------------------------- main ------------------------------------
if __name__ == "__main__":
    key = jax.random.PRNGKey(0)
    k_cell, k_frac, k_q = jax.random.split(key, 3)

    batch_size = 2
    n_per = 4
    ptr = np.array([0, n_per, 2 * n_per])

    # deterministic "covalent radii" table for allowed_species = [H, O]
    sigma_table = np.array([0.31, 0.66], dtype=np.float64)
    species_idx = np.array([0, 1, 0, 1, 1, 0, 1, 0], dtype=np.int32)

    # slightly perturbed 6 Angstrom cubic cells, fractional positions inside the cell
    cell = np.asarray(6.0 * jnp.eye(3) + 0.1 * jax.random.normal(k_cell, (batch_size, 3, 3)),
                      np.float64)
    frac = np.asarray(jax.random.uniform(k_frac, (2 * n_per, 3)), np.float64)
    pos = np.zeros((2 * n_per, 3), np.float64)
    for bi in range(batch_size):
        s, e = ptr[bi], ptr[bi + 1]
        pos[s:e] = frac[s:e] @ cell[bi]
    charges = np.asarray(0.5 * jax.random.normal(k_q, (2 * n_per, 1)), np.float64)

    out = ewald_forward(cell, pos, species_idx, charges, ptr, sigma_table, scale=1.0)
    out = jax.block_until_ready(out)

    # numpy float64 reference check
    sig_all = sigma_table[species_idx]
    refs = np.array([[ewald_energy_reference(cell[bi],
                                             pos[ptr[bi]:ptr[bi + 1]],
                                             sig_all[ptr[bi]:ptr[bi + 1]],
                                             charges[ptr[bi]:ptr[bi + 1], 0])]
                     for bi in range(batch_size)])
    assert np.allclose(np.asarray(out, np.float64), refs, rtol=2e-2, atol=5e-2), (out, refs)

    print("KERNEL_OK")
</pallas_src>

<mosaic_0001>
module attributes {stable_mosaic.version = 11 : i64} {
  func.func @_ewald_kernel(%arg0: i32, %arg1: i32, %arg2: memref<2x2xf32, #tpu.memory_space<smem>>, %arg3: memref<1x128x128xf32, #tpu.memory_space<vmem>>, %arg4: memref<1x1x128xf32, #tpu.memory_space<vmem>>, %arg5: memref<1x1x128xf32, #tpu.memory_space<vmem>>, %arg6: memref<1x1x128xf32, #tpu.memory_space<vmem>>, %arg7: memref<1x128x128xf32, #tpu.memory_space<vmem>>, %arg8: memref<1x120x3xf32, #tpu.memory_space<vmem>>, %arg9: memref<1x120x1xf32, #tpu.memory_space<vmem>>, %arg10: memref<1x3x8xf32, #tpu.memory_space<vmem>>, %arg11: memref<1x1x8xf32, #tpu.memory_space<vmem>>, %arg12: memref<1x1x1x128xf32, #tpu.memory_space<vmem>>) attributes {dimension_semantics = [#tpu.dimension_semantics<parallel>, #tpu.dimension_semantics<parallel>], iteration_bounds = array<i64: 2, 1>, scalar_prefetch = 0 : i64, scratch_operands = 0 : i64, tpu.core_type = #tpu.core_type<tc>, window_params = [{transform_indices = @transform_0, window_bounds = array<i64: 2, 2>}, {transform_indices = @transform_1, window_bounds = array<i64: 1, 128, 128>}, {transform_indices = @transform_2, window_bounds = array<i64: 1, 1, 128>}, {transform_indices = @transform_3, window_bounds = array<i64: 1, 1, 128>}, {transform_indices = @transform_4, window_bounds = array<i64: 1, 1, 128>}, {transform_indices = @transform_5, window_bounds = array<i64: 1, 128, 128>}, {transform_indices = @transform_6, window_bounds = array<i64: 1, 120, 3>}, {transform_indices = @transform_7, window_bounds = array<i64: 1, 120, 1>}, {transform_indices = @transform_8, window_bounds = array<i64: 1, 3, 8>}, {transform_indices = @transform_9, window_bounds = array<i64: 1, 1, 8>}, {transform_indices = @transform_10, window_bounds = array<i64: 1, 1, 1, 128>}]} {
    %0 = arith.index_cast %arg0 : i32 to index
    %c0 = arith.constant 0 : index
    %1 = memref.load %arg2[%0, %c0] : memref<2x2xf32, #tpu.memory_space<smem>>
    %2 = arith.index_cast %arg0 : i32 to index
    %c1 = arith.constant 1 : index
    %3 = memref.load %arg2[%2, %c1] : memref<2x2xf32, #tpu.memory_space<smem>>
    %c0_0 = arith.constant 0 : index
    %c0_1 = arith.constant 0 : index
    %c0_2 = arith.constant 0 : index
    %4 = vector.load %arg3[%c0_0, %c0_1, %c0_2] : memref<1x128x128xf32, #tpu.memory_space<vmem>>, vector<1x128x128xf32>
    %5 = vector.shape_cast %4 : vector<1x128x128xf32> to vector<128x128xf32>
    %c0_3 = arith.constant 0 : index
    %c0_4 = arith.constant 0 : index
    %c0_5 = arith.constant 0 : index
    %6 = vector.load %arg7[%c0_3, %c0_4, %c0_5] : memref<1x128x128xf32, #tpu.memory_space<vmem>>, vector<1x128x128xf32>
    %7 = vector.shape_cast %6 : vector<1x128x128xf32> to vector<128x128xf32>
    %c0_6 = arith.constant 0 : index
    %c0_7 = arith.constant 0 : index
    %c0_8 = arith.constant 0 : index
    %8 = vector.load %arg4[%c0_6, %c0_7, %c0_8] : memref<1x1x128xf32, #tpu.memory_space<vmem>>, vector<1x1x128xf32>
    %9 = vector.shape_cast %8 : vector<1x1x128xf32> to vector<1x128xf32>
    %10 = arith.mulf %7, %7 : vector<128x128xf32>
    %cst = arith.constant dense<0.000000e+00> : vector<128xf32>
    %11 = vector.multi_reduction <add>, %10, %cst [1] : vector<128x128xf32> to vector<128xf32>
    %12 = vector.shape_cast %11 : vector<128xf32> to vector<128x1xf32>
    %13 = arith.mulf %5, %5 : vector<128x128xf32>
    %cst_9 = arith.constant dense<0.000000e+00> : vector<128xf32>
    %14 = vector.multi_reduction <add>, %13, %cst_9 [0] : vector<128x128xf32> to vector<128xf32>
    %15 = vector.shape_cast %14 : vector<128xf32> to vector<1x128xf32>
    %16 = arith.addf %7, %7 : vector<128x128xf32>
    %cst_10 = arith.constant dense<0.000000e+00> : vector<128x128xf32>
    %17 = tpu.matmul %16, %5, %cst_10 {dimension_numbers = #tpu.dot_dimension_numbers<[1], [0], [0], [1], [0, 0, 1, 1], [], []>} : vector<128x128xf32>, vector<128x128xf32>, vector<128x128xf32> -> vector<128x128xf32>
    %18 = vector.broadcast %12 : vector<128x1xf32> to vector<128x128xf32>
    %19 = arith.addf %17, %18 : vector<128x128xf32>
    %20 = vector.broadcast %15 : vector<1x128xf32> to vector<128x128xf32>
    %21 = arith.addf %19, %20 : vector<128x128xf32>
    %cst_11 = arith.constant 1.000000e-16 : f32
    %22 = vector.broadcast %cst_11 : f32 to vector<128x128xf32>
    %23 = arith.cmpf ogt, %21, %22 : vector<128x128xf32>
    %24 = vector.broadcast %3 : f32 to vector<128x128xf32>
    %25 = arith.cmpf olt, %21, %24 : vector<128x128xf32>
    %26 = arith.andi %23, %25 : vector<128x128xi1>
    %cst_12 = arith.constant 1.000000e+00 : f32
    %27 = vector.broadcast %cst_12 : f32 to vector<128x128xf32>
    %28 = arith.select %26, %21, %27 : vector<128x128xi1>, vector<128x128xf32>
    %29 = math.rsqrt %28 : vector<128x128xf32>
    %30 = arith.mulf %28, %29 : vector<128x128xf32>
    %31 = vector.broadcast %1 : f32 to vector<128x128xf32>
    %32 = arith.mulf %30, %31 : vector<128x128xf32>
    %cst_13 = arith.constant 0.327591091 : f32
    %33 = vector.broadcast %cst_13 : f32 to vector<128x128xf32>
    %34 = arith.mulf %33, %32 : vector<128x128xf32>
    %cst_14 = arith.constant 1.000000e+00 : f32
    %35 = vector.broadcast %cst_14 : f32 to vector<128x128xf32>
    %36 = arith.addf %35, %34 : vector<128x128xf32>
    %37 = tpu.reciprocal %36 {approx = true} : vector<128x128xf32> -> vector<128x128xf32>
    %cst_15 = arith.constant 1.06140542 : f32
    %38 = vector.broadcast %cst_15 : f32 to vector<128x128xf32>
    %39 = arith.mulf %37, %38 : vector<128x128xf32>
    %cst_16 = arith.constant -1.45315206 : f32
    %40 = vector.broadcast %cst_16 : f32 to vector<128x128xf32>
    %41 = arith.addf %40, %39 : vector<128x128xf32>
    %42 = arith.mulf %37, %41 : vector<128x128xf32>
    %cst_17 = arith.constant 1.42141378 : f32
    %43 = vector.broadcast %cst_17 : f32 to vector<128x128xf32>
    %44 = arith.addf %43, %42 : vector<128x128xf32>
    %45 = arith.mulf %37, %44 : vector<128x128xf32>
    %cst_18 = arith.constant -0.284496725 : f32
    %46 = vector.broadcast %cst_18 : f32 to vector<128x128xf32>
    %47 = arith.addf %46, %45 : vector<128x128xf32>
    %48 = arith.mulf %37, %47 : vector<128x128xf32>
    %cst_19 = arith.constant 0.254829586 : f32
    %49 = vector.broadcast %cst_19 : f32 to vector<128x128xf32>
    %50 = arith.addf %49, %48 : vector<128x128xf32>
    %51 = arith.mulf %37, %50 : vector<128x128xf32>
    %cst_20 = arith.constant 0.000000e+00 : f32
    %52 = vector.broadcast %cst_20 : f32 to vector<128x128xf32>
    %53 = arith.subf %52, %32 : vector<128x128xf32>
    %54 = arith.mulf %53, %32 : vector<128x128xf32>
    %55 = math.exp %54 : vector<128x128xf32>
    %56 = arith.mulf %51, %55 : vector<128x128xf32>
    %57 = vector.broadcast %9 : vector<1x128xf32> to vector<128x128xf32>
    %58 = arith.mulf %30, %57 : vector<128x128xf32>
    %cst_21 = arith.constant 0.327591091 : f32
    %59 = vector.broadcast %cst_21 : f32 to vector<128x128xf32>
    %60 = arith.mulf %59, %58 : vector<128x128xf32>
    %cst_22 = arith.constant 1.000000e+00 : f32
    %61 = vector.broadcast %cst_22 : f32 to vector<128x128xf32>
    %62 = arith.addf %61, %60 : vector<128x128xf32>
    %63 = tpu.reciprocal %62 {approx = true} : vector<128x128xf32> -> vector<128x128xf32>
    %cst_23 = arith.constant 1.06140542 : f32
    %64 = vector.broadcast %cst_23 : f32 to vector<128x128xf32>
    %65 = arith.mulf %63, %64 : vector<128x128xf32>
    %cst_24 = arith.constant -1.45315206 : f32
    %66 = vector.broadcast %cst_24 : f32 to vector<128x128xf32>
    %67 = arith.addf %66, %65 : vector<128x128xf32>
    %68 = arith.mulf %63, %67 : vector<128x128xf32>
    %cst_25 = arith.constant 1.42141378 : f32
    %69 = vector.broadcast %cst_25 : f32 to vector<128x128xf32>
    %70 = arith.addf %69, %68 : vector<128x128xf32>
    %71 = arith.mulf %63, %70 : vector<128x128xf32>
    %cst_26 = arith.constant -0.284496725 : f32
    %72 = vector.broadcast %cst_26 : f32 to vector<128x128xf32>
    %73 = arith.addf %72, %71 : vector<128x128xf32>
    %74 = arith.mulf %63, %73 : vector<128x128xf32>
    %cst_27 = arith.constant 0.254829586 : f32
    %75 = vector.broadcast %cst_27 : f32 to vector<128x128xf32>
    %76 = arith.addf %75, %74 : vector<128x128xf32>
    %77 = arith.mulf %63, %76 : vector<128x128xf32>
    %cst_28 = arith.constant 0.000000e+00 : f32
    %78 = vector.broadcast %cst_28 : f32 to vector<128x128xf32>
    %79 = arith.subf %78, %58 : vector<128x128xf32>
    %80 = arith.mulf %79, %58 : vector<128x128xf32>
    %81 = math.exp %80 : vector<128x128xf32>
    %82 = arith.mulf %77, %81 : vector<128x128xf32>
    %83 = arith.subf %56, %82 : vector<128x128xf32>
    %84 = arith.mulf %83, %29 : vector<128x128xf32>
    %cst_29 = arith.constant 0.000000e+00 : f32
    %85 = vector.broadcast %cst_29 : f32 to vector<128x128xf32>
    %86 = arith.select %26, %84, %85 : vector<128x128xi1>, vector<128x128xf32>
    %cst_30 = arith.constant dense<0.000000e+00> : vector<128xf32>
    %87 = vector.multi_reduction <add>, %86, %cst_30 [0] : vector<128x128xf32> to vector<128xf32>
    %88 = vector.shape_cast %87 : vector<128xf32> to vector<1x128xf32>
    %cst_31 = arith.constant 14.3996458 : f32
    %89 = vector.broadcast %cst_31 : f32 to vector<1x128xf32>
    %90 = arith.mulf %89, %88 : vector<1x128xf32>
    %c0_32 = arith.constant 0 : index
    %c0_33 = arith.constant 0 : index
    %c0_34 = arith.constant 0 : index
    %91 = vector.load %arg5[%c0_32, %c0_33, %c0_34] : memref<1x1x128xf32, #tpu.memory_space<vmem>>, vector<1x1x128xf32>
    %92 = vector.shape_cast %91 : vector<1x1x128xf32> to vector<1x128xf32>
    %93 = arith.addf %90, %92 : vector<1x128xf32>
    %c0_35 = arith.constant 0 : index
    %c0_36 = arith.constant 0 : index
    %c0_37 = arith.constant 0 : index
    %94 = vector.load %arg6[%c0_35, %c0_36, %c0_37] : memref<1x1x128xf32, #tpu.memory_space<vmem>>, vector<1x1x128xf32>
    %95 = vector.shape_cast %94 : vector<1x1x128xf32> to vector<1x128xf32>
    %96 = arith.mulf %93, %95 : vector<1x128xf32>
    %97 = vector.shape_cast %96 : vector<1x128xf32> to vector<1x1x128xf32>
    %cst_38 = arith.constant dense<0.000000e+00> : vector<1xf32>
    %98 = vector.multi_reduction <add>, %97, %cst_38 [1, 2] : vector<1x1x128xf32> to vector<1xf32>
    %99 = vector.shape_cast %98 : vector<1xf32> to vector<1x1x1xf32>
    %100 = vector.extract %99[0, 0, 0] : f32 from vector<1x1x1xf32>
    %c0_i32 = arith.constant 0 : i32
    %101 = arith.cmpi eq, %arg1, %c0_i32 : i32
    %102 = arith.extui %101 : i1 to i32
    %c0_i32_39 = arith.constant 0 : i32
    %103 = arith.cmpi ne, %102, %c0_i32_39 : i32
    scf.if %103 {
      %c0_42 = arith.constant 0 : index
      %c0_43 = arith.constant 0 : index
      %c0_44 = arith.constant 0 : index
      %107 = vector.load %arg8[%c0_42, %c0_43, %c0_44] : memref<1x120x3xf32, #tpu.memory_space<vmem>>, vector<1x120x3xf32>
      %108 = vector.shape_cast %107 : vector<1x120x3xf32> to vector<120x3xf32>
      %c0_45 = arith.constant 0 : index
      %c0_46 = arith.constant 0 : index
      %c0_47 = arith.constant 0 : index
      %109 = vector.load %arg10[%c0_45, %c0_46, %c0_47] : memref<1x3x8xf32, #tpu.memory_space<vmem>>, vector<1x3x8xf32>
      %110 = vector.shape_cast %109 : vector<1x3x8xf32> to vector<3x8xf32>
      %c0_48 = arith.constant 0 : index
      %c0_49 = arith.constant 0 : index
      %c0_50 = arith.constant 0 : index
      %111 = vector.load %arg11[%c0_48, %c0_49, %c0_50] : memref<1x1x8xf32, #tpu.memory_space<vmem>>, vector<1x1x8xf32>
      %112 = vector.shape_cast %111 : vector<1x1x8xf32> to vector<1x8xf32>
      %113 = vector.extract_strided_slice %108 {offsets = [0, 0], sizes = [120, 1], strides = [1, 1]} : vector<120x3xf32> to vector<120x1xf32>
      %114 = vector.extract_strided_slice %110 {offsets = [0, 0], sizes = [1, 8], strides = [1, 1]} : vector<3x8xf32> to vector<1x8xf32>
      %115 = vector.broadcast %113 : vector<120x1xf32> to vector<120x8xf32>
      %116 = vector.broadcast %114 : vector<1x8xf32> to vector<120x8xf32>
      %117 = arith.mulf %115, %116 : vector<120x8xf32>
      %118 = vector.extract_strided_slice %108 {offsets = [0, 1], sizes = [120, 1], strides = [1, 1]} : vector<120x3xf32> to vector<120x1xf32>
      %119 = vector.extract_strided_slice %110 {offsets = [1, 0], sizes = [1, 8], strides = [1, 1]} : vector<3x8xf32> to vector<1x8xf32>
      %120 = vector.broadcast %118 : vector<120x1xf32> to vector<120x8xf32>
      %121 = vector.broadcast %119 : vector<1x8xf32> to vector<120x8xf32>
      %122 = arith.mulf %120, %121 : vector<120x8xf32>
      %123 = arith.addf %117, %122 : vector<120x8xf32>
      %124 = vector.extract_strided_slice %108 {offsets = [0, 2], sizes = [120, 1], strides = [1, 1]} : vector<120x3xf32> to vector<120x1xf32>
      %125 = vector.extract_strided_slice %110 {offsets = [2, 0], sizes = [1, 8], strides = [1, 1]} : vector<3x8xf32> to vector<1x8xf32>
      %126 = vector.broadcast %124 : vector<120x1xf32> to vector<120x8xf32>
      %127 = vector.broadcast %125 : vector<1x8xf32> to vector<120x8xf32>
      %128 = arith.mulf %126, %127 : vector<120x8xf32>
      %129 = arith.addf %123, %128 : vector<120x8xf32>
      %130 = math.cos %129 : vector<120x8xf32>
      %131 = vector.broadcast %112 : vector<1x8xf32> to vector<120x8xf32>
      %132 = arith.mulf %130, %131 : vector<120x8xf32>
      %cst_51 = arith.constant dense<0.000000e+00> : vector<120xf32>
      %133 = vector.multi_reduction <add>, %132, %cst_51 [1] : vector<120x8xf32> to vector<120xf32>
      %134 = vector.shape_cast %133 : vector<120xf32> to vector<120x1xf32>
      %135 = math.sin %129 : vector<120x8xf32>
      %136 = vector.broadcast %112 : vector<1x8xf32> to vector<120x8xf32>
      %137 = arith.mulf %135, %136 : vector<120x8xf32>
      %cst_52 = arith.constant dense<0.000000e+00> : vector<120xf32>
      %138 = vector.multi_reduction <add>, %137, %cst_52 [1] : vector<120x8xf32> to vector<120xf32>
      %139 = vector.shape_cast %138 : vector<120xf32> to vector<120x1xf32>
      %c0_53 = arith.constant 0 : index
      %c0_54 = arith.constant 0 : index
      %c0_55 = arith.constant 0 : index
      %140 = vector.load %arg9[%c0_53, %c0_54, %c0_55] : memref<1x120x1xf32, #tpu.memory_space<vmem>>, vector<1x120x1xf32>
      %141 = vector.shape_cast %140 : vector<1x120x1xf32> to vector<120x1xf32>
      %142 = arith.mulf %134, %134 : vector<120x1xf32>
      %143 = arith.mulf %139, %139 : vector<120x1xf32>
      %144 = arith.addf %142, %143 : vector<120x1xf32>
      %145 = arith.mulf %141, %144 : vector<120x1xf32>
      %146 = vector.shape_cast %145 : vector<120x1xf32> to vector<1x120x1xf32>
      %cst_56 = arith.constant dense<0.000000e+00> : vector<1xf32>
      %147 = vector.multi_reduction <add>, %146, %cst_56 [1, 2] : vector<1x120x1xf32> to vector<1xf32>
      %148 = vector.shape_cast %147 : vector<1xf32> to vector<1x1x1xf32>
      %149 = vector.extract %148[0, 0, 0] : f32 from vector<1x1x1xf32>
      %150 = arith.addf %100, %149 : f32
      %cst_57 = arith.constant 5.000000e-01 : f32
      %151 = arith.mulf %cst_57, %150 : f32
      %152 = vector.broadcast %151 : f32 to vector<1x128xf32>
      %c0_58 = arith.constant 0 : index
      %c0_59 = arith.constant 0 : index
      %c0_60 = arith.constant 0 : index
      %c0_61 = arith.constant 0 : index
      %153 = vector.load %arg12[%c0_58, %c0_59, %c0_60, %c0_61] : memref<1x1x1x128xf32, #tpu.memory_space<vmem>>, vector<1x1x1x128xf32>
      %154 = vector.shape_cast %153 : vector<1x1x1x128xf32> to vector<1x128xf32>
      %155 = vector.shape_cast %152 : vector<1x128xf32> to vector<1x1x1x128xf32>
      tpu.vector_store %arg12[%c0_58, %c0_59, %c0_60, %c0_61], %155 {strides = array<i32>} : memref<1x1x1x128xf32, #tpu.memory_space<vmem>>, vector<1x1x1x128xf32>,
    } else {
    }
    %c0_i32_40 = arith.constant 0 : i32
    %104 = arith.cmpi ne, %arg1, %c0_i32_40 : i32
    %105 = arith.extui %104 : i1 to i32
    %c0_i32_41 = arith.constant 0 : i32
    %106 = arith.cmpi ne, %105, %c0_i32_41 : i32
    scf.if %106 {
      %cst_42 = arith.constant 5.000000e-01 : f32
      %107 = arith.mulf %cst_42, %100 : f32
      %108 = vector.broadcast %107 : f32 to vector<1x128xf32>
      %c0_43 = arith.constant 0 : index
      %c0_44 = arith.constant 0 : index
      %c0_45 = arith.constant 0 : index
      %c0_46 = arith.constant 0 : index
      %109 = vector.load %arg12[%c0_43, %c0_44, %c0_45, %c0_46] : memref<1x1x1x128xf32, #tpu.memory_space<vmem>>, vector<1x1x1x128xf32>
      %110 = vector.shape_cast %109 : vector<1x1x1x128xf32> to vector<1x128xf32>
      %111 = vector.shape_cast %108 : vector<1x128xf32> to vector<1x1x1x128xf32>
      tpu.vector_store %arg12[%c0_43, %c0_44, %c0_45, %c0_46], %111 {strides = array<i32>} : memref<1x1x1x128xf32, #tpu.memory_space<vmem>>, vector<1x1x1x128xf32>,
    } else {
    }
    return
  }
  func.func @transform_0(%arg0: i32, %arg1: i32) -> (i32, i32) {
    %c0_i32 = arith.constant 0 : i32
    %c0_i32_0 = arith.constant 0 : i32
    %c0_i32_1 = arith.constant 0 : i32
    return %c0_i32, %c0_i32_0 : i32, i32
  }
  func.func @transform_1(%arg0: i32, %arg1: i32) -> (i32, i32, i32) {
    %c0_i32 = arith.constant 0 : i32
    %c0_i32_0 = arith.constant 0 : i32
    return %arg0, %c0_i32, %arg1 : i32, i32, i32
  }
  func.func @transform_2(%arg0: i32, %arg1: i32) -> (i32, i32, i32) {
    %c0_i32 = arith.constant 0 : i32
    %c0_i32_0 = arith.constant 0 : i32
    return %arg0, %c0_i32, %arg1 : i32, i32, i32
  }
  func.func @transform_3(%arg0: i32, %arg1: i32) -> (i32, i32, i32) {
    %c0_i32 = arith.constant 0 : i32
    %c0_i32_0 = arith.constant 0 : i32
    return %arg0, %c0_i32, %arg1 : i32, i32, i32
  }
  func.func @transform_4(%arg0: i32, %arg1: i32) -> (i32, i32, i32) {
    %c0_i32 = arith.constant 0 : i32
    %c0_i32_0 = arith.constant 0 : i32
    return %arg0, %c0_i32, %arg1 : i32, i32, i32
  }
  func.func @transform_5(%arg0: i32, %arg1: i32) -> (i32, i32, i32) {
    %c0_i32 = arith.constant 0 : i32
    %c0_i32_0 = arith.constant 0 : i32
    %c0_i32_1 = arith.constant 0 : i32
    return %arg0, %c0_i32, %c0_i32_0 : i32, i32, i32
  }
  func.func @transform_6(%arg0: i32, %arg1: i32) -> (i32, i32, i32) {
    %c0_i32 = arith.constant 0 : i32
    %c0_i32_0 = arith.constant 0 : i32
    %c0_i32_1 = arith.constant 0 : i32
    return %arg0, %c0_i32, %c0_i32_0 : i32, i32, i32
  }
  func.func @transform_7(%arg0: i32, %arg1: i32) -> (i32, i32, i32) {
    %c0_i32 = arith.constant 0 : i32
    %c0_i32_0 = arith.constant 0 : i32
    %c0_i32_1 = arith.constant 0 : i32
    return %arg0, %c0_i32, %c0_i32_0 : i32, i32, i32
  }
  func.func @transform_8(%arg0: i32, %arg1: i32) -> (i32, i32, i32) {
    %c0_i32 = arith.constant 0 : i32
    %c0_i32_0 = arith.constant 0 : i32
    %c0_i32_1 = arith.constant 0 : i32
    return %arg0, %c0_i32, %c0_i32_0 : i32, i32, i32
  }
  func.func @transform_9(%arg0: i32, %arg1: i32) -> (i32, i32, i32) {
    %c0_i32 = arith.constant 0 : i32
    %c0_i32_0 = arith.constant 0 : i32
    %c0_i32_1 = arith.constant 0 : i32
    return %arg0, %c0_i32, %c0_i32_0 : i32, i32, i32
  }
  func.func @transform_10(%arg0: i32, %arg1: i32) -> (i32, i32, i32, i32) {
    %c0_i32 = arith.constant 0 : i32
    %c0_i32_0 = arith.constant 0 : i32
    %c0_i32_1 = arith.constant 0 : i32
    return %arg0, %arg1, %c0_i32, %c0_i32_0 : i32, i32, i32, i32
  }
}

</mosaic_0001>

<bundles_post_ra>
// kernel: tpu_custom_call.1
= control target key start
LH: loop header
LB: loop body
LE: loop exit
PB: predicated region body
PF: predicated region fallthrough
CT: control target
= control target key end

     0   :  { %s9857_s0 = inlined_call_operand.vmem [shape: f32[2,2], index: 0, kind: input, shape index: {}]   ;;  %s9858_s1 = inlined_call_operand.vmem [shape: f32[2,128,128], index: 1, kind: input, shape index: {}]   ;;  %s9859_s2 = inlined_call_operand.vmem [shape: f32[2,1,128], index: 2, kind: input, shape index: {}]   ;;  %s9860_s3 = inlined_call_operand.vmem [shape: f32[2,1,128], index: 3, kind: input, shape index: {}]   ;;  %s9861_s4 = inlined_call_operand.vmem [shape: f32[2,1,128], index: 4, kind: input, shape index: {}]   ;;  %s9862_s5 = inlined_call_operand.hbm [shape: f32[2,128,128], index: 5, kind: input, shape index: {}]   ;;  %s9863_s6 = inlined_call_operand.vmem [shape: f32[2,120,3], index: 6, kind: input, shape index: {}]   ;;  %s9864_s7 = inlined_call_operand.vmem [shape: f32[2,120,1], index: 7, kind: input, shape index: {}]   ;;  %s9865_s8 = inlined_call_operand.vmem [shape: f32[2,3,8], index: 8, kind: input, shape index: {}]   ;;  %s9866_s9 = inlined_call_operand.vmem [shape: f32[2,1,8], index: 9, kind: input, shape index: {}]   ;;  %s9867_s10 = inlined_call_operand.hbm [shape: f32[2,1,1,128], index: 10, kind: output, shape index: {}]  }
   0x1   :  { %9988 = sst [smem:[#allocation59_spill]] %s9857_s0 }
   0x2   :  { %9989 = sst [smem:[#allocation60_spill]] %s9861_s4 }
   0x3   :  { %9990 = sst [smem:[#allocation61_spill]] %s9864_s7 }
   0x4   :  { %9991 = sst [smem:[#allocation62_spill]] %s9867_s10 }
   0x5   :  { %15 = vsyncpa [#allocation5], 0 }
   0x6   :  { %16 = vsyncpa [#allocation3], 0 }
   0x7   :  { %18 = vsyncpa [#allocation3 + $0x1], 0 }
   0x8   :  { %19 = vsyncpa [#allocation4], 0 }
   0x9   :  { %21 = vsyncpa [#allocation4 + $0x1], 0  ;;  %s6369_s13 = smov 0   ;;  %s6371_s14 = smov 0  }
   0xa   :  { %s6373_s15 = smov 0   ;;  %s6375_s16 = smov 0  }
   0xb   :  { %s6377_s17 = smov 0   ;;  %s6379_s18 = smov 0  }
   0xc LB: > { %9992 = sst [smem:[#allocation11_spill]] %s6278_s13  ;;  %s5506_s19 = sadd.s32 4294967295, %s6298_s18   ;;  %s6298_s18 = sphi %s6379_s18, %s27_s18   ;;  %s6294_s17 = sphi %s6377_s17, %s10245_s17   ;;  %s6290_s16 = sphi %s6375_s16, %s10244_s16   ;;  %s6286_s15 = sphi %s6373_s15, %s10243_s15   ;;  %s6282_s14 = sphi %s6371_s14, %s10242_s14   ;;  %s6278_s13 = sphi %s6369_s13, %s10241_s13  }
   0xd   : > { %9993 = sst [smem:[#allocation12_spill]] %s6298_s18  ;;  %s5507_s20 = sadd.s32 4294967294, %s6298_s18  }
   0xe   : > { %p186_p0 = scmp.ne.s32.totalorder %s6286_s15, %s6282_s14  ;;  %p187_p1 = scmp.eq.s32.totalorder %s6298_s18, 0 }
   0xf   : > { %p192_p2 = scmp.ne.s32.totalorder %s6282_s14, %s6278_s13  ;;  %p6407_p3 = scmp.eq.s32.totalorder %s5506_s19, 0 }
  0x10   : > { %p322_p4 = scmp.eq.s32.totalorder %s5506_s19, 1  ;;  %p6411_p5 = por %p187_p1, %p186_p0 }
  0x11   : > { %p328_p6 = scmp.eq.s32.totalorder %s5507_s20, 1  ;;  %p6417_p7 = por %p6407_p3, %p192_p2 }
  0x12   : > { %p6421_p8 = por %p322_p4, %p186_p0  ;;  %p5508_p10 = scmp.ge.s32.totalorder %s6298_s18, 1 }
  0x13   : > { %p6425_p9 = por %p328_p6, %p192_p2  ;;  %p335_p11 = scmp.lt.s32.totalorder %s6298_s18, 3 }
  0x14   : > { %s9997_s25 = scalar_select %p6421_p8, 1, 0 }
  0x15   : > { %s9999_s26 = scalar_select %p6425_p9, 1, 0 }
  0x16   : > { %9998 = sst [smem:[#allocation13_spill]] %s9997_s25  ;;  %p6434_p12 = pnand %p5508_p10, %p335_p11 }
  0x17   : > { %10000 = sst [smem:[#allocation14_spill]] %s9999_s26  ;;  %p5856_p0 = scmp.lt.s32.totalorder %s6298_s18, 2 }
  0x18   : > { %s10001_s0 = sld [smem:[#allocation59_spill]]  ;;  %p5843_p1 = pneg %p6434_p12 }
  0x19   : > { %p6444_p2 = pnand %p5856_p0, %p6411_p5  ;;  %s39_s19 = sadd.s32 1, %s6294_s17 }
  0x1a   : > { %p6450_p4 = pnand %p5843_p1, %p6407_p3  ;;  %p6455_p6 = scmp.ge.s32.totalorder %s39_s19, 2 }
  0x1b   : > { %s397_s27 = sand.u32 1, %s6286_s15  }
  0x1c   : > { %p6173_p11 = pneg %p6450_p4 }
  0x1e   : > { %s348_s29 = sshll.u32 %s10001_s0, 4  ;;  %s349_s29 = int_to_ptr.vmem [resolvable:$true] %s348_s29 }
  0x1f   : > { %s6171_s28 = scalar_lea.vmem %s349_s29, 32  ;;  %p6179_p13 = scmp.lt.s32.totalorder %s349_s29, %s349_s29 }
  0x20   : > { %p6172_p10 = scmp.ne.s32.totalorder %s349_s29, %s6171_s28  ;;  %p6180_p9 = scmp.lt.s32.totalorder %s6171_s28, %s6171_s28 }
  0x22   : > { %p6174_p5 = pnand %p6173_p11, %p6172_p10  ;;  %p6181_p8 = por %p6180_p9, %p6179_p13 }
  0x24   : > { %p6175_p0 = pneg %p6174_p5 }
  0x26   : > { %p6182_p1 = pnand %p6181_p8, %p6175_p0 }
  0x28   : > { %6185 = shalt.err (!%p6182_p1)
}
  0x29   : > { %s6300_s23 = smov [#allocation2]   ;;  %s10247_s19 = smov (%p6455_p6, %s39_s19), 0 }
  0x2a   : > { %5846 = dma.vmem_to_smem (!%p6450_p4), %s349_s29, 32, %s6300_s23, [#allocation5]  }
  0x2b   : > { %s5511_s21 = sshll.u32 %s397_s27, 7  ;;  %s176_s0 = ssub.s32 %s6294_s17, %s10247_s19 }
  0x2c   : > { %p177_p10 = scmp.eq.s32.totalorder %s176_s0, 0  ;;  %s5648_s28 = sshll.u32 %s6294_s17, 11 }
  0x2d   : > { %s407_s13 = scalar_lea.hbm %s9862_s5, %s5648_s28  ;;  %s401_s12 = scalar_lea.vmem [#allocation6], %s5511_s21 }
  0x2e   : > { %s408_s10 = sshll.u32 %s401_s12, 4  ;;  %s10006_s25 = sadd.s32 1, %s6286_s15  ;;  %s409_s10 = int_to_ptr.vmem [resolvable:$true] %s408_s10 }
  0x2f   : > { %s6477_s7 = scalar_select %p177_p10, %s6286_s15, %s10006_s25  }
  0x30   : > { %s398_s4 = scalar_lea.sflag [#allocation3], %s397_s27  ;;  %p6188_p8 = pneg %p6444_p2 }
  0x31   : > { %s6199_s29 = scalar_lea.vmem %s409_s10, 2048  ;;  %s6301_s20 = smov [#allocation6]  }
  0x32   : > { %p6200_p9 = scmp.ne.s32.totalorder %s409_s10, %s6199_s29  ;;  %s6204_s0 = sshll.u32 %s6301_s20, 4  ;;  %s6205_s0 = int_to_ptr.vmem [resolvable:$false] %s6204_s0 }
  0x33   : > { %s6206_s23 = scalar_lea.vmem %s6205_s0, 4096  ;;  %p6207_p6 = scmp.lt.s32.totalorder %s409_s10, %s6205_s0 }
  0x34   : > { %p6202_p13 = pnand %p6200_p9, %p6188_p8  ;;  %p6208_p11 = scmp.lt.s32.totalorder %s6206_s23, %s6199_s29 }
  0x36   : > { %p6203_p4 = pneg %p6202_p13  ;;  %p6209_p5 = por %p6208_p11, %p6207_p6 }
  0x38   : > { %p6210_p0 = pnand %p6209_p5, %p6203_p4 }
  0x3a   : > { %6213 = shalt.err (!%p6210_p0)
}
  0x3b   : > { %s6302_s18 = smov 128   ;;  %s6303_s21 = smov 8  }
  0x3c   : > { %5850 = dma.hbm_to_vmem [thread:$0]  (!%p6444_p2), %s407_s13, 2048, %s409_s10, %s398_s4, %s6302_s18, %s6302_s18, %s6303_s21  }
  0x3d   : > { %449 = sbr.rel (%p6434_p12) target bundleno = 1229 (0x4cd), region = 60 }
  0x42   : > { %6265 = dma.done.wait (%p6407_p3), [#allocation5], 32  }
  0x43   : > { %6267 = vsyncadd (%p6407_p3), [#allocation5], 4294967264  ;;  %s6490_s25 = sand.u32 1, %s6282_s14  }
  0x44   : > { %s5516_s26 = sshll.u32 %s6490_s25, 7  ;;  %s456_s27 = scalar_lea.sflag [#allocation3], %s6490_s25 }
  0x45   : > { %s6494_s28 = scalar_lea.vmem [#allocation6], %s5516_s26 }
  0x46   : > { %6269 = dma.done.wait (%p6417_p7), %s456_s27, 2048  }
  0x47   : > { %6271 = vsyncadd (%p6417_p7), %s456_s27, 4294965248 }
  0x48   : > { %464 = sfence }
  0x49   : > { %p539_p3 = scmp.lt.s32.totalorder %s6290_s16, 1  ;;  %v6502_v0 = vld [vmem:[%s6494_s28] sm:$0xff]  ;;  %v6304_v1 = vmov 1   ;;  %v6305_v2 = vmov 0   ;;  %v6306_v25 = vmov 2   ;;  %v6663_v57 = vld [vmem:[%s6494_s28 + $0x8] sm:$0xff] }
  0x4a   : > { %5920 = vset.pattern.permute.xlu1 %v6304_v1  ;;  %5919 = vset.pattern.permute.xlu0 %v6305_v2  ;;  %v704_v3 = vadd.f32 %v6502_v0, %v6502_v0  ;;  %v6512_v4 = vld [vmem:[%s6494_s28 + $0x40] sm:$0xff]  ;;  %v6668_v58 = vld [vmem:[%s6494_s28 + $0x10] sm:$0xff]  ;;  %v705_v61 = vadd.f32 %v6663_v57, %v6663_v57  ;;  %s10230_s21 = sld [smem:[#allocation60_spill]] }
  0x4b   : > { %s6509_s4 = scalar_select %p539_p3, %s6290_s16, 1  ;;  %v712_v5 = vadd.f32 %v6512_v4, %v6512_v4 }
  0x4c   : > { %5714 = vmatprep.mubr.f32.mxu0 %v704_v3  ;;  %v706_v3 = vadd.f32 %v6668_v58, %v6668_v58 }
  0x4d   : > { %s5770_s10 = smul.u32 120, %s6509_s4  ;;  %s5649_s13 = sshll.u32 %s6509_s4, 7  ;;  %5726 = vmatprep.mubr.f32.mxu1 %v712_v5  ;;  %v6685_v5 = vld [vmem:[%s6494_s28 + $0x18] sm:$0xff] }
  0x4e   : > { %s6521_s30 = scalar_lea.vmem %s9858_s1, %s5649_s13  ;;  %s5521_s20 = sshll.u32 %s6509_s4, 2 }
  0x4f   : > { %s6528_s29 = scalar_lea.vmem %s9863_s6, %s5770_s10  ;;  %v6531_v6 = vld [vmem:[%s6521_s30 + $0x78] sm:$0xff]  ;;  %v6538_v8 = vld [vmem:[%s6521_s30 + $0x70] sm:$0xff]  ;;  %v6548_v10 = vld [vmem:[%s6521_s30 + $0x68] sm:$0xff]  ;;  %s578_s18 = scalar_lea.vmem %s9865_s8, %s5521_s20 }
  0x50   : > { %v6534_v7 = vld [vmem:[%s6528_s29] sm:$0xff]  ;;  %5682 = vmatprep.subr.mxu0 %v6531_v6  ;;  %5738 = vmatprep.subr.mxu1 %v6531_v6  ;;  %v1651_v9 = vld [vmem:[%s6528_s29 + $0x8] sm:$0xff]  ;;  %v6557_v12 = vld [vmem:[%s6528_s29 + $0x10] sm:$0xff]  ;;  %v680_v55 = vmul.f32 %v6548_v10, %v6548_v10  ;;  %v681_v59 = vmul.f32 %v6538_v8, %v6538_v8  ;;  %v682_v62 = vmul.f32 %v6531_v6, %v6531_v6  ;;  %s7557_s27 = scalar_lea.vmem %s9866_s9, %s6509_s4  ;;  %s8657_s12 = scalar_lea.vmem %s9859_s2, %s6509_s4 }
  0x51   : > { %1762 = vperm.xlu1 %5920, %v6534_v7   ;;  %1669 = vperm.xlu0 %5919, %v6534_v7   ;;  %v6554_v11 = vld [vmem:[%s6521_s30 + $0x60] sm:$0xff]  ;;  %v6565_v13 = vld [vmem:[%s6521_s30 + $0x58] sm:$0xff]  ;;  %v6569_v14 = vld [vmem:[%s6521_s30 + $0x8] sm:$0xff]  ;;  %s558_s0 = scalar_lea.vmem %s9860_s3, %s6509_s4  ;;  %s564_s26 = scalar_lea.vmem %s10230_s21, %s6509_s4 }
  0x52   : > { %5683 = vmatpush3.msra.mxu0 %v6531_v6  ;;  %5754 = vmatpush3.msra.mxu1 %v6531_v6  ;;  %v6574_v15 = vld [vmem:[%s6521_s30 + $0x10] sm:$0xff]  ;;  %v668_v16 = vmul.f32 %v6569_v14, %v6569_v14  ;;  %v6579_v17 = vld [vmem:[%s6521_s30] sm:$0xff]  ;;  %v6582_v18 = vld [vmem:[%s6528_s29 + $0x28] sm:$0xff]  ;;  %v678_v51 = vmul.f32 %v6565_v13, %v6565_v13  ;;  %v679_v53 = vmul.f32 %v6554_v11, %v6554_v11  ;;  %s10232_s4 = sld [smem:[#allocation13_spill]] }
  0x53   : > { %5684 = vmatprep.subr.mxu0 %v6538_v8  ;;  %5739 = vmatprep.subr.mxu1 %v6538_v8  ;;  %v669_v19 = vmul.f32 %v6574_v15, %v6574_v15  ;;  %v667_v20 = vmul.f32 %v6579_v17, %v6579_v17  ;;  %v596_v21 = vld [vmem:[%s6521_s30 + $0x50] sm:$0xff]  ;;  %v6594_v22 = vld [vmem:[%s6521_s30 + $0x18] sm:$0xff]  ;;  %v595_v26 = vld [vmem:[%s6521_s30 + $0x48] sm:$0xff] }
  0x54   : > { %5685 = vmatpush3.msra.mxu0 %v6538_v8  ;;  %5755 = vmatpush3.msra.mxu1 %v6538_v8  ;;  %v670_v23 = vmul.f32 %v6594_v22, %v6594_v22  ;;  %v6604_v27 = vld [vmem:[%s6521_s30 + $0x20] sm:$0xff]  ;;  %v6607_v28 = vld [vmem:[%s6528_s29 + $0x30] sm:$0xff]  ;;  %v6613_v32 = vld [vmem:[%s6521_s30 + $0x28] sm:$0xff]  ;;  %v676_v46 = vmul.f32 %v595_v26, %v595_v26  ;;  %v677_v49 = vmul.f32 %v596_v21, %v596_v21 }
  0x55   : > { %1766 = vperm.xlu1 %5920, %v1651_v9   ;;  %1674 = vperm.xlu0 %5919, %v1651_v9   ;;  %v683_v24 = vadd.f32 %v668_v16, %v667_v20  ;;  %v671_v29 = vmul.f32 %v6604_v27, %v6604_v27  ;;  %v594_v31 = vld [vmem:[%s6521_s30 + $0x40] sm:$0xff]  ;;  %v6616_v33 = vld [vmem:[%s6528_s29 + $0x18] sm:$0xff]  ;;  %v672_v34 = vmul.f32 %v6613_v32, %v6613_v32  ;;  %v6623_v37 = vld [vmem:[%s6521_s30 + $0x30] sm:$0xff] }
  0x56   : > { %5686 = vmatprep.subr.mxu0 %v6548_v10  ;;  %5740 = vmatprep.subr.mxu1 %v6548_v10  ;;  %v593_v36 = vld [vmem:[%s6521_s30 + $0x38] sm:$0xff]  ;;  %v6627_v38 = vld [vmem:[%s6528_s29 + $0x50] sm:$0xff]  ;;  %v673_v39 = vmul.f32 %v6623_v37, %v6623_v37  ;;  %v675_v44 = vmul.f32 %v594_v31, %v594_v31  ;;  %v6644_v48 = vld [vmem:[%s6528_s29 + $0x20] sm:$0xff]  ;;  %v707_v8 = vadd.f32 %v6685_v5, %v6685_v5  ;;  %s5645_s30 = sshll.u32 %s6290_s16, 4 }
  0x57   : > { %5687 = vmatpush3.msra.mxu0 %v6548_v10  ;;  %5756 = vmatpush3.msra.mxu1 %v6548_v10  ;;  %v684_v30 = vadd.f32 %v683_v24, %v669_v19  ;;  %v674_v41 = vmul.f32 %v593_v36, %v593_v36  ;;  %v6634_v43 = vld [vmem:[%s6528_s29 + $0x58] sm:$0xff]  ;;  %v6729_v20 = vld [vmem:[%s6494_s28 + $0x48] sm:$0xff] }
  0x58   : > { %5688 = vmatprep.subr.mxu0 %v6554_v11  ;;  %5741 = vmatprep.subr.mxu1 %v6554_v11  ;;  %v6716_v16 = vld [vmem:[%s6494_s28 + $0x38] sm:$0xff]  ;;  %p10235_p12 = scmp.ne.s32.totalorder %s10232_s4, 0 }
  0x59   : > { %1770 = vperm.xlu1 %5920, %v6557_v12   ;;  %1679 = vperm.xlu0 %5919, %v6557_v12   ;;  %v685_v35 = vadd.f32 %v684_v30, %v670_v23  ;;  %v711_v19 = vadd.f32 %v6716_v16, %v6716_v16  ;;  %v6747_v24 = vld [vmem:[%s6494_s28 + $0x58] sm:$0xff]  ;;  %v1659_v30 = vld [vmem:[%s6528_s29 + $0x48] sm:$0xff] }
  0x5a   : > { %5689 = vmatpush3.msra.mxu0 %v6554_v11  ;;  %5757 = vmatpush3.msra.mxu1 %v6554_v11  ;;  %v6703_v11 = vld [vmem:[%s6494_s28 + $0x28] sm:$0xff] }
  0x5b   : > { %5690 = vmatprep.subr.mxu0 %v6565_v13  ;;  %5742 = vmatprep.subr.mxu1 %v6565_v13  ;;  %v686_v40 = vadd.f32 %v685_v35, %v671_v29  ;;  %v6760_v29 = vld [vmem:[%s6494_s28 + $0x68] sm:$0xff] }
  0x5c   : > { %5691 = vmatpush3.msra.mxu0 %v6565_v13  ;;  %5758 = vmatpush3.msra.mxu1 %v6565_v13  ;;  %v709_v13 = vadd.f32 %v6703_v11, %v6703_v11 }
  0x5d   : > { %5921 = vset.pattern.permute.xlu1 %v6306_v25  ;;  %1694 = vperm.xlu0 %5919, %v6582_v18   ;;  %v687_v42 = vadd.f32 %v686_v40, %v672_v34  ;;  %v1663_v34 = vld [vmem:[%s6528_s29 + $0x68] sm:$0xff]  ;;  %v624_v40 = vmul.f32 %v6703_v11, %v6703_v11 }
  0x5e   : > { %1860 = vperm.xlu1 %5921, %v1651_v9   ;;  %5692 = vmatprep.subr.mxu0 %v596_v21 }
  0x5f   : > { %5693 = vmatpush3.msra.mxu0 %v596_v21  ;;  %5743 = vmatprep.subr.mxu1 %v596_v21  ;;  %v688_v45 = vadd.f32 %v687_v42, %v673_v39  ;;  %v620_v39 = vmul.f32 %v6663_v57, %v6663_v57  ;;  %v1742_v42 = vlaneseq }
  0x60   : > { %5694 = vmatprep.subr.mxu0 %v595_v26  ;;  %5759 = vmatpush3.msra.mxu1 %v596_v21  ;;  %v6733_v21 = vld [vmem:[%s6494_s28 + $0x50] sm:$0xff] }
  0x61   : > { %1699 = vperm.xlu0 %5919, %v6607_v28   ;;  %5695 = vmatpush3.msra.mxu0 %v595_v26  ;;  %v689_v47 = vadd.f32 %v688_v45, %v674_v41  ;;  %v714_v23 = vadd.f32 %v6733_v21, %v6733_v21  ;;  %v628_v41 = vmul.f32 %v6729_v20, %v6729_v20 }
  0x62   : > { %5922 = vset.pattern.permute.xlu1 %v6305_v2  ;;  %5696 = vmatprep.subr.mxu0 %v594_v31 }
  0x63   : > { %1684 = vperm.xlu1 %5922, %v6616_v33   ;;  %5697 = vmatpush3.msra.mxu0 %v594_v31  ;;  %v690_v50 = vadd.f32 %v689_v47, %v675_v44  ;;  %v1743_v44 = vshrl.u32 %v1742_v42, 7  ;;  %v9885_v42 = vmov 2475754826  }
  0x64   : > { %5698 = vmatprep.subr.mxu0 %v593_v36  ;;  %5744 = vmatprep.subr.mxu1 %v595_v26 }
  0x65   : > { %1719 = vperm.xlu0 %5919, %v6627_v38   ;;  %5699 = vmatpush3.msra.mxu0 %v593_v36  ;;  %v691_v52 = vadd.f32 %v690_v50, %v676_v46  ;;  %v1823_v47 = vsub.s32 1, %v1743_v44  ;;  %v1665_v50 = vld [vmem:[%s578_s18] sm:$0x7]  ;;  %s10233_s18 = sld [smem:[#allocation62_spill]] }
  0x66   : > { %5700 = vmatprep.subr.mxu0 %v6623_v37  ;;  %5760 = vmatpush3.msra.mxu1 %v595_v26  ;;  %v6751_v26 = vld [vmem:[%s6494_s28 + $0x60] sm:$0xff] }
  0x67   : > { %5923 = vset.pattern.permute.xlu1 %v6306_v25  ;;  %5701 = vmatpush3.msra.mxu0 %v6623_v37  ;;  %v692_v54 = vadd.f32 %v691_v52, %v677_v49 }
  0x68   : > { %1864 = vperm.xlu1 %5923, %v6557_v12   ;;  %5702 = vmatprep.subr.mxu0 %v6613_v32  ;;  %v6709_v12 = vld [vmem:[%s6494_s28 + $0x30] sm:$0xff] }
  0x69   : > { %1724 = vperm.xlu0 %5919, %v6634_v43   ;;  %5703 = vmatpush3.msra.mxu0 %v6613_v32  ;;  %v693_v56 = vadd.f32 %v692_v54, %v678_v51  ;;  %v1917_v51 = vsub.s32 2, %v1743_v44 }
  0x6a   : > { %5704 = vmatprep.subr.mxu0 %v6604_v27  ;;  %5745 = vmatprep.subr.mxu1 %v594_v31 }
  0x6b   : > { %5705 = vmatpush3.msra.mxu0 %v6604_v27  ;;  %5761 = vmatpush3.msra.mxu1 %v594_v31  ;;  %v694_v60 = vadd.f32 %v693_v56, %v679_v53  ;;  %v717_v31 = vadd.f32 %v6760_v29, %v6760_v29  ;;  %v6815_v53 = vrot.slane %v1665_v50, %v1823_v47  ;;  %s10234_s21 = smov %s10233_s18 }
  0x6c   : > { %5924 = vset.pattern.permute.xlu1 %v6305_v2  ;;  %5706 = vmatprep.subr.mxu0 %v6594_v22 }
  0x6d   : > { %1689 = vperm.xlu1 %5924, %v6644_v48   ;;  %5937 = vset.pattern.permute.xlu0 %v6306_v25  ;;  %v695_v63 = vadd.f32 %v694_v60, %v680_v55  ;;  %v6821_v60 = vrot.slane %v1665_v50, %v1917_v51  ;;  %v9893_v51 = vmov 1326507024  }
  0x6e   : > { %1856 = vperm.xlu0 %5937, %v6534_v7   ;;  %5707 = vmatpush3.msra.mxu0 %v6594_v22  ;;  %v6690_v7 = vld [vmem:[%s6494_s28 + $0x20] sm:$0xff] }
  0x6f   : > { %5708 = vmatprep.subr.mxu0 %v6574_v15  ;;  %5746 = vmatprep.subr.mxu1 %v593_v36  ;;  %v696_v6 = vadd.f32 %v695_v63, %v681_v59  ;;  %v708_v10 = vadd.f32 %v6690_v7, %v6690_v7 }
  0x70   : > { %5709 = vmatpush3.msra.mxu0 %v6574_v15  ;;  %5762 = vmatpush3.msra.mxu1 %v593_v36  ;;  %v1664_v36 = vld [vmem:[%s6528_s29 + $0x70] sm:$0xff] }
  0x71   : > { %5925 = vset.pattern.permute.xlu1 %v6306_v25  ;;  %5710 = vmatprep.subr.mxu0 %v6569_v14  ;;  %v6697_v9 = vadd.f32 %v696_v6, %v682_v62 }
  0x72   : > { %1868 = vperm.xlu1 %5925, %v6616_v33   ;;  %1876 = vperm.xlu0 %5937, %v6582_v18  }
  0x73   : > { %5711 = vmatpush3.msra.mxu0 %v6569_v14  ;;  %5747 = vmatprep.subr.mxu1 %v6623_v37  ;;  %10007 = vst [vmem:[#allocation15_spill] sm:$0xff] %v6697_v9 }
  0x74   : > { %5712 = vmatprep.subr.mxu0 %v6579_v17  ;;  %5763 = vmatpush3.msra.mxu1 %v6623_v37  ;;  %v1662_v37 = vld [vmem:[%s6528_s29 + $0x60] sm:$0xff] }
  0x75   : > { %5713 = vmatpush3.msra.mxu0 %v6579_v17  ;;  %5748 = vmatprep.subr.mxu1 %v6613_v32 }
  0x76   : > { %5926 = vset.pattern.permute.xlu1 %v6304_v1  ;;  %1880 = vperm.xlu0 %5937, %v6607_v28  }
  0x77   : > { %1782 = vperm.xlu1 %5926, %v6582_v18   ;;  %5715 = vmatmul.mubr.f32.vlgmr.msra.gmra.mxu0 %v705_v61  ;;  %v710_v18 = vadd.f32 %v6709_v12, %v6709_v12 }
  0x78   : > { %5717 = vmatprep.mubr.f32.mxu0 %v706_v3  ;;  %5764 = vmatpush3.msra.mxu1 %v6613_v32 }
  0x79   : > { %5749 = vmatprep.subr.mxu1 %v6604_v27 }
  0x7a   : > { %1896 = vperm.xlu0 %5937, %v6627_v38   ;;  %5765 = vmatpush3.msra.mxu1 %v6604_v27  ;;  %v715_v27 = vadd.f32 %v6747_v24, %v6747_v24 }
  0x7b   : > { %5927 = vset.pattern.permute.xlu1 %v6306_v25  ;;  %5718 = vmatmul.mubr.f32.gmra.mxu0 %v707_v8 }
  0x7c   : > { %1872 = vperm.xlu1 %5927, %v6644_v48   ;;  %5720 = vmatprep.mubr.f32.mxu0 %v708_v10 }
  0x7d   : > { %5750 = vmatprep.subr.mxu1 %v6594_v22 }
  0x7e   : > { %1900 = vperm.xlu0 %5937, %v6634_v43   ;;  %5766 = vmatpush3.msra.mxu1 %v6594_v22  ;;  %v1657_v22 = vld [vmem:[%s6528_s29 + $0x38] sm:$0xff] }
  0x7f   : > { %5721 = vmatmul.mubr.f32.gmra.mxu0 %v709_v13  ;;  %5751 = vmatprep.subr.mxu1 %v6574_v15 }
  0x80   : > { %5928 = vset.pattern.permute.xlu1 %v6304_v1  ;;  %5767 = vmatpush3.msra.mxu1 %v6574_v15  ;;  %v713_v15 = vadd.f32 %v6729_v20, %v6729_v20 }
  0x81   : > { %1786 = vperm.xlu1 %5928, %v6607_v28   ;;  %5723 = vmatprep.mubr.f32.mxu0 %v710_v18  ;;  %v716_v28 = vadd.f32 %v6751_v26, %v6751_v26 }
  0x82   : > { %5941 = vset.pattern.permute.xlu0 %v6304_v1  ;;  %5752 = vmatprep.subr.mxu1 %v6569_v14 }
  0x83   : > { %1774 = vperm.xlu0 %5941, %v6616_v33   ;;  %5724 = vmatmul.mubr.f32.gmra.mxu0 %v711_v19  ;;  %v6772_v33 = vld [vmem:[%s6494_s28 + $0x78] sm:$0xff] }
  0x84   : > { %5768 = vmatpush3.msra.mxu1 %v6569_v14  ;;  %v1658_v14 = vld [vmem:[%s6528_s29 + $0x40] sm:$0xff]  ;;  %v719_v35 = vadd.f32 %v6772_v33, %v6772_v33  ;;  %v634_v52 = vmul.f32 %v6772_v33, %v6772_v33  ;;  %v619_v33 = vmul.f32 %v6502_v0, %v6502_v0 }
  0x85   : > { %5929 = vset.pattern.permute.xlu1 %v6305_v2  ;;  %5753 = vmatprep.subr.mxu1 %v6579_v17 }
  0x86   : > { %1704 = vperm.xlu1 %5929, %v1657_v22   ;;  %5769 = vmatpush3.msra.mxu1 %v6579_v17  ;;  %v6764_v17 = vld [vmem:[%s6494_s28 + $0x70] sm:$0xff]  ;;  %s5522_s28 = sshll.u32 %s6290_s16, 7 }
  0x87   : > { %1778 = vperm.xlu0 %5941, %v6644_v48   ;;  %5727 = vmatmul.mubr.f32.vlgmr.msra.gmra.mxu1 %v713_v15  ;;  %v718_v32 = vadd.f32 %v6764_v17, %v6764_v17  ;;  %v1744_v48 = vsub.s32 0, %v1743_v44  ;;  %s584_s13 = sadd.s32 1, %s5522_s28  ;;  %s8597_s24 = sld [smem:[#allocation2 + %s5522_s28]] }
  0x88   : > { %5729 = vmatprep.mubr.f32.mxu1 %v714_v23  ;;  %s8489_s22 = sld [smem:[#allocation2 + %s584_s13]] }
  0x89   : > { %v6817_v54 = vrot.slane %v1665_v50, %v1744_v48  ;;  %s10231_s13 = sld [smem:[#allocation61_spill]] }
  0x8a   : > { %5930 = vset.pattern.permute.xlu1 %v6304_v1 }
  0x8b   : > { %1790 = vperm.xlu1 %5930, %v1657_v22   ;;  %1794 = vperm.xlu0 %5941, %v1658_v14  }
  0x8c   : > { %5730 = vmatmul.mubr.f32.gmra.mxu1 %v715_v27 }
  0x8d   : > { %5732 = vmatprep.mubr.f32.mxu1 %v716_v28 }
  0x8f   : > { %5931 = vset.pattern.permute.xlu1 %v6305_v2  ;;  %1798 = vperm.xlu0 %5941, %v1659_v30  }
  0x90   : > { %1709 = vperm.xlu1 %5931, %v1658_v14   ;;  %5733 = vmatmul.mubr.f32.gmra.mxu1 %v717_v31 }
  0x91   : > { %5735 = vmatprep.mubr.f32.mxu1 %v718_v32 }
  0x93   : > { %1814 = vperm.xlu0 %5941, %v1663_v34  }
  0x94   : > { %5932 = vset.pattern.permute.xlu1 %v6306_v25  ;;  %5736 = vmatmul.mubr.f32.gmra.mxu1 %v719_v35 }
  0x95   : > { %1884 = vperm.xlu1 %5932, %v1657_v22  }
  0x97   : > { %1818 = vperm.xlu0 %5941, %v1664_v36  }
  0x99   : > { %5933 = vset.pattern.permute.xlu1 %v6305_v2 }
  0x9a   : > { %1714 = vperm.xlu1 %5933, %v1659_v30  }
  0x9b   : > { %5946 = vset.pattern.permute.xlu0 %v6306_v25 }
  0x9c   : > { %1912 = vperm.xlu0 %5946, %v1664_v36  }
  0x9e   : > { %5934 = vset.pattern.permute.xlu1 %v6306_v25 }
  0x9f   : > { %1888 = vperm.xlu1 %5934, %v1658_v14  }
  0xa3   : > { %5935 = vset.pattern.permute.xlu1 %v6304_v1 }
  0xa4   : > { %1802 = vperm.xlu1 %5935, %v6627_v38   ;;  %v622_v38 = vmul.f32 %v6685_v5, %v6685_v5 }
  0xa8   : > { %5936 = vset.pattern.permute.xlu1 %v6306_v25 }
  0xa9   : > { %1892 = vperm.xlu1 %5936, %v1659_v30  }
  0xad   : > { %5938 = vset.pattern.permute.xlu1 %v6304_v1 }
  0xae   : > { %1806 = vperm.xlu1 %5938, %v6634_v43   ;;  %v630_v43 = vmul.f32 %v6747_v24, %v6747_v24 }
  0xb2   : > { %5939 = vset.pattern.permute.xlu1 %v6305_v2 }
  0xb3   : > { %1729 = vperm.xlu1 %5939, %v1662_v37  }
  0xb7   : > { %5940 = vset.pattern.permute.xlu1 %v6304_v1  ;;  %v626_v1 = vmul.f32 %v6716_v16, %v6716_v16 }
  0xb8   : > { %1810 = vperm.xlu1 %5940, %v1662_v37  }
  0xbb   : > { %637 = vadd.xlane.f32.xlu0 %v620_v39  ;;  %v6855_v39 = vmul.f32 %v6690_v7, %v6690_v7 }
  0xbc   : > { %5942 = vset.pattern.permute.xlu1 %v6305_v2 }
  0xbd   : > { %1734 = vperm.xlu1 %5942, %v1663_v34  }
  0xbf   : > { %641 = vadd.xlane.f32.xlu0 %v622_v38 }
  0xc1   : > { %5943 = vset.pattern.permute.xlu1 %v6306_v25 }
  0xc2   : > { %1904 = vperm.xlu1 %5943, %v1662_v37  }
  0xc3   : > { %645 = vadd.xlane.f32.xlu0 %v624_v40  ;;  %v9880_v40 = vmov 683565275  }
  0xc6   : > { %5944 = vset.pattern.permute.xlu1 %v6305_v2  ;;  %v632_v2 = vmul.f32 %v6760_v29, %v6760_v29 }
  0xc7   : > { %1739 = vperm.xlu1 %5944, %v1664_v36   ;;  %649 = vadd.xlane.f32.xlu0 %v626_v1 }
  0xcb   : > { %5945 = vset.pattern.permute.xlu1 %v6306_v25  ;;  %653 = vadd.xlane.f32.xlu0 %v628_v41 }
  0xcc   : > { %1908 = vperm.xlu1 %5945, %v1663_v34   ;;  %v1763_v45 = vpop.permute.xlu1 %1762  ;;  %v1670_v46 = vpop.permute.xlu0 %1669  ;;  %v621_v34 = vmul.f32 %v6668_v58, %v6668_v58 }
  0xcd   : > { %v1825_v35 = vmul.f32 %v6815_v53, %v1763_v45  ;;  %v1746_v36 = vmul.f32 %v6817_v54, %v1670_v46  ;;  %v9889_v45 = vmov 2102212464  }
  0xcf   : > { %657 = vadd.xlane.f32.xlu0 %v630_v43  ;;  %v9883_v43 = vmov 2131351028  }
  0xd0   : > { %v1767_v25 = vpop.permute.xlu1 %1766  ;;  %v1675_v49 = vpop.permute.xlu0 %1674 }
  0xd1   : > { %v1826_v57 = vmul.f32 %v6815_v53, %v1767_v25  ;;  %v1747_v59 = vmul.f32 %v6817_v54, %v1675_v49 }
  0xd3   : > { %661 = vadd.xlane.f32.xlu0 %v632_v2  ;;  %v1841_v63 = vadd.f32 %v1826_v57, %v1747_v59  ;;  %v9891_v2 = vmov 920167782  }
  0xd4   : > { %v1771_v55 = vpop.permute.xlu1 %1770  ;;  %v1680_v56 = vpop.permute.xlu0 %1679 }
  0xd5   : > { %v1827_v13 = vmul.f32 %v6815_v53, %v1771_v55  ;;  %v1748_v16 = vmul.f32 %v6817_v54, %v1680_v56 }
  0xd7   : > { %665 = vadd.xlane.f32.xlu0 %v634_v52  ;;  %v1842_v23 = vadd.f32 %v1827_v13, %v1748_v16 }
  0xd8   : > { %v6823_v61 = vpop.permute.xlu0 %1694 }
  0xd9   : > { %v1861_v62 = vpop.permute.xlu1 %1860 }
  0xda   : > { %v1920_v3 = vmul.f32 %v6821_v60, %v1861_v62 }
  0xdc   : > { %v6826_v5 = vadd.f32 %v1920_v3, %v1841_v63  ;;  %v6828_v6 = vpop.permute.xlu0 %1699 }
  0xde   : > { %v9879_v8 = vand.u32 2147483647, %v6826_v5  ;;  %v2055_v10 = vand.u32 2139095040, %v6826_v5  ;;  %v6832_v11 = vpop.permute.xlu1 %1684 }
  0xe0   : > { %v2056_v18 = vshrl.u32 %v2055_v10, 23  ;;  %v2059_v19 = vand.u32 8388607, %v9879_v8  ;;  %v6838_v22 = vpop.permute.xlu0 %1719 }
  0xe2   : > { %v5528_v20 = vadd.s32 4294967169, %v2056_v18  ;;  %v2060_v27 = vor.u32 8388608, %v2059_v19 }
  0xe3   : > { %v1865_v15 = vpop.permute.xlu1 %1864 }
  0xe4   : > { %v2062_v24 = vadd.s32 1, %v5528_v20  ;;  %v1921_v14 = vmul.f32 %v6821_v60, %v1865_v15  ;;  %v6843_v32 = vpop.permute.xlu0 %1724  ;;  %v6851_v37 = vshll.u32 %v2060_v27, 8 }
  0xe6   : > { %vm2063_vm0 = vcmp.gt.s32.totalorder %v2062_v24, 0  ;;  %v6841_v28 = vadd.f32 %v1921_v14, %v1842_v23 }
  0xe7   : > { %v2064_v29 = vsel %vm2063_vm0, %v2062_v24, 0 }
  0xe8   : > { %v2065_v30 = vshrl.u32 %v2064_v29, 5  ;;  %v2066_v31 = vand.u32 31, %v2064_v29  ;;  %v9878_v41 = vand.u32 2147483647, %v6841_v28  ;;  %v2158_v0 = vand.u32 2139095040, %v6841_v28 }
  0xe9   : > { %v1857_v62 = vpop.permute.xlu0 %1856 }
  0xea   : > { %v2067_v38 = vsub.s32 32, %v2066_v31  ;;  %v2069_v1 = vshll.u32 %v9880_v40, %v2066_v31  ;;  %v2072_v58 = vshll.u32 %v9885_v42, %v2066_v31  ;;  %v2075_v44 = vshll.u32 %v9883_v43, %v2066_v31 }
  0xeb   : > { %v2078_v46 = vshll.u32 %v9889_v45, %v2066_v31  ;;  %v2081_v7 = vshll.u32 %v9891_v2, %v2066_v31  ;;  %vm2084_vm1 = vcmp.lt.s32.totalorder %v2065_v30, 1  ;;  %vm2085_vm2 = vcmp.lt.s32.totalorder %v2065_v30, 2 }
  0xec   : > { %v2070_v47 = vshrl.u32 %v9885_v42, %v2067_v38  ;;  %v2073_v48 = vshrl.u32 %v9883_v43, %v2067_v38  ;;  %v2076_v25 = vshrl.u32 %v9889_v45, %v2067_v38  ;;  %v2068_v49 = vshrl.u32 %v9880_v40, %v2067_v38 }
  0xed   : > { %v2079_v50 = vshrl.u32 %v9891_v2, %v2067_v38  ;;  %v2082_v52 = vshrl.u32 %v9893_v51, %v2067_v38  ;;  %v2159_v59 = vshrl.u32 %v2158_v0, 23  ;;  %vm2086_vm3 = vcmp.lt.s32.totalorder %v2065_v30, 3 }
  0xee   : > { %v2071_v55 = vor.u32 %v2070_v47, %v2069_v1  ;;  %v2074_v56 = vor.u32 %v2073_v48, %v2072_v58  ;;  %v2077_v57 = vor.u32 %v2076_v25, %v2075_v44  ;;  %vm2087_vm4 = vcmp.lt.s32.totalorder %v2065_v30, 4  ;;  %v6890_v48 = vpop.permute.xlu1 %1689 }
  0xef   : > { %v2080_v63 = vor.u32 %v2079_v50, %v2078_v46  ;;  %v2083_v3 = vor.u32 %v2082_v52, %v2081_v7  ;;  %v2162_v18 = vand.u32 8388607, %v9878_v41  ;;  %v5532_v15 = vadd.s32 4294967169, %v2159_v59 }
  0xf0   : > { %v2089_v10 = vsel %vm2087_vm4, %v2077_v57, 2102212464  ;;  %v2092_v13 = vsel %vm2084_vm1, %v2071_v55, %v2074_v56  ;;  %v2096_v16 = vsel %vm2084_vm1, %v2074_v56, %v2077_v57  ;;  %635 = vadd.xlane.f32.xlu1 %v619_v33  ;;  %v1919_v23 = vmul.f32 %v6821_v60, %v1857_v62 }
  0xf1   : > { %v2093_v19 = vsel %vm2087_vm4, %v2080_v63, 920167782  ;;  %v2097_v20 = vsel %vm2087_vm4, %v2083_v3, 1326507024  ;;  %v2088_v24 = vsel %vm2084_vm1, %v2068_v49, %v2071_v55  ;;  %v2090_v14 = vsel %vm2086_vm3, %v2074_v56, %v2089_v10 }
  0xf2   : > { %v2094_v27 = vsel %vm2086_vm3, %v2077_v57, %v2093_v19  ;;  %v2098_v29 = vsel %vm2086_vm3, %v2080_v63, %v2097_v20  ;;  %v1840_v31 = vadd.f32 %v1825_v35, %v1746_v36  ;;  %v2165_v0 = vadd.s32 1, %v5532_v15  ;;  %v6917_v19 = vpop.permute.xlu1 %1868 }
  0xf3   : > { %v2095_v38 = vsel %vm2085_vm2, %v2092_v13, %v2094_v27  ;;  %v2099_v1 = vsel %vm2085_vm2, %v2096_v16, %v2098_v29  ;;  %v2091_v7 = vsel %vm2085_vm2, %v2088_v24, %v2090_v14  ;;  %v2163_v47 = vor.u32 8388608, %v2162_v18 }
  0xf4   : > { %v6879_v58 = vmul.u32.u64.low %v6851_v37, %v2099_v1  ;;  %v6880_v44 = vmul.u32.u64.high %v6851_v37, %v2099_v1, %v6879_v58  ;;  %v6883_v33 = vmul.u32.u64.low %v6851_v37, %v2095_v38  ;;  %v6884_v46 = vmul.u32.u64.high %v6851_v37, %v2095_v38, %v6883_v33  ;;  %639 = vadd.xlane.f32.xlu1 %v621_v34 }
  0xf5   : > { %vm2166_vm5 = vcmp.gt.s32.totalorder %v2165_v0, 0  ;;  %v6888_v35 = vadd.f32 %v1919_v23, %v1840_v31  ;;  %v625_v49 = vmul.f32 %v6709_v12, %v6709_v12  ;;  %v627_v50 = vmul.f32 %v6512_v4, %v6512_v4 }
  0xf6   : > { %v2167_v36 = vsel %vm2166_vm5, %v2165_v0, 0  ;;  %v629_v52 = vmul.f32 %v6733_v21, %v6733_v21  ;;  %v2107_v30 = vmul.u32 %v6851_v37, %v2091_v7  ;;  %vm2109_vm6 = vc.u32 %v6880_v44, %v6883_v33 }
  0xf7   : > { %v2169_v25 = vand.u32 31, %v2167_v36  ;;  %v2110_v34 = vadd.s32 1, %v6884_v46  ;;  %v2168_v55 = vshrl.u32 %v2167_v36, 5  ;;  %v6904_v12 = vshll.u32 %v2163_v47, 8 }
  0xf8   : > { %643 = vadd.xlane.f32.xlu1 %v6855_v39  ;;  %v1952_v4 = vand.u32 2139095040, %v6888_v35  ;;  %vm2054_vm5 = vcmp.lt.s32.totalorder %v6826_v5, 0 }
  0xf9   : > { %v2170_v56 = vsub.s32 32, %v2169_v25  ;;  %v2172_v57 = vshll.u32 %v9880_v40, %v2169_v25  ;;  %v2111_v59 = vsel %vm2109_vm6, %v2110_v34, %v6884_v46  ;;  %v2175_v21 = vshll.u32 %v9885_v42, %v2169_v25 }
  0xfa   : > { %v2178_v37 = vshll.u32 %v9883_v43, %v2169_v25  ;;  %v2181_v62 = vshll.u32 %v9889_v45, %v2169_v25  ;;  %v2112_v63 = vadd.s32 %v2111_v59, %v2107_v30  ;;  %v2184_v10 = vshll.u32 %v9891_v2, %v2169_v25 }
  0xfb   : > { %v2173_v3 = vshrl.u32 %v9885_v42, %v2170_v56  ;;  %v2176_v39 = vshrl.u32 %v9883_v43, %v2170_v56  ;;  %v2179_v13 = vshrl.u32 %v9889_v45, %v2170_v56  ;;  %v2182_v16 = vshrl.u32 %v9891_v2, %v2170_v56 }
  0xfc   : > { %v2185_v18 = vshrl.u32 %v9893_v51, %v2170_v56  ;;  %vm2187_vm7 = vcmp.lt.s32.totalorder %v2168_v55, 1  ;;  %647 = vadd.xlane.f32.xlu1 %v625_v49  ;;  %v2113_v20 = vadd.s32 536870912, %v2112_v63  ;;  %v2171_v15 = vshrl.u32 %v9880_v40, %v2170_v56 }
  0xfd   : > { %v2174_v23 = vor.u32 %v2173_v3, %v2172_v57  ;;  %v2177_v24 = vor.u32 %v2176_v39, %v2175_v21  ;;  %v2180_v14 = vor.u32 %v2179_v13, %v2178_v37  ;;  %v2183_v27 = vor.u32 %v2182_v16, %v2181_v62  ;;  %v1783_v57 = vpop.permute.xlu1 %1782 }
  0xfe   : > { %v2186_v29 = vor.u32 %v2185_v18, %v2184_v10  ;;  %vm2189_vm8 = vcmp.lt.s32.totalorder %v2168_v55, 3  ;;  %v6920_v31 = vshrl.u32 %v2113_v20, 30  ;;  %vm2190_vm9 = vcmp.lt.s32.totalorder %v2168_v55, 4 }
  0xff   : > { %v2195_v38 = vsel %vm2187_vm7, %v2174_v23, %v2177_v24  ;;  %v1953_v1 = vshrl.u32 %v1952_v4, 23  ;;  %v2192_v0 = vsel %vm2190_vm9, %v2180_v14, 2102212464  ;;  %v2196_v58 = vsel %vm2190_vm9, %v2183_v27, 920167782 }
 0x100   : > { %v2199_v46 = vsel %vm2187_vm7, %v2177_v24, %v2180_v14  ;;  %v2200_v7 = vsel %vm2190_vm9, %v2186_v29, 1326507024  ;;  %651 = vadd.xlane.f32.xlu1 %v627_v50  ;;  %v2115_v47 = vshll.u32 %v6920_v31, 30  ;;  %vm2188_vm10 = vcmp.lt.s32.totalorder %v2168_v55, 2  ;;  %v1877_v55 = vpop.permute.xlu0 %1876 }
 0x101   : > { %v2197_v36 = vsel %vm2189_vm8, %v2180_v14, %v2196_v58  ;;  %v2201_v25 = vsel %vm2189_vm8, %v2183_v27, %v2200_v7  ;;  %v2191_v49 = vsel %vm2187_vm7, %v2171_v15, %v2174_v23  ;;  %v5524_v56 = vadd.s32 4294967169, %v1953_v1  ;;  %v6950_v15 = vpop.permute.xlu1 %1872 }
 0x102   : > { %v2198_v30 = vsel %vm2188_vm10, %v2195_v38, %v2197_v36  ;;  %v2202_v34 = vsel %vm2188_vm10, %v2199_v46, %v2201_v25  ;;  %v6930_v4 = vsub.s32 %v2112_v63, %v2115_v47  ;;  %v2193_v59 = vsel %vm2189_vm8, %v2177_v24, %v2192_v0 }
 0x103   : > { %v6934_v50 = vmul.u32.u64.low %v6904_v12, %v2202_v34  ;;  %v6935_v21 = vmul.u32.u64.high %v6904_v12, %v2202_v34, %v6934_v50  ;;  %v6938_v37 = vmul.u32.u64.low %v6904_v12, %v2198_v30  ;;  %v6939_v62 = vmul.u32.u64.high %v6904_v12, %v2198_v30, %v6938_v37 }
 0x104   : > { %v1959_v3 = vadd.s32 1, %v5524_v56  ;;  %655 = vadd.xlane.f32.xlu1 %v629_v52  ;;  %v631_v39 = vmul.f32 %v6751_v26, %v6751_v26  ;;  %v2118_v10 = vsub.s32 0, %v6930_v4  ;;  %v2194_v63 = vsel %vm2188_vm10, %v2191_v49, %v2193_v59  ;;  %v1881_v56 = vpop.permute.xlu0 %1880 }
 0x105   : > { %vm2212_vm12 = vc.u32 %v6935_v21, %v6938_v37  ;;  %v2213_v18 = vadd.s32 1, %v6939_v62  ;;  %v633_v26 = vmul.f32 %v6764_v17, %v6764_v17  ;;  %v2210_v52 = vmul.u32 %v6904_v12, %v2194_v63  ;;  %v1787_v36 = vpop.permute.xlu1 %1786 }
 0x106   : > { %vm1960_vm11 = vcmp.gt.s32.totalorder %v1959_v3, 0  ;;  %v5529_v13 = vmin.u32 %v2118_v10, %v6930_v4  ;;  %v9877_v14 = vand.u32 2147483647, %v6888_v35  ;;  %v1751_v38 = vmul.f32 %v6817_v54, %v6823_v61 }
 0x107   : > { %v1961_v16 = vsel %vm1960_vm11, %v1959_v3, 0  ;;  %v2214_v24 = vsel %vm2212_vm12, %v2213_v18, %v6939_v62  ;;  %v1752_v1 = vmul.f32 %v6817_v54, %v6828_v6  ;;  %v1830_v0 = vmul.f32 %v6815_v53, %v1783_v57 }
 0x108   : > { %v1963_v20 = vand.u32 31, %v1961_v16  ;;  %659 = vadd.xlane.f32.xlu1 %v631_v39  ;;  %v2120_v23 = vclz %v5529_v13  ;;  %v2215_v29 = vadd.s32 %v2214_v24, %v2210_v52  ;;  %v1956_v61 = vand.u32 8388607, %v9877_v14 }
 0x109   : > { %v6977_v49 = vshrl.u32 %v1961_v16, 5  ;;  %v1831_v63 = vmul.f32 %v6815_v53, %v1787_v36  ;;  %v1924_v18 = vmul.f32 %v6821_v60, %v1877_v55  ;;  %v1845_v52 = vadd.f32 %v1830_v0, %v1751_v38 }
 0x10a   : > { %v6957_v27 = vsub.s32 32, %v1963_v20  ;;  %v2216_v17 = vadd.s32 536870912, %v2215_v29  ;;  %v5530_v7 = vadd.s32 4294967294, %v2120_v23  ;;  %v1975_v47 = vshll.u32 %v9889_v45, %v1963_v20 }
 0x10b   : > { %v1966_v30 = vshll.u32 %v9880_v40, %v1963_v20  ;;  %v1969_v34 = vshll.u32 %v9885_v42, %v1963_v20  ;;  %v1972_v57 = vshll.u32 %v9883_v43, %v1963_v20  ;;  %v1978_v50 = vshll.u32 %v9891_v2, %v1963_v20 }
 0x10c   : > { %663 = vadd.xlane.f32.xlu1 %v633_v26  ;;  %v1967_v12 = vshrl.u32 %v9885_v42, %v6957_v27  ;;  %v1970_v58 = vshrl.u32 %v9883_v43, %v6957_v27  ;;  %v1976_v46 = vshrl.u32 %v9891_v2, %v6957_v27  ;;  %v1973_v6 = vshrl.u32 %v9889_v45, %v6957_v27 }
 0x10d   : > { %v6975_v25 = vshrl.u32 %v2216_v17, 30  ;;  %v1979_v62 = vshrl.u32 %v9893_v51, %v6957_v27  ;;  %vm5531_vm13 = vcmp.lt.s32.totalorder %v5530_v7, 0  ;;  %vm1984_vm14 = vcmp.lt.s32.totalorder %v6977_v49, 4 }
 0x10e   : > { %v1977_v59 = vor.u32 %v1976_v46, %v1975_v47  ;;  %v1968_v39 = vor.u32 %v1967_v12, %v1966_v30  ;;  %v1971_v10 = vor.u32 %v1970_v58, %v1969_v34  ;;  %v1974_v13 = vor.u32 %v1973_v6, %v1972_v57 }
 0x10f   : > { %v2218_v3 = vshll.u32 %v6975_v25, 30  ;;  %v1980_v16 = vor.u32 %v1979_v62, %v1978_v50  ;;  %v1925_v20 = vmul.f32 %v6821_v60, %v1881_v56  ;;  %v1957_v23 = vor.u32 8388608, %v1956_v61 }
 0x110   : > { %vm1981_vm15 = vcmp.lt.s32.totalorder %v6977_v49, 1  ;;  %v1990_v24 = vsel %vm1984_vm14, %v1977_v59, 920167782  ;;  %v2123_v12 = vsel %vm5531_vm13, 0, %v5530_v7  ;;  %vm1983_vm0 = vcmp.lt.s32.totalorder %v6977_v49, 3  ;;  %v7009_v7 = vpop.permute.xlu1 %1704 }
 0x111   : > { %v6988_v26 = vsub.s32 %v2215_v29, %v2218_v3  ;;  %v1994_v17 = vsel %vm1984_vm14, %v1980_v16, 1326507024  ;;  %v1989_v55 = vsel %vm1981_vm15, %v1968_v39, %v1971_v10  ;;  %v7000_v29 = vpop.permute.xlu0 %1896  ;;  %v1846_v38 = vadd.f32 %v1831_v63, %v1752_v1 }
 0x112   : > { %v1991_v58 = vsel %vm1983_vm0, %v1974_v13, %v1990_v24  ;;  %v1993_v46 = vsel %vm1981_vm15, %v1971_v10, %v1974_v13  ;;  %v1995_v61 = vsel %vm1983_vm0, %v1977_v59, %v1994_v17  ;;  %vm1982_vm1 = vcmp.lt.s32.totalorder %v6977_v49, 2 }
 0x113   : > { %v2221_v0 = vsub.s32 0, %v6988_v26  ;;  %v1992_v6 = vsel %vm1982_vm1, %v1989_v55, %v1991_v58  ;;  %v7014_v47 = vadd.f32 %v1924_v18, %v1845_v52  ;;  %v2128_v1 = vsub.s32 4294967266, %v2123_v12 }
 0x114   : > { %v1996_v36 = vsel %vm1982_vm1, %v1993_v46, %v1995_v61  ;;  %v1997_v30 = vshll.u32 %v1957_v23, 8  ;;  %v7018_v34 = vadd.f32 %v1925_v20, %v1846_v38  ;;  %v1791_v16 = vpop.permute.xlu1 %1790  ;;  %v2124_v24 = vsub.s32 32, %v2123_v12 }
 0x115   : > { %10008 = vst [vmem:[#allocation16_spill] sm:$0xff] %v7014_v47  ;;  %v5533_v56 = vmin.u32 %v2221_v0, %v6988_v26  ;;  %v7025_v50 = vpop.permute.xlu0 %1900  ;;  %v2467_v63 = vand.u32 2139095040, %v7014_v47  ;;  %v2129_v18 = vadd.s32 127, %v2128_v1  ;;  %v1986_v20 = vsel %vm1984_vm14, %v1974_v13, 2102212464 }
 0x116   : > { %10009 = vst [vmem:[#allocation17_spill] sm:$0xff] %v7018_v34  ;;  %v7021_v57 = vmul.u32.u64.low %v1997_v30, %v1992_v6  ;;  %v7022_v59 = vmul.u32.u64.high %v1997_v30, %v1992_v6, %v7021_v57  ;;  %v7027_v62 = vmul.u32.u64.low %v1997_v30, %v1996_v36  ;;  %v7028_v3 = vmul.u32.u64.high %v1997_v30, %v1996_v36, %v7027_v62 }
 0x117   : > { %v2223_v52 = vclz %v5533_v56  ;;  %v1965_v23 = vshrl.u32 %v9880_v40, %v6957_v27  ;;  %v2468_v17 = vshrl.u32 %v2467_v63, 23  ;;  %v2108_v55 = vadd.s32 %v6883_v33, %v6880_v44 }
 0x118   : > { %v2130_v38 = vshll.u32 %v2129_v18, 23  ;;  %v1987_v61 = vsel %vm1983_vm0, %v1971_v10, %v1986_v20  ;;  %v7041_v6 = vpop.permute.xlu1 %1709  ;;  %v2007_v13 = vadd.s32 1, %v7022_v59  ;;  %vm2006_vm2 = vc.u32 %v7028_v3, %v7021_v57 }
 0x119   : > { %v1775_v0 = vpop.permute.xlu0 %1774  ;;  %v5534_v58 = vadd.s32 4294967294, %v2223_v52  ;;  %v1985_v46 = vsel %vm1981_vm15, %v1965_v23, %v1968_v39  ;;  %v2126_v1 = vshrl.u32 %v2108_v55, %v2124_v24  ;;  %v5544_v27 = vadd.s32 4294967169, %v2468_v17 }
 0x11a   : > { %v1828_v44 = vmul.f32 %v6815_v53, %v1775_v0  ;;  %v2125_v33 = vshll.u32 %v6930_v4, %v2123_v12  ;;  %v2131_v36 = vor.u32 4788187, %v2130_v38  ;;  %v1988_v39 = vsel %vm1982_vm1, %v1985_v46, %v1987_v61 }
 0x11b   : > { %v1749_v10 = vmul.f32 %v6817_v54, %v6832_v11  ;;  %vm5535_vm3 = vcmp.lt.s32.totalorder %v5534_v58, 0  ;;  %v2570_v56 = vand.u32 2139095040, %v7018_v34  ;;  %v2008_v63 = vsel %vm2006_vm2, %v2007_v13, %v7022_v59 }
 0x11c   : > { %v2127_v62 = vor.u32 %v2126_v1, %v2125_v33  ;;  %v2004_v18 = vmul.u32 %v1997_v30, %v1988_v39  ;;  %v2474_v52 = vadd.s32 1, %v5544_v27  ;;  %v1885_v20 = vpop.permute.xlu1 %1884  ;;  %v2132_v23 = vand.u32 2147483647, %v2131_v36 }
 0x11d   : > { %v1843_v24 = vadd.f32 %v1828_v44, %v1749_v10  ;;  %v2226_v17 = vsel %vm5535_vm3, 0, %v5534_v58  ;;  %v1922_v49 = vmul.f32 %v6821_v60, %v6917_v19  ;;  %v2571_v12 = vshrl.u32 %v2570_v56, 23  ;;  %v1779_v55 = vpop.permute.xlu0 %1778 }
 0x11e   : > { %v2009_v4 = vadd.s32 %v2008_v63, %v2004_v18  ;;  %v2134_v38 = vcvt.s32.f32 %v2127_v62  ;;  %v2231_v11 = vsub.s32 4294967266, %v2226_v17  ;;  %vm2475_vm4 = vcmp.gt.s32.totalorder %v2474_v52, 0 }
 0x11f   : > { %v7056_v0 = vadd.f32 %v1922_v49, %v1843_v24  ;;  %v1829_v59 = vmul.f32 %v6815_v53, %v1779_v55  ;;  %v1832_v30 = vmul.f32 %v6815_v53, %v1791_v16  ;;  %v5548_v1 = vadd.s32 4294967169, %v2571_v12 }
 0x120   : > { %v2135_v46 = vmul.f32 %v2134_v38, %v2132_v23  ;;  %v2010_v61 = vadd.s32 536870912, %v2009_v4  ;;  %v7060_v13 = vpop.permute.xlu1 %1714  ;;  %v1750_v58 = vmul.f32 %v6817_v54, %v6890_v48  ;;  %v2476_v19 = vsel %vm2475_vm4, %v2474_v52, 0 }
 0x121   : > { %v1753_v27 = vmul.f32 %v6817_v54, %v7009_v7  ;;  %v1926_v44 = vmul.f32 %v6821_v60, %v1885_v20  ;;  %v2227_v33 = vsub.s32 32, %v2226_v17  ;;  %v2232_v36 = vadd.s32 127, %v2231_v11  ;;  %v1795_v12 = vpop.permute.xlu0 %1794 }
 0x122   : > { %v2261_v39 = vand.u32 2139095040, %v7056_v0  ;;  %v2136_v16 = vxor.u32 2147483648, %v2135_v46  ;;  %v1844_v10 = vadd.f32 %v1829_v59, %v1750_v58  ;;  %v2211_v62 = vadd.s32 %v6938_v37, %v6935_v21 }
 0x123   : > { %v1847_v56 = vadd.f32 %v1832_v30, %v1753_v27  ;;  %v7071_v63 = vshrl.u32 %v2010_v61, 30  ;;  %v7073_v48 = vand.u32 31, %v2476_v19  ;;  %v2577_v18 = vadd.s32 1, %v5548_v1 }
 0x124   : > { %v1756_v7 = vmul.f32 %v6817_v54, %v6838_v22  ;;  %v7079_v52 = vmul.f32 %v6817_v54, %v6843_v32  ;;  %v1923_v24 = vmul.f32 %v6821_v60, %v6950_v15  ;;  %v2229_v23 = vshrl.u32 %v2211_v62, %v2227_v33  ;;  %v1889_v55 = vpop.permute.xlu1 %1888 }
 0x125   : > { %10010 = vst [vmem:[#allocation18_spill] sm:$0xff] %v7073_v48  ;;  %v7083_v20 = vadd.f32 %v1926_v44, %v1847_v56  ;;  %v2233_v49 = vshll.u32 %v2232_v36, 23  ;;  %v1929_v21 = vmul.f32 %v6821_v60, %v7000_v29  ;;  %v2262_v37 = vshrl.u32 %v2261_v39, 23 }
 0x126   : > { %v7089_v22 = vsel %vm2054_vm5, %v2136_v16, %v2135_v46  ;;  %v7093_v32 = vadd.s32 %v7021_v57, %v7028_v3  ;;  %v7097_v15 = vmul.f32 %v6821_v60, %v7025_v50  ;;  %v7099_v38 = vadd.f32 %v1923_v24, %v1844_v10 }
 0x127   : > { %10011 = vst [vmem:[#allocation19_spill] sm:$0xff] %v7083_v20  ;;  %v2228_v11 = vshll.u32 %v6988_v26, %v2226_v17  ;;  %v2012_v29 = vshll.u32 %v7071_v63, 30  ;;  %v7104_v59 = vsub.s32 32, %v7073_v48  ;;  %vm2578_vm6 = vcmp.gt.s32.totalorder %v2577_v18, 0 }
 0x128   : > { %10012 = vst [vmem:[#allocation20_spill] sm:$0xff] %v7099_v38  ;;  %v1754_v46 = vmul.f32 %v6817_v54, %v7041_v6  ;;  %v1833_v57 = vmul.f32 %v6815_v53, %v1795_v12  ;;  %v9876_v3 = vand.u32 2147483647, %v7083_v20  ;;  %v2673_v50 = vand.u32 2139095040, %v7083_v20  ;;  %v1803_v39 = vpop.permute.xlu1 %1802 }
 0x129   : > { %10013 = vst [vmem:[#allocation21_spill] sm:$0xff] %v7104_v59  ;;  %v2230_v30 = vor.u32 %v2229_v23, %v2228_v11  ;;  %v2234_v61 = vor.u32 4788187, %v2233_v49  ;;  %v7111_v1 = vshrl.u32 %v2476_v19, 5  ;;  %v5536_v26 = vadd.s32 4294967169, %v2262_v37  ;;  %v1799_v49 = vpop.permute.xlu0 %1798 }
 0x12a   : > { %v2490_v17 = vshll.u32 %v9889_v45, %v7073_v48  ;;  %v7117_v58 = vshll.u32 %v9891_v2, %v7073_v48  ;;  %v2364_v6 = vand.u32 2139095040, %v7099_v38  ;;  %v2674_v27 = vshrl.u32 %v2673_v50, 23 }
 0x12b   : > { %10014 = vst [vmem:[#allocation22_spill] sm:$0xff] %v7111_v1  ;;  %v7120_v44 = vsub.s32 %v2009_v4, %v2012_v29  ;;  %v2491_v33 = vshrl.u32 %v9891_v2, %v7104_v59  ;;  %v7126_v19 = vshrl.u32 %v9893_v51, %v7104_v59  ;;  %v2579_v36 = vsel %vm2578_vm6, %v2577_v18, 0 }
 0x12c   : > { %v1848_v16 = vadd.f32 %v1833_v57, %v1754_v46  ;;  %v5552_v10 = vadd.s32 4294967169, %v2674_v27  ;;  %v2677_v56 = vand.u32 8388607, %v9876_v3  ;;  %v1927_v62 = vmul.f32 %v6821_v60, %v1889_v55 }
 0x12d   : > { %v2235_v24 = vand.u32 2147483647, %v2234_v61  ;;  %v2237_v4 = vcvt.s32.f32 %v2230_v30  ;;  %vm2499_vm7 = vcmp.lt.s32.totalorder %v7111_v1, 4  ;;  %v7133_v23 = vadd.s32 1, %v5536_v26 }
 0x12e   : > { %v7135_v37 = vand.u32 31, %v2579_v36  ;;  %v2680_v12 = vadd.s32 1, %v5552_v10  ;;  %v7137_v11 = vadd.f32 %v1927_v62, %v1848_v16  ;;  %v1835_v18 = vmul.f32 %v6815_v53, %v1803_v39 }
 0x12f   : > { %v2015_v29 = vsub.s32 0, %v7120_v44  ;;  %v7141_v46 = vor.u32 %v2491_v33, %v2490_v17  ;;  %v7145_v57 = vshrl.u32 %v2579_v36, 5  ;;  %v2678_v50 = vor.u32 8388608, %v2677_v56  ;;  %v1893_v56 = vpop.permute.xlu1 %1892 }
 0x130   : > { %10015 = vst [vmem:[#allocation23_spill] sm:$0xff] %v7135_v37  ;;  %10016 = vst [vmem:[#allocation24_spill] sm:$0xff] %v7137_v11  ;;  %vm2681_vm8 = vcmp.gt.s32.totalorder %v2680_v12, 0  ;;  %v1755_v30 = vmul.f32 %v6817_v54, %v7060_v13  ;;  %v1834_v61 = vmul.f32 %v6815_v53, %v1799_v49  ;;  %v7150_v26 = vshrl.u32 %v2364_v6, 23 }
 0x131   : > { %10017 = vst [vmem:[#allocation25_spill] sm:$0xff] %v7141_v46  ;;  %10018 = vst [vmem:[#allocation26_spill] sm:$0xff] %v7145_v57  ;;  %v2682_v27 = vsel %vm2681_vm8, %v2680_v12, 0  ;;  %v2776_v39 = vand.u32 2139095040, %v7137_v11  ;;  %v1850_v16 = vadd.f32 %v1835_v18, %v1756_v7  ;;  %v7153_v17 = vmul.f32 %v2237_v4, %v2235_v24 }
 0x132   : > { %v7156_v33 = vsub.s32 32, %v7135_v37  ;;  %v7160_v36 = vshll.u32 %v9889_v45, %v7135_v37  ;;  %v2684_v10 = vand.u32 31, %v2682_v27  ;;  %v7163_v13 = vmin.u32 %v2015_v29, %v7120_v44 }
 0x133   : > { %v7168_v6 = vsel %vm2499_vm7, %v7141_v46, 920167782  ;;  %v2683_v7 = vshrl.u32 %v2682_v27, 5  ;;  %v7170_v62 = vadd.f32 %v1929_v21, %v1850_v16  ;;  %v7172_v4 = vshll.u32 %v2678_v50, 8 }
 0x134   : > { %10019 = vst [vmem:[#allocation27_spill] sm:$0xff] %v7156_v33  ;;  %10020 = vst [vmem:[#allocation28_spill] sm:$0xff] %v7168_v6  ;;  %v2685_v24 = vsub.s32 32, %v2684_v10  ;;  %v1849_v49 = vadd.f32 %v1834_v61, %v1755_v30  ;;  %v2777_v12 = vshrl.u32 %v2776_v39, 23  ;;  %vm2269_vm9 = vcmp.gt.s32.totalorder %v7133_v23, 0 }
 0x135   : > { %10021 = vst [vmem:[#allocation29_spill] sm:$0xff] %v7170_v62  ;;  %v2687_v18 = vshll.u32 %v9880_v40, %v2684_v10  ;;  %v2690_v29 = vshll.u32 %v9885_v42, %v2684_v10  ;;  %v2693_v3 = vshll.u32 %v9883_v43, %v2684_v10  ;;  %v1928_v14 = vmul.f32 %v6821_v60, %v1893_v56 }
 0x136   : > { %v2688_v41 = vshrl.u32 %v9885_v42, %v2685_v24  ;;  %v2691_v21 = vshrl.u32 %v9883_v43, %v2685_v24  ;;  %v2694_v27 = vshrl.u32 %v9889_v45, %v2685_v24  ;;  %v2696_v50 = vshll.u32 %v9889_v45, %v2684_v10 }
 0x137   : > { %v2697_v30 = vshrl.u32 %v9891_v2, %v2685_v24  ;;  %v2699_v61 = vshll.u32 %v9891_v2, %v2684_v10  ;;  %v2700_v39 = vshrl.u32 %v9893_v51, %v2685_v24  ;;  %vm2702_vm10 = vcmp.lt.s32.totalorder %v2683_v7, 1 }
 0x138   : > { %v2689_v16 = vor.u32 %v2688_v41, %v2687_v18  ;;  %v2692_v8 = vor.u32 %v2691_v21, %v2690_v29  ;;  %v2695_v55 = vor.u32 %v2694_v27, %v2693_v3  ;;  %v5556_v40 = vadd.s32 4294967169, %v2777_v12 }
 0x139   : > { %v2698_v56 = vor.u32 %v2697_v30, %v2696_v50  ;;  %v2701_v9 = vor.u32 %v2700_v39, %v2699_v61  ;;  %vm2703_vm11 = vcmp.lt.s32.totalorder %v2683_v7, 2  ;;  %vm2705_vm12 = vcmp.lt.s32.totalorder %v2683_v7, 4 }
 0x13a   : > { %v10022_v43 = vmov 683565275   ;;  %v2707_v34 = vsel %vm2705_vm12, %v2695_v55, 2102212464  ;;  %v2710_v45 = vsel %vm2702_vm10, %v2689_v16, %v2692_v8  ;;  %v2714_v6 = vsel %vm2702_vm10, %v2692_v8, %v2695_v55 }
 0x13b   : > { %v2686_v42 = vshrl.u32 %v10022_v43, %v2685_v24  ;;  %vm2704_vm13 = vcmp.lt.s32.totalorder %v2683_v7, 3  ;;  %v2711_v10 = vsel %vm2705_vm12, %v2698_v56, 920167782  ;;  %v2715_v2 = vsel %vm2705_vm12, %v2701_v9, 1326507024 }
 0x13c   : > { %v2783_v51 = vadd.s32 1, %v5556_v40  ;;  %v2708_v18 = vsel %vm2704_vm13, %v2692_v8, %v2707_v34  ;;  %v2712_v3 = vsel %vm2704_vm13, %v2695_v55, %v2711_v10  ;;  %v2716_v12 = vsel %vm2704_vm13, %v2698_v56, %v2715_v2  ;;  %v1807_v40 = vpop.permute.xlu1 %1806 }
 0x13d   : > { %v2706_v41 = vsel %vm2702_vm10, %v2686_v42, %v2689_v16  ;;  %v2713_v29 = vsel %vm2703_vm11, %v2710_v45, %v2712_v3  ;;  %v2717_v21 = vsel %vm2703_vm11, %v2714_v6, %v2716_v12  ;;  %v9895_v24 = vand.u32 2147483647, %v7137_v11 }
 0x13e   : > { %vm2784_vm14 = vcmp.gt.s32.totalorder %v2783_v51, 0  ;;  %v7194_v27 = vmul.u32.u64.low %v7172_v4, %v2717_v21  ;;  %v7195_v50 = vmul.u32.u64.high %v7172_v4, %v2717_v21, %v7194_v27  ;;  %v10023_v8 = vor.u32 %v7126_v19, %v7117_v58 }
 0x13f   : > { %v7198_v30 = vmul.u32.u64.low %v7172_v4, %v2713_v29  ;;  %v7199_v9 = vmul.u32.u64.high %v7172_v4, %v2713_v29, %v7198_v30  ;;  %v2709_v45 = vsel %vm2703_vm11, %v2706_v41, %v2708_v18  ;;  %v2785_v2 = vsel %vm2784_vm14, %v2783_v51, 0 }
 0x140   : > { %v7207_v42 = vsel %vm2499_vm7, %v10023_v8, 1326507024  ;;  %v7210_v34 = vadd.f32 %v1928_v14, %v1849_v49  ;;  %v10026_v6 = vmov 920167782   ;;  %v7220_v39 = vsel %vm2269_vm9, %v7133_v23, 0 }
 0x141   : > { %10024 = vst [vmem:[#allocation30_spill] sm:$0xff] %v7207_v42  ;;  %v7215_v61 = vshrl.u32 %v10026_v6, %v7156_v33  ;;  %v2787_v58 = vand.u32 31, %v2785_v2  ;;  %v2017_v19 = vclz %v7163_v13  ;;  %v5540_v7 = vadd.s32 4294967169, %v7150_v26 }
 0x142   : > { %10025 = vst [vmem:[#allocation31_spill] sm:$0xff] %v7210_v34  ;;  %v2780_v51 = vand.u32 8388607, %v9895_v24  ;;  %v1836_v14 = vmul.f32 %v6815_v53, %v1807_v40  ;;  %v2725_v49 = vmul.u32 %v7172_v4, %v2709_v45  ;;  %vm2727_vm15 = vc.u32 %v7195_v50, %v7198_v30 }
 0x143   : > { %v2728_v16 = vadd.s32 1, %v7199_v9  ;;  %v7231_v56 = vsub.s32 32, %v2787_v58  ;;  %v7233_v23 = vshrl.u32 %v2785_v2, 5  ;;  %v2790_v13 = vshll.u32 %v10022_v43, %v2787_v58 }
 0x144   : > { %v10027_v10 = vmov 2475754826   ;;  %v2879_v41 = vand.u32 2139095040, %v7210_v34  ;;  %v10028_v3 = vmov 2131351028   ;;  %vm2157_vm0 = vcmp.lt.s32.totalorder %v6841_v28, 0 }
 0x145   : > { %v2793_v26 = vshll.u32 %v10027_v10, %v2787_v58  ;;  %v2729_v18 = vsel %vm2727_vm15, %v2728_v16, %v7199_v9  ;;  %v2791_v4 = vshrl.u32 %v10027_v10, %v7231_v56  ;;  %v2794_v12 = vshrl.u32 %v10028_v3, %v7231_v56 }
 0x146   : > { %v2796_v29 = vshll.u32 %v10028_v3, %v2787_v58  ;;  %v2730_v21 = vadd.s32 %v2729_v18, %v2725_v49  ;;  %v10029_v27 = vmov 2102212464   ;;  %v2800_v45 = vshrl.u32 %v10026_v6, %v7231_v56 }
 0x147   : > { %v2797_v40 = vshrl.u32 %v10029_v27, %v7231_v56  ;;  %v2799_v8 = vshll.u32 %v10029_v27, %v2787_v58  ;;  %v2792_v9 = vor.u32 %v2791_v4, %v2790_v13  ;;  %v2795_v2 = vor.u32 %v2794_v12, %v2793_v26 }
 0x148   : > { %v2802_v16 = vshll.u32 %v10026_v6, %v2787_v58  ;;  %v10030_v24 = vmov 1326507024   ;;  %v5526_v46 = vadd.s32 4294967294, %v2017_v19  ;;  %v2731_v42 = vadd.s32 536870912, %v2730_v21 }
 0x149   : > { %v2803_v55 = vshrl.u32 %v10030_v24, %v7231_v56  ;;  %v2798_v49 = vor.u32 %v2797_v40, %v2796_v29  ;;  %v2801_v18 = vor.u32 %v2800_v45, %v2799_v8  ;;  %v2781_v1 = vor.u32 8388608, %v2780_v51 }
 0x14a   : > { %vm2808_vm1 = vcmp.lt.s32.totalorder %v7233_v23, 4  ;;  %v1851_v59 = vadd.f32 %v1836_v14, %v7079_v52  ;;  %v7255_v47 = vshrl.u32 %v2731_v42, 30  ;;  %vm2805_vm2 = vcmp.lt.s32.totalorder %v7233_v23, 1 }
 0x14b   : > { %v2804_v48 = vor.u32 %v2803_v55, %v2802_v16  ;;  %vm2807_vm3 = vcmp.lt.s32.totalorder %v7233_v23, 3  ;;  %v2814_v58 = vsel %vm2808_vm1, %v2801_v18, 920167782  ;;  %v2813_v19 = vsel %vm2805_vm2, %v2792_v9, %v2795_v2 }
 0x14c   : > { %10031 = vst [vmem:[#allocation32_spill] sm:$0xff] %v7255_v47  ;;  %v2815_v51 = vsel %vm2807_vm3, %v2798_v49, %v2814_v58  ;;  %v2880_v13 = vshrl.u32 %v2879_v41, 23  ;;  %v2597_v52 = vshrl.u32 %v10030_v24, %v7156_v33  ;;  %v2733_v42 = vshll.u32 %v7255_v47, 30 }
 0x14d   : > { %v2818_v55 = vsel %vm2808_vm1, %v2804_v48, 1326507024  ;;  %v2817_v14 = vsel %vm2805_vm2, %v2795_v2, %v2798_v49  ;;  %vm5527_vm4 = vcmp.lt.s32.totalorder %v5526_v46, 0  ;;  %v2596_v4 = vshll.u32 %v10026_v6, %v7135_v37 }
 0x14e   : > { %v2819_v26 = vsel %vm2807_vm3, %v2801_v18, %v2818_v55  ;;  %v7277_v12 = vand.u32 31, %v7220_v39  ;;  %vm2806_vm6 = vcmp.lt.s32.totalorder %v7233_v23, 2  ;;  %vm2602_vm8 = vcmp.lt.s32.totalorder %v7145_v57, 4 }
 0x14f   : > { %v2371_v48 = vadd.s32 1, %v5540_v7  ;;  %v7281_v41 = vsub.s32 %v2730_v21, %v2733_v42  ;;  %v2816_v29 = vsel %vm2806_vm6, %v2813_v19, %v2815_v51  ;;  %v2820_v40 = vsel %vm2806_vm6, %v2817_v14, %v2819_v26 }
 0x150   : > { %v7287_v8 = vshll.u32 %v2781_v1, 8  ;;  %v5560_v45 = vadd.s32 4294967169, %v2880_v13  ;;  %v7290_v16 = vadd.f32 %v7097_v15, %v1851_v59  ;;  %v10033_v18 = vxor.u32 2147483648, %v7153_v17 }
 0x151   : > { %v7299_v21 = vsel %vm5527_vm4, 0, %v5526_v46  ;;  %v7303_v58 = vor.u32 %v7215_v61, %v7160_v36  ;;  %v2598_v19 = vor.u32 %v2597_v52, %v2596_v4  ;;  %v7306_v1 = vsub.s32 32, %v7277_v12 }
 0x152   : > { %10032 = vst [vmem:[#allocation33_spill] sm:$0xff] %v7290_v16  ;;  %v7297_v7 = vsel %vm2157_vm0, %v10033_v18, %v7153_v17  ;;  %v7309_v15 = vmul.u32.u64.low %v7287_v8, %v2816_v29  ;;  %v7310_v59 = vmul.u32.u64.high %v7287_v8, %v2816_v29, %v7309_v15  ;;  %v2886_v51 = vadd.s32 1, %v5560_v45 }
 0x153   : > { %10034 = vst [vmem:[#allocation34_spill] sm:$0xff] %v7303_v58  ;;  %vm2372_vm9 = vcmp.gt.s32.totalorder %v2371_v48, 0  ;;  %v2736_v17 = vsub.s32 0, %v7281_v41  ;;  %v7315_v46 = vmul.u32.u64.low %v7287_v8, %v2820_v40  ;;  %v7316_v55 = vmul.u32.u64.high %v7287_v8, %v2820_v40, %v7315_v46 }
 0x154   : > { %v2025_v36 = vsub.s32 4294967266, %v7299_v21  ;;  %v7320_v61 = vshrl.u32 %v7220_v39, 5  ;;  %v2810_v13 = vsel %vm2808_vm1, %v2798_v49, 2102212464  ;;  %vm2887_vm10 = vcmp.gt.s32.totalorder %v2886_v51, 0 }
 0x155   : > { %v7327_v52 = vsel %vm2602_vm8, %v7303_v58, 920167782  ;;  %v2284_v42 = vshll.u32 %v10029_v27, %v7277_v12  ;;  %v2789_v14 = vshrl.u32 %v10022_v43, %v7231_v56  ;;  %v2888_v26 = vsel %vm2887_vm10, %v2886_v51, 0 }
 0x156   : > { %10035 = vst [vmem:[#allocation35_spill] sm:$0xff] %v7327_v52  ;;  %v2021_v4 = vsub.s32 32, %v7299_v21  ;;  %v2285_v39 = vshrl.u32 %v10026_v6, %v7306_v1  ;;  %v7338_v49 = vshrl.u32 %v10030_v24, %v7306_v1  ;;  %v2373_v29 = vsel %vm2372_vm9, %v2371_v48, 0 }
 0x157   : > { %v5553_v40 = vmin.u32 %v2736_v17, %v7281_v41  ;;  %v2809_v45 = vsel %vm2805_vm2, %v2789_v14, %v2792_v9  ;;  %v2811_v18 = vsel %vm2807_vm3, %v2795_v2, %v2810_v13  ;;  %v2890_v56 = vand.u32 31, %v2888_v26 }
 0x158   : > { %v2026_v51 = vadd.s32 127, %v2025_v36  ;;  %v7347_v46 = vshll.u32 %v10026_v6, %v7277_v12  ;;  %v2982_v47 = vand.u32 2139095040, %v7170_v62  ;;  %v2022_v48 = vshll.u32 %v7120_v44, %v7299_v21 }
 0x159   : > { %v7355_v17 = vsel %vm2602_vm8, %v2598_v19, 1326507024  ;;  %v7357_v9 = vshrl.u32 %v2373_v29, 5  ;;  %v7359_v2 = vsub.s32 32, %v2890_v56  ;;  %v10037_v36 = vand.u32 2147483647, %v6826_v5 }
 0x15a   : > { %10036 = vst [vmem:[#allocation36_spill] sm:$0xff] %v7355_v17  ;;  %v7367_v14 = vor.u32 %v2285_v39, %v2284_v42  ;;  %v2812_v44 = vsel %vm2806_vm6, %v2809_v45, %v2811_v18  ;;  %v2831_v21 = vadd.s32 1, %v7310_v59  ;;  %v2023_v19 = vshrl.u32 %v7093_v32, %v2021_v4 }
 0x15b   : > { %vm7363_vm11 = vcmp.le.f32.partialorder %v10037_v36, 0.7853982  ;;  %v7375_v62 = vand.u32 31, %v2373_v29  ;;  %v2738_v58 = vclz %v5553_v40  ;;  %vm2830_vm12 = vc.u32 %v7316_v55, %v7309_v15  ;;  %v7388_v29 = vpop.permute.xlu1 %1729 }
 0x15c   : > { %10040 = vst [vmem:[#allocation37_spill] sm:$0xff] %v7367_v14  ;;  %v2027_v36 = vshll.u32 %v2026_v51, 23  ;;  %v2983_v17 = vshrl.u32 %v2982_v47, 23  ;;  %v10042_v42 = vand.u32 2147483647, %v7210_v34  ;;  %v2894_v52 = vshrl.u32 %v10027_v10, %v7359_v2 }
 0x15d   : > { %10041 = vst [vmem:[#allocation38_spill] sm:$0xff] %v7375_v62  ;;  %v2828_v23 = vmul.u32 %v7287_v8, %v2812_v44  ;;  %v2893_v45 = vshll.u32 %v10022_v43, %v2890_v56  ;;  %v2896_v32 = vshll.u32 %v10027_v10, %v2890_v56  ;;  %v2897_v4 = vshrl.u32 %v10028_v3, %v7359_v2 }
 0x15e   : > { %v2883_v39 = vand.u32 8388607, %v10042_v42  ;;  %v2832_v40 = vsel %vm2830_vm12, %v2831_v21, %v7310_v59  ;;  %v7391_v47 = vshrl.u32 %v2888_v26, 5  ;;  %v2899_v18 = vshll.u32 %v10028_v3, %v2890_v56 }
 0x15f   : > { %v2900_v51 = vshrl.u32 %v10029_v27, %v7359_v2  ;;  %v5554_v42 = vadd.s32 4294967294, %v2738_v58  ;;  %v7396_v8 = vor.u32 %v2894_v52, %v2893_v45  ;;  %v7398_v44 = vor.u32 %v2897_v4, %v2896_v32 }
 0x160   : > { %v2902_v57 = vshll.u32 %v10029_v27, %v2890_v56  ;;  %v2903_v37 = vshrl.u32 %v10026_v6, %v7359_v2  ;;  %v2905_v59 = vshll.u32 %v10026_v6, %v2890_v56  ;;  %v2906_v26 = vshrl.u32 %v10030_v24, %v7359_v2 }
 0x161   : > { %v2901_v33 = vor.u32 %v2900_v51, %v2899_v18  ;;  %v2028_v21 = vor.u32 4788187, %v2027_v36  ;;  %v7407_v34 = vsub.s32 32, %v7375_v62  ;;  %v7409_v58 = vadd.s32 %v2832_v40, %v2828_v23  ;;  %v1811_v36 = vpop.permute.xlu1 %1810 }
 0x162   : > { %v5564_v52 = vadd.s32 4294967169, %v2983_v17  ;;  %vm2293_vm13 = vcmp.lt.s32.totalorder %v7320_v61, 4  ;;  %v2884_v45 = vor.u32 8388608, %v2883_v39  ;;  %v2904_v32 = vor.u32 %v2903_v37, %v2902_v57 }
 0x163   : > { %10043 = vst [vmem:[#allocation39_spill] sm:$0xff] %v7407_v34  ;;  %v2907_v4 = vor.u32 %v2906_v26, %v2905_v59  ;;  %v2140_v56 = vsel %vm7363_vm11, %v6826_v5, %v7089_v22  ;;  %vm5555_vm14 = vcmp.lt.s32.totalorder %v5554_v42, 0  ;;  %vm2908_vm15 = vcmp.lt.s32.totalorder %v7391_v47, 1 }
 0x164   : > { %vm2910_vm1 = vcmp.lt.s32.totalorder %v7391_v47, 3  ;;  %vm2911_vm2 = vcmp.lt.s32.totalorder %v7391_v47, 4  ;;  %v2916_v17 = vsel %vm2908_vm15, %v7396_v8, %v7398_v44  ;;  %v2920_v22 = vsel %vm2908_vm15, %v7398_v44, %v2901_v33 }
 0x165   : > { %v2917_v37 = vsel %vm2911_vm2, %v2904_v32, 920167782  ;;  %v2921_v57 = vsel %vm2911_vm2, %v2907_v4, 1326507024  ;;  %v2024_v39 = vor.u32 %v2023_v19, %v2022_v48  ;;  %v2029_v23 = vand.u32 2147483647, %v2028_v21 }
 0x166   : > { %v2834_v40 = vadd.s32 536870912, %v7409_v58  ;;  %v2918_v18 = vsel %vm2910_vm1, %v2901_v33, %v2917_v37  ;;  %v2989_v51 = vadd.s32 1, %v5564_v52  ;;  %vm2909_vm3 = vcmp.lt.s32.totalorder %v7391_v47, 2 }
 0x167   : > { %v2922_v59 = vsel %vm2910_vm1, %v2904_v32, %v2921_v57  ;;  %v7436_v26 = vshll.u32 %v2884_v45, 8  ;;  %vm2396_vm4 = vcmp.lt.s32.totalorder %v7357_v9, 4  ;;  %v7440_v11 = vsel %vm5555_vm14, 0, %v5554_v42 }
 0x168   : > { %v2919_v48 = vsel %vm2909_vm3, %v2916_v17, %v2918_v18  ;;  %v2923_v19 = vsel %vm2909_vm3, %v2920_v22, %v2922_v59  ;;  %5947 = vcosq.f32 %v2140_v56  ;;  %v2387_v21 = vshll.u32 %v10029_v27, %v7375_v62  ;;  %v7459_v22 = vpop.permute.xlu1 %1734  ;;  %v1815_v18 = vpop.permute.xlu0 %1814 }
 0x169   : > { %v2388_v52 = vshrl.u32 %v10026_v6, %v7407_v34  ;;  %v2391_v45 = vshrl.u32 %v10030_v24, %v7407_v34  ;;  %v2138_v32 = vsub.s32 4, %v6920_v31  ;;  %v2031_v42 = vcvt.s32.f32 %v2024_v39 }
 0x16a   : > { %v7453_v4 = vshrl.u32 %v2834_v40, 30  ;;  %v7456_v17 = vmul.u32.u64.low %v7436_v26, %v2923_v19  ;;  %v7457_v37 = vmul.u32.u64.high %v7436_v26, %v2923_v19, %v7456_v17  ;;  %vm1951_vm6 = vcmp.lt.s32.totalorder %v6888_v35, 0 }
 0x16b   : > { %v2746_v57 = vsub.s32 4294967266, %v7440_v11  ;;  %v7464_v59 = vmul.u32.u64.low %v7436_v26, %v2919_v48  ;;  %v7465_v38 = vmul.u32.u64.high %v7436_v26, %v2919_v48, %v7464_v59  ;;  %5949 = vsinq.f32 %v2140_v56 }
 0x16c   : > { %10044 = vst [vmem:[#allocation40_spill] sm:$0xff] %v7453_v4  ;;  %v2032_v39 = vmul.f32 %v2031_v42, %v2029_v23  ;;  %v7471_v40 = vsel %vm2293_vm13, %v7367_v14, 920167782  ;;  %v2390_v19 = vshll.u32 %v10026_v6, %v7375_v62  ;;  %vm2990_vm9 = vcmp.gt.s32.totalorder %v2989_v51, 0 }
 0x16d   : > { %v7475_v17 = vor.u32 %v2388_v52, %v2387_v21  ;;  %v2913_v34 = vsel %vm2911_vm2, %v2901_v33, 2102212464  ;;  %v1837_v48 = vmul.f32 %v6815_v53, %v1811_v36  ;;  %v2139_v56 = vsel %vm2054_vm5, %v2138_v32, %v6920_v31  ;;  %v1905_v32 = vpop.permute.xlu1 %1904 }
 0x16e   : > { %v10046_v23 = vor.u32 %v7338_v49, %v7347_v46  ;;  %v2392_v62 = vor.u32 %v2391_v45, %v2390_v19  ;;  %v2836_v21 = vshll.u32 %v7453_v4, 30  ;;  %v2892_v52 = vshrl.u32 %v10022_v43, %v7359_v2 }
 0x16f   : > { %10045 = vst [vmem:[#allocation41_spill] sm:$0xff] %v7475_v17  ;;  %v2747_v33 = vadd.s32 127, %v2746_v57  ;;  %v7494_v36 = vmul.f32 %v6815_v53, %v1815_v18  ;;  %v7496_v14 = vsel %vm2990_vm9, %v2989_v51, 0  ;;  %v1758_v31 = vmul.f32 %v6817_v54, %v7388_v29  ;;  %v1819_v57 = vpop.permute.xlu0 %1818 }
 0x170   : > { %v7488_v42 = vsel %vm2293_vm13, %v10046_v23, 1326507024  ;;  %v2033_v49 = vxor.u32 2147483648, %v2032_v39  ;;  %v2912_v46 = vsel %vm2908_vm15, %v2892_v52, %v7396_v8  ;;  %v2914_v45 = vsel %vm2910_vm1, %v7398_v44, %v2913_v34 }
 0x171   : > { %v2141_v2 = vsel %vm7363_vm11, 0, %v2139_v56  ;;  %v7511_v51 = vsel %vm2396_vm4, %v7475_v17, 920167782  ;;  %v2934_v29 = vadd.s32 1, %v7465_v38  ;;  %v3085_v18 = vand.u32 2139095040, %v7290_v16 }
 0x172   : > { %v1852_v19 = vadd.f32 %v1837_v48, %v1758_v31  ;;  %v2742_v8 = vsub.s32 32, %v7440_v11  ;;  %v7517_v23 = vsub.s32 %v7409_v58, %v2836_v21  ;;  %v7520_v34 = vand.u32 31, %v7496_v14 }
 0x173   : > { %vm2933_vm5 = vc.u32 %v7457_v37, %v7464_v59  ;;  %v2748_v13 = vshll.u32 %v2747_v33, 23  ;;  %v2915_v44 = vsel %vm2909_vm3, %v2912_v46, %v2914_v45  ;;  %v3758_v56 = vadd.s32 3, %v2141_v2 }
 0x174   : > { %10047 = vst [vmem:[#allocation42_spill] sm:$0xff] %v7520_v34  ;;  %v1931_v52 = vmul.f32 %v6821_v60, %v1905_v32  ;;  %v7529_v48 = vsel %vm1951_vm6, %v2033_v49, %v2032_v39  ;;  %v7533_v58 = vsel %vm2396_vm4, %v2392_v62, 1326507024  ;;  %v7536_v21 = vmul.f32 %v6815_v53, %v1819_v57 }
 0x175   : > { %10048 = vst [vmem:[#allocation43_spill] sm:$0xff] %v7533_v58  ;;  %vm2144_vm10 = vweird.f32 %v6826_v5  ;;  %v2145_v33 = vand.u32 3, %v2141_v2  ;;  %v5948_v47 = vpop.eup %5947  ;;  %v2726_v31 = vadd.s32 %v7198_v30, %v7195_v50  ;;  %v2935_v46 = vsel %vm2933_vm5, %v2934_v29, %v7465_v38 }
 0x176   : > { %v3759_v45 = vand.u32 3, %v3758_v56  ;;  %v7542_v39 = vadd.f32 %v1931_v52, %v1852_v19  ;;  %v7545_v49 = vsub.s32 32, %v7520_v34  ;;  %v2931_v62 = vmul.u32 %v7436_v26, %v2915_v44 }
 0x177   : > { %v3086_v53 = vshrl.u32 %v3085_v18, 23  ;;  %v2151_v32 = vxor.u32 2147483648, %v5948_v47  ;;  %v2743_v2 = vshll.u32 %v7281_v41, %v7440_v11  ;;  %v2744_v57 = vshrl.u32 %v2726_v31, %v2742_v8  ;;  %v7561_v18 = vld [vmem:[%s7557_s27] ss:$0 sm:$0xff] }
 0x178   : > { %10049 = vst [vmem:[#allocation44_spill] sm:$0xff] %v7542_v39  ;;  %10050 = vst [vmem:[#allocation45_spill] sm:$0xff] %v7545_v49  ;;  %v2749_v16 = vor.u32 4788187, %v2748_v13  ;;  %v2839_v4 = vsub.s32 0, %v7517_v23  ;;  %v5950_v50 = vpop.eup %5949  ;;  %v7551_v30 = vadd.s32 %v2935_v46, %v2931_v62  ;;  %vm2150_vm11 = vcmp.eq.s32.totalorder %v2145_v33, 2 }
 0x179   : > { %vm3764_vm12 = vcmp.eq.s32.totalorder %v3759_v45, 2  ;;  %v3188_v38 = vand.u32 2139095040, %v7542_v39  ;;  %v2148_v26 = vxor.u32 2147483648, %v5950_v50  ;;  %v2152_v29 = vsel %vm2150_vm11, %v2151_v32, %v5950_v50 }
 0x17a   : > { %vm9981_vm14 = vcmask 64512   ;;  %v3766_v11 = vsel %vm3764_vm12, %v2151_v32, %v5950_v50  ;;  %vm2146_vm15 = vcmp.lt.s32.totalorder %v2145_v33, 2  ;;  %vm2147_vm1 = vcmp.eq.s32.totalorder %v2145_v33, 0 }
 0x17b   : > { %vm3761_vm2 = vcmp.eq.s32.totalorder %v3759_v45, 0  ;;  %v3189_v41 = vshrl.u32 %v3188_v38, 23  ;;  %v2149_v19 = vsel %vm2147_vm1, %v5948_v47, %v2148_v26  ;;  %vm3760_vm3 = vcmp.lt.s32.totalorder %v3759_v45, 2 }
 0x17c   : > { %v3763_v8 = vsel %vm3761_vm2, %v5948_v47, %v2148_v26  ;;  %v10051_v13 = vand.u32 2147483647, %v6841_v28  ;;  %v2937_v56 = vadd.s32 536870912, %v7551_v30  ;;  %v2153_v52 = vsel %vm2146_vm15, %v2149_v19, %v2152_v29 }
 0x17d   : > { %v3767_v31 = vsel %vm3760_vm3, %v3763_v8, %v3766_v11  ;;  %v5572_v46 = vadd.s32 4294967169, %v3189_v41  ;;  %v2154_v33 = vsel %vm2144_vm10, nan, %v2153_v52  ;;  %v9931_v45 = vand.u32 2147483647, %v7542_v39 }
 0x17e   : > { %vm7565_vm9 = vcmp.le.f32.partialorder %v10051_v13, 0.7853982  ;;  %v3768_v62 = vsel %vm2144_vm10, nan, %v3767_v31  ;;  %v2745_v32 = vor.u32 %v2744_v57, %v2743_v2  ;;  %v3501_v50 = vmul.f32 %v7561_v18, %v2154_v33 }
 0x17f   : > { %v2243_v47 = vsel %vm7565_vm9, %v6841_v28, %v7297_v7  ;;  %v3195_v38 = vadd.s32 1, %v5572_v46  ;;  %v2241_v26 = vsub.s32 4, %v6975_v25  ;;  %v2750_v29 = vand.u32 2147483647, %v2749_v16 }
 0x180   : > { %v5557_v11 = vmin.u32 %v2839_v4, %v7517_v23  ;;  %v3005_v5 = vshll.u32 %v10029_v27, %v7520_v34  ;;  %v3006_v41 = vshrl.u32 %v10026_v6, %v7545_v49  ;;  %v3519_v19 = vsel %vm9981_vm14, %v3501_v50, 0.0 }
 0x181   : > { %v5122_v8 = vmul.f32 %v7561_v18, %v3768_v62  ;;  %vm3196_vm5 = vcmp.gt.s32.totalorder %v3195_v38, 0  ;;  %5951 = vsinq.f32 %v2243_v47  ;;  %v7588_v7 = vshrl.u32 %v2937_v56, 30  ;;  %3520 = vadd.xlane.f32.xlu0 %v3519_v19 }
 0x182   : > { %v3192_v16 = vand.u32 8388607, %v9931_v45  ;;  %v3197_v2 = vsel %vm3196_vm5, %v3195_v38, 0  ;;  %5953 = vcosq.f32 %v2243_v47  ;;  %v2752_v4 = vcvt.s32.f32 %v2745_v32 }
 0x183   : > { %10054 = vst [vmem:[#allocation46_spill] sm:$0xff] %v7588_v7  ;;  %v7593_v57 = vshrl.u32 %v7496_v14, 5  ;;  %v3199_v13 = vand.u32 31, %v3197_v2  ;;  %v2242_v52 = vsel %vm2157_vm0, %v2241_v26, %v6975_v25  ;;  %v7598_v31 = vor.u32 %v3006_v41, %v3005_v5 }
 0x184   : > { %v7602_v56 = vshll.u32 %v10026_v6, %v7520_v34  ;;  %v7606_v46 = vshrl.u32 %v10030_v24, %v7545_v49  ;;  %v5568_v33 = vadd.s32 4294967169, %v3086_v53  ;;  %v7608_v62 = vmul.f32 %v2752_v4, %v2750_v29 }
 0x185   : > { %10055 = vst [vmem:[#allocation47_spill] sm:$0xff] %v7593_v57  ;;  %10056 = vst [vmem:[#allocation48_spill] sm:$0xff] %v7598_v31  ;;  %v2841_v14 = vclz %v5557_v11  ;;  %v5139_v47 = vsel %vm9981_vm14, %v5122_v8, 0.0  ;;  %v7611_v32 = vsub.s32 32, %v3199_v13  ;;  %v2939_v25 = vshll.u32 %v7588_v7, 30 }
 0x186   : > { %5140 = vadd.xlane.f32.xlu0 %v5139_v47  ;;  %v3193_v50 = vor.u32 8388608, %v3192_v16  ;;  %v7614_v38 = vshrl.u32 %v3197_v2, 5  ;;  %v7618_v26 = vsel %vm7565_vm9, 0, %v2242_v52  ;;  %v3202_v5 = vshll.u32 %v10022_v43, %v3199_v13  ;;  %v1740_v47 = vpop.permute.xlu1 %1739 }
 0x187   : > { %v3205_v53 = vshll.u32 %v10027_v10, %v3199_v13  ;;  %v3208_v29 = vshll.u32 %v10028_v3, %v3199_v13  ;;  %v3211_v11 = vshll.u32 %v10029_v27, %v3199_v13  ;;  %v3203_v41 = vshrl.u32 %v10027_v10, %v7611_v32 }
 0x188   : > { %v3206_v19 = vshrl.u32 %v10028_v3, %v7611_v32  ;;  %v3209_v8 = vshrl.u32 %v10029_v27, %v7611_v32  ;;  %v3212_v44 = vshrl.u32 %v10026_v6, %v7611_v32  ;;  %v7632_v16 = vadd.s32 4294967294, %v2841_v14 }
 0x189   : > { %v3214_v2 = vshll.u32 %v10026_v6, %v3199_v13  ;;  %v3215_v4 = vshrl.u32 %v10030_v24, %v7611_v32  ;;  %v3862_v52 = vadd.s32 3, %v7618_v26  ;;  %v3204_v45 = vor.u32 %v3203_v41, %v3202_v5 }
 0x18a   : > { %v3207_v39 = vor.u32 %v3206_v19, %v3205_v53  ;;  %v3210_v34 = vor.u32 %v3209_v8, %v3208_v29  ;;  %v3213_v49 = vor.u32 %v3212_v44, %v3211_v11  ;;  %v7639_v7 = vsub.s32 %v7551_v30, %v2939_v25 }
 0x18b   : > { %v7641_v17 = vadd.s32 1, %v5568_v33  ;;  %v3216_v58 = vor.u32 %v3215_v4, %v3214_v2  ;;  %vm3217_vm0 = vcmp.lt.s32.totalorder %v7614_v38, 1  ;;  %vm3220_vm10 = vcmp.lt.s32.totalorder %v7614_v38, 4 }
 0x18c   : > { %v3225_v13 = vsel %vm3217_vm0, %v3204_v45, %v3207_v39  ;;  %v7647_v14 = vshll.u32 %v3193_v50, 8  ;;  %v1760_v5 = vmul.f32 %v6817_v54, %v1740_v47  ;;  %vm3219_vm11 = vcmp.lt.s32.totalorder %v7614_v38, 3 }
 0x18d   : > { %v3226_v30 = vsel %vm3220_vm10, %v3213_v49, 920167782  ;;  %v3863_v25 = vand.u32 3, %v3862_v52  ;;  %v10057_v33 = vand.u32 2147483647, %v6888_v35  ;;  %vm3218_vm15 = vcmp.lt.s32.totalorder %v7614_v38, 2 }
 0x18e   : > { %v7659_v29 = vpop.eup %5951  ;;  %v3227_v50 = vsel %vm3219_vm11, %v3210_v34, %v3226_v30  ;;  %v3229_v11 = vsel %vm3217_vm0, %v3207_v39, %v3210_v34  ;;  %v3230_v41 = vsel %vm3220_vm10, %v3216_v58, 1326507024  ;;  %v1759_v8 = vmul.f32 %v6817_v54, %v7459_v22  ;;  %v1913_v54 = vpop.permute.xlu0 %1912 }
 0x18f   : > { %vm7655_vm12 = vcmp.le.f32.partialorder %v10057_v33, 0.7853982  ;;  %v7668_v19 = vpop.eup %5953  ;;  %v3228_v44 = vsel %vm3218_vm15, %v3225_v13, %v3227_v50  ;;  %v3231_v2 = vsel %vm3219_vm11, %v3213_v49, %v3230_v41  ;;  %v2942_v52 = vsub.s32 0, %v7639_v7 }
 0x190   : > { %v2037_v4 = vsel %vm7655_vm12, %v6888_v35, %v7529_v48  ;;  %v3232_v58 = vsel %vm3218_vm15, %v3229_v11, %v3231_v2  ;;  %v7684_v47 = vmul.u32.u64.low %v7647_v14, %v3228_v44  ;;  %v7685_v30 = vmul.u32.u64.high %v7647_v14, %v3228_v44, %v7684_v47 }
 0x191   : > { %v7689_v22 = vmul.u32.u64.low %v7647_v14, %v3232_v58  ;;  %v7690_v13 = vmul.u32.u64.high %v7647_v14, %v3232_v58, %v7689_v22  ;;  %v9945_v49 = vxor.u32 2147483648, %v7659_v29  ;;  %v2035_v33 = vsub.s32 4, %v7071_v63 }
 0x192   : > { %v9942_v48 = vxor.u32 2147483648, %v7668_v19  ;;  %vm3865_vm1 = vcmp.eq.s32.totalorder %v3863_v25, 0  ;;  %v1854_v50 = vadd.f32 %v7536_v21, %v1760_v5  ;;  %5955 = vcosq.f32 %v2037_v4  ;;  %v1909_v21 = vpop.permute.xlu1 %1908 }
 0x193   : > { %v3867_v11 = vsel %vm3865_vm1, %v7668_v19, %v9945_v49  ;;  %vm3868_vm2 = vcmp.eq.s32.totalorder %v3863_v25, 2  ;;  %5957 = vsinq.f32 %v2037_v4  ;;  %v1933_v41 = vmul.f32 %v6821_v60, %v1913_v54 }
 0x194   : > { %vm5559_vm3 = vcmp.lt.s32.totalorder %v7632_v16, 0  ;;  %v3222_v44 = vsel %vm3220_vm10, %v3210_v34, 2102212464  ;;  %vm3864_vm9 = vcmp.lt.s32.totalorder %v3863_v25, 2  ;;  %v3870_v2 = vsel %vm3868_vm2, %v9942_v48, %v7659_v29 }
 0x195   : > { %vm2672_vm5 = vcmp.lt.s32.totalorder %v7083_v20, 0  ;;  %v1853_v5 = vadd.f32 %v7494_v36, %v1759_v8  ;;  %v3201_v4 = vshrl.u32 %v10022_v43, %v7611_v32  ;;  %vm2247_vm1 = vweird.f32 %v6841_v28 }
 0x196   : > { %v3871_v58 = vsel %vm3864_vm9, %v3867_v11, %v3870_v2  ;;  %v5561_v54 = vmin.u32 %v2942_v52, %v7639_v7  ;;  %v2036_v25 = vsel %vm1951_vm6, %v2035_v33, %v7071_v63  ;;  %v7717_v22 = vadd.f32 %v1933_v41, %v1854_v50 }
 0x197   : > { %v3872_v34 = vsel %vm2247_vm1, nan, %v3871_v58  ;;  %v3221_v36 = vsel %vm3217_vm0, %v3201_v4, %v3204_v45  ;;  %v3223_v32 = vsel %vm3219_vm11, %v3207_v39, %v3222_v44  ;;  %v1932_v11 = vmul.f32 %v6821_v60, %v1909_v21 }
 0x198   : > { %10060 = vst [vmem:[#allocation49_spill] sm:$0xff] %v7717_v22  ;;  %v5123_v8 = vmul.f32 %v7561_v18, %v3872_v34  ;;  %v7728_v52 = vsel %vm5559_vm3, 0, %v7632_v16  ;;  %v3010_v63 = vor.u32 %v7606_v46, %v7602_v56  ;;  %v3243_v33 = vadd.s32 1, %v7685_v30 }
 0x199   : > { %v3394_v50 = vand.u32 2139095040, %v7717_v22  ;;  %v2754_v45 = vxor.u32 2147483648, %v7608_v62  ;;  %vm3242_vm6 = vc.u32 %v7690_v13, %v7684_v47  ;;  %v7738_v60 = vadd.f32 %v1932_v11, %v1853_v5 }
 0x19a   : > { %v5142_v39 = vsel %vm9981_vm14, %v5123_v8, 0.0  ;;  %v2944_v41 = vclz %v5561_v54  ;;  %v3224_v16 = vsel %vm3218_vm15, %v3221_v36, %v3223_v32  ;;  %v7744_v56 = vsel %vm7655_vm12, 0, %v2036_v25 }
 0x19b   : > { %10061 = vst [vmem:[#allocation50_spill] sm:$0xff] %v7738_v60  ;;  %5143 = vadd.xlane.f32.xlu0 %v5142_v39  ;;  %v3395_v46 = vshrl.u32 %v3394_v50, 23  ;;  %v2829_v44 = vadd.s32 %v7309_v15, %v7316_v55  ;;  %v2845_v2 = vsub.s32 32, %v7728_v52  ;;  %v2849_v21 = vsub.s32 4294967266, %v7728_v52 }
 0x19c   : > { %vm3093_vm0 = vcmp.gt.s32.totalorder %v7641_v17, 0  ;;  %vm9955_vm10 = vcmp.lt.s32.totalorder %v7593_v57, 4  ;;  %v3244_v38 = vsel %vm3242_vm6, %v3243_v33, %v7685_v30  ;;  %v3291_v4 = vand.u32 2139095040, %v7738_v60 }
 0x19d   : > { %v5580_v5 = vadd.s32 4294967169, %v3395_v46  ;;  %v7757_v53 = vsel %vm9955_vm10, %v7598_v31, 920167782  ;;  %v7761_v15 = vsel %vm9955_vm10, %v3010_v63, 1326507024  ;;  %v3240_v55 = vmul.u32 %v7647_v14, %v3224_v16 }
 0x19e   : > { %10062 = vst [vmem:[#allocation51_spill] sm:$0xff] %v7757_v53  ;;  %10063 = vst [vmem:[#allocation52_spill] sm:$0xff] %v7761_v15  ;;  %v2042_v58 = vand.u32 3, %v7744_v56  ;;  %v7768_v30 = vsel %vm2672_vm5, %v2754_v45, %v7608_v62  ;;  %v5562_v54 = vadd.s32 4294967294, %v2944_v41  ;;  %v3094_v34 = vsel %vm3093_vm0, %v7641_v17, 0 }
 0x19f   : > { %10064 = vst [vmem:[#allocation53_spill] sm:$0xff] %v7768_v30  ;;  %v3401_v25 = vadd.s32 1, %v5580_v5  ;;  %v7771_v36 = vpop.eup %5955  ;;  %v7775_v8 = vshrl.u32 %v2829_v44, %v2845_v2  ;;  %v7777_v11 = vadd.s32 127, %v2849_v21  ;;  %v7779_v14 = vadd.s32 %v3244_v38, %v3240_v55 }
 0x1a0   : > { %v7781_v63 = vpop.eup %5957  ;;  %v9941_v62 = vxor.u32 2147483648, %v7771_v36  ;;  %v9944_v33 = vand.u32 2147483647, %v7717_v22  ;;  %v3292_v17 = vshrl.u32 %v3291_v4, 23  ;;  %v7785_v50 = vshrl.u32 %v3094_v34, 5 }
 0x1a1   : > { %vm3402_vm11 = vcmp.gt.s32.totalorder %v3401_v25, 0  ;;  %v9943_v45 = vxor.u32 2147483648, %v7781_v63  ;;  %vm2047_vm12 = vcmp.eq.s32.totalorder %v2042_v58, 2  ;;  %vm5563_vm15 = vcmp.lt.s32.totalorder %v5562_v54, 0 }
 0x1a2   : > { %10065 = vst [vmem:[#allocation54_spill] sm:$0xff] %v7785_v50  ;;  %v3403_v39 = vsel %vm3402_vm11, %v3401_v25, 0  ;;  %vm2044_vm2 = vcmp.eq.s32.totalorder %v2042_v58, 0  ;;  %v2049_v41 = vsel %vm2047_vm12, %v9941_v62, %v7781_v63  ;;  %v3246_v46 = vadd.s32 536870912, %v7779_v14 }
 0x1a3   : > { %v3405_v16 = vand.u32 31, %v3403_v39  ;;  %vm2041_vm3 = vweird.f32 %v6888_v35  ;;  %vm2043_vm9 = vcmp.lt.s32.totalorder %v2042_v58, 2  ;;  %v2046_v44 = vsel %vm2044_vm2, %v7771_v36, %v9943_v45 }
 0x1a4   : > { %v2050_v2 = vsel %vm2043_vm9, %v2046_v44, %v2049_v41  ;;  %v3398_v21 = vand.u32 8388607, %v9944_v33  ;;  %v5576_v5 = vadd.s32 4294967169, %v3292_v17  ;;  %v3404_v55 = vshrl.u32 %v3403_v39, 5 }
 0x1a5   : > { %v3406_v38 = vsub.s32 32, %v3405_v16  ;;  %v2051_v4 = vsel %vm2041_vm3, nan, %v2050_v2  ;;  %v3408_v25 = vshll.u32 %v10022_v43, %v3405_v16  ;;  %v3411_v62 = vshll.u32 %v10027_v10, %v3405_v16 }
 0x1a6   : > { %v3500_v58 = vmul.f32 %v7561_v18, %v2051_v4  ;;  %v3414_v41 = vshll.u32 %v10028_v3, %v3405_v16  ;;  %v3417_v17 = vshll.u32 %v10029_v27, %v3405_v16  ;;  %v3420_v39 = vshll.u32 %v10026_v6, %v3405_v16 }
 0x1a7   : > { %v3409_v48 = vshrl.u32 %v10027_v10, %v3406_v38  ;;  %v3412_v45 = vshrl.u32 %v10028_v3, %v3406_v38  ;;  %v3415_v44 = vshrl.u32 %v10029_v27, %v3406_v38  ;;  %v3418_v33 = vshrl.u32 %v10026_v6, %v3406_v38 }
 0x1a8   : > { %v3516_v2 = vsel %vm9981_vm14, %v3500_v58, 0.0  ;;  %v3421_v4 = vshrl.u32 %v10030_v24, %v3406_v38  ;;  %v7812_v22 = vand.u32 31, %v3094_v34  ;;  %v3298_v31 = vadd.s32 1, %v5576_v5 }
 0x1a9   : > { %v3410_v49 = vor.u32 %v3409_v48, %v3408_v25  ;;  %v3413_v32 = vor.u32 %v3412_v45, %v3411_v62  ;;  %3517 = vadd.xlane.f32.xlu1 %v3516_v2  ;;  %v3416_v50 = vor.u32 %v3415_v44, %v3414_v41  ;;  %v3419_v53 = vor.u32 %v3418_v33, %v3417_v17 }
 0x1aa   : > { %10066 = vst [vmem:[#allocation55_spill] sm:$0xff] %v7812_v22  ;;  %v7815_v15 = vsel %vm5563_vm15, 0, %v5562_v54  ;;  %v3399_v57 = vor.u32 8388608, %v3398_v21  ;;  %v3422_v30 = vor.u32 %v3421_v4, %v3420_v39  ;;  %v3654_v20 = vadd.s32 3, %v7744_v56 }
 0x1ab   : > { %v7818_v16 = vshrl.u32 %v3246_v46, 30  ;;  %vm3423_vm6 = vcmp.lt.s32.totalorder %v3404_v55, 1  ;;  %vm3426_vm0 = vcmp.lt.s32.totalorder %v3404_v55, 4  ;;  %v2248_v48 = vand.u32 3, %v7618_v26 }
 0x1ac   : > { %vm3425_vm11 = vcmp.lt.s32.totalorder %v3404_v55, 3  ;;  %v3428_v34 = vsel %vm3426_vm0, %v3416_v50, 2102212464  ;;  %v3431_v62 = vsel %vm3423_vm6, %v3410_v49, %v3413_v32  ;;  %v3432_v45 = vsel %vm3426_vm0, %v3419_v53, 920167782 }
 0x1ad   : > { %10067 = vst [vmem:[#allocation56_spill] sm:$0xff] %v7818_v16  ;;  %v3407_v33 = vshrl.u32 %v10022_v43, %v3406_v38  ;;  %vm3424_vm12 = vcmp.lt.s32.totalorder %v3404_v55, 2  ;;  %v3433_v5 = vsel %vm3425_vm11, %v3416_v50, %v3432_v45  ;;  %vm3299_vm15 = vcmp.gt.s32.totalorder %v3298_v31, 0 }
 0x1ae   : > { %v3434_v54 = vsel %vm3424_vm12, %v3431_v62, %v3433_v5  ;;  %v3435_v21 = vsel %vm3423_vm6, %v3413_v32, %v3416_v50  ;;  %v3436_v25 = vsel %vm3426_vm0, %v3422_v30, 1326507024  ;;  %v3439_v56 = vshll.u32 %v3399_v57, 8 }
 0x1af   : > { %v3427_v46 = vsel %vm3423_vm6, %v3407_v33, %v3410_v49  ;;  %v3429_v58 = vsel %vm3425_vm11, %v3413_v32, %v3428_v34  ;;  %v3437_v41 = vsel %vm3425_vm11, %v3419_v53, %v3436_v25  ;;  %v3655_v44 = vand.u32 3, %v3654_v20 }
 0x1b0   : > { %v3438_v26 = vsel %vm3424_vm12, %v3435_v21, %v3437_v41  ;;  %v7824_v17 = vmul.u32.u64.low %v3439_v56, %v3434_v54  ;;  %v7825_v39 = vmul.u32.u64.high %v3439_v56, %v3434_v54, %v7824_v17  ;;  %v3300_v2 = vsel %vm3299_vm15, %v3298_v31, 0 }
 0x1b1   : > { %v7830_v38 = vadd.s32 %v7464_v59, %v7457_v37  ;;  %v7832_v4 = vmul.u32.u64.low %v3439_v56, %v3438_v26  ;;  %v7833_v62 = vmul.u32.u64.high %v3439_v56, %v3438_v26, %v7832_v4  ;;  %v9954_v57 = vand.u32 2147483647, %v7738_v60 }
 0x1b2   : > { %v10068_v49 = vshll.u32 %v7517_v23, %v7728_v52  ;;  %v3248_v53 = vshll.u32 %v7818_v16, 30  ;;  %v3430_v30 = vsel %vm3424_vm12, %v3427_v46, %v3429_v58  ;;  %v3302_v31 = vand.u32 31, %v3300_v2 }
 0x1b3   : > { %v2851_v32 = vshll.u32 %v7777_v11, 23  ;;  %v2952_v37 = vsub.s32 4294967266, %v7815_v15  ;;  %vm2249_vm2 = vcmp.lt.s32.totalorder %v2248_v48, 2  ;;  %vm2250_vm9 = vcmp.eq.s32.totalorder %v2248_v48, 0 }
 0x1b4   : > { %v7840_v20 = vor.u32 %v7775_v8, %v10068_v49  ;;  %v3449_v59 = vadd.s32 1, %v7825_v39  ;;  %v7847_v50 = vsub.s32 32, %v3302_v31  ;;  %vm3656_vm6 = vcmp.lt.s32.totalorder %v3655_v44, 2 }
 0x1b5   : > { %vm3657_vm0 = vcmp.eq.s32.totalorder %v3655_v44, 0  ;;  %v3446_v23 = vmul.u32 %v3439_v56, %v3430_v30  ;;  %vm3448_vm11 = vc.u32 %v7833_v62, %v7824_v17  ;;  %v3295_v52 = vand.u32 8388607, %v9954_v57 }
 0x1b6   : > { %vm3660_vm12 = vcmp.eq.s32.totalorder %v3655_v44, 2  ;;  %v7854_v8 = vsub.s32 %v7779_v14, %v3248_v53  ;;  %v3450_v55 = vsel %vm3448_vm11, %v3449_v59, %v7825_v39  ;;  %v10069_v34 = vxor.u32 2147483648, %v7659_v29 }
 0x1b7   : > { %vm2253_vm15 = vcmp.eq.s32.totalorder %v2248_v48, 2  ;;  %v3451_v33 = vadd.s32 %v3450_v55, %v3446_v23  ;;  %v7860_v5 = vshrl.u32 %v3300_v2, 5  ;;  %v10070_v54 = vxor.u32 2147483648, %v7781_v63 }
 0x1b8   : > { %v2252_v45 = vsel %vm2250_vm9, %v7668_v19, %v10069_v34  ;;  %v10071_v25 = vxor.u32 2147483648, %v7668_v19  ;;  %v3306_v14 = vshrl.u32 %v10027_v10, %v7847_v50  ;;  %v3314_v46 = vshll.u32 %v10029_v27, %v3302_v31 }
 0x1b9   : > { %v3659_v21 = vsel %vm3657_vm0, %v7771_v36, %v10070_v54  ;;  %v3315_v58 = vshrl.u32 %v10026_v6, %v7847_v50  ;;  %v10072_v41 = vxor.u32 2147483648, %v7771_v36  ;;  %v3452_v39 = vadd.s32 536870912, %v3451_v33 }
 0x1ba   : > { %v2255_v56 = vsel %vm2253_vm15, %v10071_v25, %v7659_v29  ;;  %v3309_v2 = vshrl.u32 %v10028_v3, %v7847_v50  ;;  %v3312_v19 = vshrl.u32 %v10029_v27, %v7847_v50  ;;  %v3318_v29 = vshrl.u32 %v10030_v24, %v7847_v50 }
 0x1bb   : > { %v3662_v26 = vsel %vm3660_vm12, %v10072_v41, %v7781_v63  ;;  %v3305_v4 = vshll.u32 %v10022_v43, %v3302_v31  ;;  %v3316_v49 = vor.u32 %v3315_v58, %v3314_v46  ;;  %v3317_v53 = vshll.u32 %v10026_v6, %v3302_v31 }
 0x1bc   : > { %v2256_v30 = vsel %vm2249_vm2, %v2252_v45, %v2255_v56  ;;  %v3251_v36 = vsub.s32 0, %v7854_v8  ;;  %v3308_v63 = vshll.u32 %v10027_v10, %v3302_v31  ;;  %v3311_v59 = vshll.u32 %v10028_v3, %v3302_v31 }
 0x1bd   : > { %v3663_v23 = vsel %vm3656_vm6, %v3659_v21, %v3662_v26  ;;  %v7890_v55 = vsub.s32 32, %v7812_v22  ;;  %v7894_v34 = vshll.u32 %v10029_v27, %v7812_v22  ;;  %v7896_v54 = vor.u32 %v3306_v14, %v3305_v4 }
 0x1be   : > { %v3319_v25 = vor.u32 %v3318_v29, %v3317_v53  ;;  %v7898_v48 = vshrl.u32 %v3452_v39, 30  ;;  %v7900_v45 = vor.u32 %v3309_v2, %v3308_v63  ;;  %v3313_v56 = vor.u32 %v3312_v19, %v3311_v59 }
 0x1bf   : > { %10073 = vst [vmem:[#allocation57_spill] sm:$0xff] %v7890_v55  ;;  %vm3323_vm2 = vcmp.lt.s32.totalorder %v7860_v5, 4  ;;  %v3664_v31 = vsel %vm2041_vm3, nan, %v3663_v23  ;;  %v2257_v21 = vsel %vm2247_vm1, nan, %v2256_v30  ;;  %v2258_v14 = vand.u32 2147483647, %v7056_v0 }
 0x1c0   : > { %10074 = vst [vmem:[#allocation58_spill] sm:$0xff] %v7898_v48  ;;  %v3329_v44 = vsel %vm3323_vm2, %v3316_v49, 920167782  ;;  %v7910_v46 = vadd.s32 127, %v2952_v37  ;;  %v7914_v58 = vshll.u32 %v10026_v6, %v7812_v22  ;;  %v5573_v41 = vmin.u32 %v3251_v36, %v7854_v8  ;;  %v10140_v22 = vld [vmem:[#allocation52_spill] sm:$0xff] }
 0x1c1   : > { %v3296_v26 = vor.u32 8388608, %v3295_v52  ;;  %vm3320_vm9 = vcmp.lt.s32.totalorder %v7860_v5, 1  ;;  %vm3322_vm6 = vcmp.lt.s32.totalorder %v7860_v5, 3  ;;  %v3333_v35 = vsel %vm3323_vm2, %v3319_v25, 1326507024 }
 0x1c2   : > { %v5121_v28 = vmul.f32 %v7561_v18, %v3664_v31  ;;  %v3454_v39 = vshll.u32 %v7898_v48, 30  ;;  %v3328_v37 = vsel %vm3320_vm9, %v7896_v54, %v7900_v45  ;;  %v3330_v2 = vsel %vm3322_vm6, %v3313_v56, %v3329_v44 }
 0x1c3   : > { %v3502_v52 = vmul.f32 %v7561_v18, %v2257_v21  ;;  %v2265_v29 = vand.u32 8388607, %v2258_v14  ;;  %v2275_v4 = vshll.u32 %v10022_v43, %v7277_v12  ;;  %v2276_v53 = vshrl.u32 %v10027_v10, %v7306_v1 }
 0x1c4   : > { %v5136_v19 = vsel %vm9981_vm14, %v5121_v28, 0.0  ;;  %vm3321_vm1 = vcmp.lt.s32.totalorder %v7860_v5, 2  ;;  %v3332_v30 = vsel %vm3320_vm9, %v7900_v45, %v3313_v56  ;;  %v3334_v18 = vsel %vm3322_vm6, %v3316_v49, %v3333_v35 }
 0x1c5   : > { %v7943_v36 = vshll.u32 %v3296_v26, 8  ;;  %5137 = vadd.xlane.f32.xlu1 %v5136_v19  ;;  %v3331_v63 = vsel %vm3321_vm1, %v3328_v37, %v3330_v2  ;;  %v2277_v59 = vor.u32 %v2276_v53, %v2275_v4  ;;  %v2278_v23 = vshll.u32 %v10027_v10, %v7277_v12  ;;  %v10075_v4 = vld [vmem:[#allocation37_spill] sm:$0xff] }
 0x1c6   : > { %v2279_v25 = vshrl.u32 %v10028_v3, %v7306_v1  ;;  %v3253_v44 = vclz %v5573_v41  ;;  %v7951_v31 = vsub.s32 %v3451_v33, %v3454_v39  ;;  %v2281_v21 = vshll.u32 %v10028_v3, %v7277_v12 }
 0x1c7   : > { %v2282_v49 = vshrl.u32 %v10029_v27, %v7306_v1  ;;  %v3335_v26 = vsel %vm3321_vm1, %v3332_v30, %v3334_v18  ;;  %v3522_v35 = vsel %vm9981_vm14, %v3502_v52, 0.0  ;;  %v2266_v28 = vor.u32 8388608, %v2265_v29 }
 0x1c8   : > { %v2280_v37 = vor.u32 %v2279_v25, %v2278_v23  ;;  %v7961_v2 = vmul.u32.u64.low %v7943_v36, %v3331_v63  ;;  %v7962_v19 = vmul.u32.u64.high %v7943_v36, %v3331_v63, %v7961_v2  ;;  %vm2290_vm3 = vcmp.lt.s32.totalorder %v7320_v61, 1 }
 0x1c9   : > { %3523 = vadd.xlane.f32.xlu1 %v3522_v35  ;;  %v2283_v33 = vor.u32 %v2282_v49, %v2281_v21  ;;  %v2274_v12 = vshrl.u32 %v10022_v43, %v7306_v1  ;;  %vm2291_vm0 = vcmp.lt.s32.totalorder %v7320_v61, 2  ;;  %vm2292_vm11 = vcmp.lt.s32.totalorder %v7320_v61, 3 }
 0x1ca   : > { %v2298_v41 = vsel %vm2290_vm3, %v2277_v59, %v2280_v37  ;;  %v2304_v53 = vsel %vm2292_vm11, %v10075_v4, %v7488_v42  ;;  %v7976_v30 = vmul.u32.u64.low %v7943_v36, %v3335_v26  ;;  %v7977_v18 = vmul.u32.u64.high %v7943_v36, %v3335_v26, %v7976_v30 }
 0x1cb   : > { %v2295_v39 = vsel %vm2293_vm13, %v2283_v33, 2102212464  ;;  %v2300_v52 = vsel %vm2292_vm11, %v2283_v33, %v7471_v40  ;;  %v2302_v29 = vsel %vm2290_vm3, %v2280_v37, %v2283_v33  ;;  %v2306_v63 = vshll.u32 %v2266_v28, 8 }
 0x1cc   : > { %v2301_v1 = vsel %vm2291_vm0, %v2298_v41, %v2300_v52  ;;  %v2852_v23 = vor.u32 4788187, %v2851_v32  ;;  %v2948_v25 = vsub.s32 32, %v7815_v15  ;;  %v2294_v21 = vsel %vm2290_vm3, %v2274_v12, %v2277_v59 }
 0x1cd   : > { %v2296_v49 = vsel %vm2292_vm11, %v2280_v37, %v2295_v39  ;;  %v2954_v40 = vshll.u32 %v7910_v46, 23  ;;  %v2305_v42 = vsel %vm2291_vm0, %v2302_v29, %v2304_v53  ;;  %v5574_v26 = vadd.s32 4294967294, %v3253_v44 }
 0x1ce   : > { %v7987_v35 = vmul.u32.u64.low %v2306_v63, %v2301_v1  ;;  %v7988_v33 = vmul.u32.u64.high %v2306_v63, %v2301_v1, %v7987_v35  ;;  %v3325_v28 = vsel %vm3323_vm2, %v3313_v56, 2102212464  ;;  %v2855_v32 = vcvt.s32.f32 %v7840_v20  ;;  %v10076_v1 = vld [vmem:[#allocation20_spill] sm:$0xff] }
 0x1cf   : > { %v7993_v41 = vmul.u32.u64.low %v2306_v63, %v2305_v42  ;;  %v7994_v11 = vmul.u32.u64.high %v2306_v63, %v2305_v42, %v7993_v41  ;;  %v3457_v59 = vsub.s32 0, %v7951_v31  ;;  %v3304_v46 = vshrl.u32 %v10022_v43, %v7847_v50 }
 0x1d0   : > { %v2297_v37 = vsel %vm2291_vm0, %v2294_v21, %v2296_v49  ;;  %v2853_v12 = vand.u32 2147483647, %v2852_v23  ;;  %v2949_v44 = vshll.u32 %v7639_v7, %v7815_v15  ;;  %v2950_v39 = vshrl.u32 %v7830_v38, %v2948_v25  ;;  %v10077_v23 = vld [vmem:[#allocation39_spill] sm:$0xff]  ;;  %v10078_v21 = vld [vmem:[#allocation24_spill] sm:$0xff] }
 0x1d1   : > { %v3109_v56 = vshrl.u32 %v10026_v6, %v7890_v55  ;;  %v2955_v52 = vor.u32 4788187, %v2954_v40  ;;  %v3324_v20 = vsel %vm3320_vm9, %v3304_v46, %v7896_v54  ;;  %v3326_v50 = vsel %vm3322_vm6, %v7900_v45, %v3325_v28  ;;  %v10079_v28 = vld [vmem:[#allocation38_spill] sm:$0xff] }
 0x1d2   : > { %v2316_v61 = vadd.s32 1, %v7988_v33  ;;  %vm5575_vm13 = vcmp.lt.s32.totalorder %v5574_v26, 0  ;;  %v3346_v29 = vadd.s32 1, %v7962_v19  ;;  %v2313_v7 = vmul.u32 %v2306_v63, %v2297_v37 }
 0x1d3   : > { %vm2315_vm12 = vc.u32 %v7994_v11, %v7987_v35  ;;  %v8019_v6 = vshrl.u32 %v10030_v24, %v7890_v55  ;;  %v5581_v15 = vmin.u32 %v3457_v59, %v7951_v31  ;;  %vm3345_vm15 = vc.u32 %v7977_v18, %v7961_v2 }
 0x1d4   : > { %v2317_v38 = vsel %vm2315_vm12, %v2316_v61, %v7988_v33  ;;  %v2856_v54 = vmul.f32 %v2855_v32, %v2853_v12  ;;  %v2951_v45 = vor.u32 %v2950_v39, %v2949_v44  ;;  %v3327_v4 = vsel %vm3321_vm1, %v3324_v20, %v3326_v50 }
 0x1d5   : > { %v2318_v53 = vadd.s32 %v2317_v38, %v2313_v7  ;;  %v8027_v30 = vsel %vm5575_vm13, 0, %v5574_v26  ;;  %v2361_v63 = vand.u32 2147483647, %v10076_v1  ;;  %v2382_v24 = vshrl.u32 %v10028_v3, %v10077_v23 }
 0x1d6   : > { %v2385_v25 = vshrl.u32 %v10029_v27, %v10077_v23  ;;  %vm2775_vm2 = vcmp.lt.s32.totalorder %v10078_v21, 0  ;;  %v2956_v49 = vand.u32 2147483647, %v2955_v52  ;;  %v3347_v40 = vsel %vm3345_vm15, %v3346_v29, %v7962_v19 }
 0x1d7   : > { %v2319_v42 = vadd.s32 536870912, %v2318_v53  ;;  %v2379_v5 = vshrl.u32 %v10027_v10, %v10077_v23  ;;  %v3459_v33 = vclz %v5581_v15  ;;  %v3343_v26 = vmul.u32 %v7943_v36, %v3327_v4 }
 0x1d8   : > { %v2381_v41 = vshll.u32 %v10027_v10, %v10079_v28  ;;  %v2384_v32 = vshll.u32 %v10028_v3, %v10079_v28  ;;  %v2958_v59 = vcvt.s32.f32 %v2951_v45  ;;  %v3261_v46 = vsub.s32 4294967266, %v8027_v30 }
 0x1d9   : > { %v8044_v37 = vshrl.u32 %v2319_v42, 30  ;;  %v2378_v19 = vshll.u32 %v10022_v43, %v10079_v28  ;;  %v8048_v12 = vadd.s32 %v3347_v40, %v3343_v26  ;;  %v2368_v44 = vand.u32 8388607, %v2361_v63  ;;  %v10081_v40 = vld [vmem:[#allocation41_spill] sm:$0xff] }
 0x1da   : > { %v2383_v36 = vor.u32 %v2382_v24, %v2381_v41  ;;  %v2386_v39 = vor.u32 %v2385_v25, %v2384_v32  ;;  %v8053_v52 = vor.u32 %v3109_v56, %v7894_v34  ;;  %v2857_v29 = vxor.u32 2147483648, %v2856_v54 }
 0x1db   : > { %v2321_v50 = vshll.u32 %v8044_v37, 30  ;;  %v2380_v61 = vor.u32 %v2379_v5, %v2378_v19  ;;  %v8058_v7 = vmul.f32 %v2958_v59, %v2956_v49  ;;  %v3241_v15 = vadd.s32 %v7684_v47, %v7690_v13 }
 0x1dc   : > { %v5582_v38 = vadd.s32 4294967294, %v3459_v33  ;;  %v3257_v45 = vsub.s32 32, %v8027_v30  ;;  %v3262_v4 = vadd.s32 127, %v3261_v46  ;;  %vm2393_vm9 = vcmp.lt.s32.totalorder %v7357_v9, 1 }
 0x1dd   : > { %v8063_v24 = vsub.s32 %v2318_v53, %v2321_v50  ;;  %v3349_v34 = vadd.s32 536870912, %v8048_v12  ;;  %v2369_v56 = vor.u32 8388608, %v2368_v44  ;;  %vm2395_vm6 = vcmp.lt.s32.totalorder %v7357_v9, 3  ;;  %v10080_v53 = vld [vmem:[#allocation43_spill] sm:$0xff] }
 0x1de   : > { %v2405_v25 = vsel %vm2393_vm9, %v2383_v36, %v2386_v39  ;;  %v2401_v47 = vsel %vm2393_vm9, %v2380_v61, %v2383_v36  ;;  %v2403_v13 = vsel %vm2395_vm6, %v2386_v39, %v7511_v51  ;;  %v2407_v42 = vsel %vm2395_vm6, %v10081_v40, %v10080_v53 }
 0x1df   : > { %v2324_v49 = vsub.s32 0, %v8063_v24  ;;  %v8082_v5 = vsel %vm2775_vm2, %v2857_v29, %v2856_v54  ;;  %v2960_v33 = vxor.u32 2147483648, %v8058_v7  ;;  %vm5583_vm1 = vcmp.lt.s32.totalorder %v5582_v38, 0 }
 0x1e0   : > { %vm2394_vm3 = vcmp.lt.s32.totalorder %v7357_v9, 2  ;;  %v3259_v26 = vshrl.u32 %v3241_v15, %v3257_v45  ;;  %v2398_v51 = vsel %vm2396_vm4, %v2386_v39, 2102212464  ;;  %v3263_v32 = vshll.u32 %v3262_v4, 23 }
 0x1e1   : > { %v5537_v28 = vmin.u32 %v2324_v49, %v8063_v24  ;;  %v2408_v41 = vsel %vm2394_vm3, %v2405_v25, %v2407_v42  ;;  %v2377_v59 = vshrl.u32 %v10022_v43, %v10077_v23  ;;  %v2404_v54 = vsel %vm2394_vm3, %v2401_v47, %v2403_v13  ;;  %v10084_v13 = vld [vmem:[#allocation21_spill] sm:$0xff] }
 0x1e2   : > { %v2409_v46 = vshll.u32 %v2369_v56, 8  ;;  %v3258_v19 = vshll.u32 %v7854_v8, %v8027_v30  ;;  %v8097_v44 = vsel %vm5583_vm1, 0, %v5582_v38  ;;  %v8099_v50 = vshrl.u32 %v3349_v34, 30  ;;  %v10083_v8 = vld [vmem:[#allocation16_spill] sm:$0xff] }
 0x1e3   : > { %v2326_v29 = vclz %v5537_v28  ;;  %v2397_v39 = vsel %vm2393_vm9, %v2377_v59, %v2380_v61  ;;  %v2399_v15 = vsel %vm2395_vm6, %v2383_v36, %v2398_v51  ;;  %v9958_v30 = vand.u32 2147483647, %v10083_v8 }
 0x1e4   : > { %10082 = vst [vmem:[#allocation37_spill] sm:$0xff] %v8099_v50  ;;  %v8105_v45 = vmul.u32.u64.low %v2409_v46, %v2408_v41  ;;  %v8106_v23 = vmul.u32.u64.high %v2409_v46, %v2408_v41, %v8105_v45  ;;  %v8108_v25 = vmul.u32.u64.low %v2409_v46, %v2404_v54  ;;  %v8109_v56 = vmul.u32.u64.high %v2409_v46, %v2404_v54, %v8108_v25 }
 0x1e5   : > { %v5538_v4 = vadd.s32 4294967294, %v2326_v29  ;;  %v8113_v38 = vor.u32 %v3259_v26, %v3258_v19  ;;  %v8115_v34 = vor.u32 4788187, %v3263_v32  ;;  %v3447_v61 = vadd.s32 %v7824_v17, %v7833_v62  ;;  %v10085_v26 = vld [vmem:[#allocation18_spill] sm:$0xff] }
 0x1e6   : > { %v3467_v49 = vsub.s32 4294967266, %v8097_v44  ;;  %v3351_v36 = vshll.u32 %v8099_v50, 30  ;;  %v2400_v47 = vsel %vm2394_vm3, %v2397_v39, %v2399_v15  ;;  %v2482_v53 = vshrl.u32 %v10027_v10, %v10084_v13 }
 0x1e7   : > { %vm5539_vm4 = vcmp.lt.s32.totalorder %v5538_v4, 0  ;;  %v2314_v40 = vadd.s32 %v7987_v35, %v7994_v11  ;;  %vm2418_vm0 = vc.u32 %v8106_v23, %v8108_v25  ;;  %v2481_v17 = vshll.u32 %v10022_v43, %v10085_v26 }
 0x1e8   : > { %v2329_v42 = vsel %vm5539_vm4, 0, %v5538_v4  ;;  %v2419_v51 = vadd.s32 1, %v8109_v56  ;;  %v2471_v9 = vand.u32 8388607, %v9958_v30  ;;  %vm2260_vm11 = vcmp.lt.s32.totalorder %v7056_v0, 0 }
 0x1e9   : > { %v2330_v62 = vsub.s32 32, %v2329_v42  ;;  %v2334_v28 = vsub.s32 4294967266, %v2329_v42  ;;  %v2331_v41 = vshll.u32 %v8063_v24, %v2329_v42  ;;  %v2416_v32 = vmul.u32 %v2409_v46, %v2400_v47  ;;  %v10089_v42 = vld [vmem:[#allocation31_spill] sm:$0xff] }
 0x1ea   : > { %v2483_v35 = vor.u32 %v2482_v53, %v2481_v17  ;;  %v2484_v11 = vshll.u32 %v10027_v10, %v10085_v26  ;;  %v2420_v19 = vsel %vm2418_vm0, %v2419_v51, %v8109_v56  ;;  %v2485_v29 = vshrl.u32 %v10028_v3, %v10084_v13  ;;  %v10091_v51 = vld [vmem:[#allocation25_spill] sm:$0xff] }
 0x1eb   : > { %v2332_v59 = vshrl.u32 %v2314_v40, %v2330_v62  ;;  %v2335_v54 = vadd.s32 127, %v2334_v28  ;;  %v8142_v39 = vsub.s32 %v8048_v12, %v3351_v36  ;;  %v2421_v15 = vadd.s32 %v2420_v19, %v2416_v32  ;;  %v10088_v36 = vld [vmem:[#allocation22_spill] sm:$0xff] }
 0x1ec   : > { %v2487_v45 = vshll.u32 %v10028_v3, %v10085_v26  ;;  %v2488_v24 = vshrl.u32 %v10029_v27, %v10084_v13  ;;  %v2472_v47 = vor.u32 8388608, %v2471_v9  ;;  %v2486_v53 = vor.u32 %v2485_v29, %v2484_v11  ;;  %v10090_v28 = vld [vmem:[#allocation30_spill] sm:$0xff] }
 0x1ed   : > { %v2333_v46 = vor.u32 %v2332_v59, %v2331_v41  ;;  %v2336_v4 = vshll.u32 %v2335_v54, 23  ;;  %vm8150_vm13 = vcmp.le.f32.partialorder %v2258_v14, 0.7853982  ;;  %v2422_v40 = vadd.s32 536870912, %v2421_v15  ;;  %v10092_v41 = vld [vmem:[#allocation28_spill] sm:$0xff] }
 0x1ee   : > { %v2489_v12 = vor.u32 %v2488_v24, %v2487_v45  ;;  %vm2496_vm12 = vcmp.lt.s32.totalorder %v10088_v36, 1  ;;  %vm2498_vm15 = vcmp.lt.s32.totalorder %v10088_v36, 3  ;;  %vm9956_vm9 = vcmp.lt.s32.totalorder %v10089_v42, 0 }
 0x1ef   : > { %v2337_v26 = vor.u32 4788187, %v2336_v4  ;;  %v2344_v17 = vsub.s32 4, %v8044_v37  ;;  %v2504_v62 = vsel %vm2496_vm12, %v2483_v35, %v2486_v53  ;;  %v2510_v14 = vsel %vm2498_vm15, %v10091_v51, %v10090_v28 }
 0x1f0   : > { %v8164_v9 = vshrl.u32 %v2422_v40, 30  ;;  %vm2497_vm6 = vcmp.lt.s32.totalorder %v10088_v36, 2  ;;  %v2506_v32 = vsel %vm2498_vm15, %v2489_v12, %v10092_v41  ;;  %v2508_v11 = vsel %vm2496_vm12, %v2486_v53, %v2489_v12 }
 0x1f1   : > { %v3463_v59 = vsub.s32 32, %v8097_v44  ;;  %v2338_v54 = vand.u32 2147483647, %v2337_v26  ;;  %v2340_v19 = vcvt.s32.f32 %v2333_v46  ;;  %v2511_v29 = vsel %vm2497_vm6, %v2508_v11, %v2510_v14 }
 0x1f2   : > { %v3354_v45 = vsub.s32 0, %v8142_v39  ;;  %v2424_v24 = vshll.u32 %v8164_v9, 30  ;;  %v2507_v4 = vsel %vm2497_vm6, %v2504_v62, %v2506_v32  ;;  %v2512_v40 = vshll.u32 %v2472_v47, 8 }
 0x1f3   : > { %v3468_v28 = vadd.s32 127, %v3467_v49  ;;  %v2341_v51 = vmul.f32 %v2340_v19, %v2338_v54  ;;  %v2345_v41 = vsel %vm2260_vm11, %v2344_v17, %v8044_v37  ;;  %v2501_v46 = vsel %vm2499_vm7, %v2489_v12, 2102212464 }
 0x1f4   : > { %v8184_v26 = vsub.s32 %v2421_v15, %v2424_v24  ;;  %v2480_v14 = vshrl.u32 %v10022_v43, %v10084_v13  ;;  %v8188_v11 = vmul.u32.u64.low %v2512_v40, %v2511_v29  ;;  %v8189_v57 = vmul.u32.u64.high %v2512_v40, %v2511_v29, %v8188_v11 }
 0x1f5   : > { %v3465_v20 = vshrl.u32 %v3447_v61, %v3463_v59  ;;  %v2342_v62 = vxor.u32 2147483648, %v2341_v51  ;;  %v8191_v47 = vmul.u32.u64.low %v2512_v40, %v2507_v4  ;;  %v8192_v49 = vmul.u32.u64.high %v2512_v40, %v2507_v4, %v8191_v47  ;;  %v10095_v11 = vld [vmem:[#allocation27_spill] sm:$0xff] }
 0x1f6   : > { %v5577_v32 = vmin.u32 %v3354_v45, %v8142_v39  ;;  %v2427_v37 = vsub.s32 0, %v8184_v26  ;;  %v2500_v15 = vsel %vm2496_vm12, %v2480_v14, %v2483_v35  ;;  %v2502_v12 = vsel %vm2498_vm15, %v2486_v53, %v2501_v46 }
 0x1f7   : > { %v3464_v13 = vshll.u32 %v7951_v31, %v8097_v44  ;;  %v3469_v17 = vshll.u32 %v3468_v28, 23  ;;  %v2343_v61 = vsel %vm2260_vm11, %v2342_v62, %v2341_v51  ;;  %v2347_v59 = vsel %vm8150_vm13, 0, %v2345_v41  ;;  %v10093_v51 = vld [vmem:[#allocation17_spill] sm:$0xff]  ;;  %v10094_v41 = vld [vmem:[#allocation23_spill] sm:$0xff] }
 0x1f8   : > { %v8212_v54 = vsel %vm9956_vm9, %v2960_v33, %v8058_v7  ;;  %v2346_v31 = vsel %vm8150_vm13, %v7056_v0, %v2343_v61  ;;  %v5541_v44 = vmin.u32 %v2427_v37, %v8184_v26  ;;  %v2503_v29 = vsel %vm2497_vm6, %v2500_v15, %v2502_v12 }
 0x1f9   : > { %v8220_v19 = vor.u32 %v3465_v20, %v3464_v13  ;;  %5959 = vcosq.f32 %v2346_v31  ;;  %v3356_v45 = vclz %v5577_v32  ;;  %v3966_v7 = vadd.s32 3, %v2347_v59 }
 0x1fa   : > { %5961 = vsinq.f32 %v2346_v31  ;;  %v2429_v33 = vclz %v5541_v44  ;;  %v8224_v24 = vor.u32 4788187, %v3469_v17  ;;  %v8226_v4 = vand.u32 3, %v2347_v59 }
 0x1fb   : > { %vm2521_vm7 = vc.u32 %v8189_v57, %v8191_v47  ;;  %v2522_v56 = vadd.s32 1, %v8192_v49  ;;  %vm2363_vm1 = vcmp.lt.s32.totalorder %v10076_v1, 0  ;;  %v2519_v28 = vmul.u32 %v2512_v40, %v2503_v29 }
 0x1fc   : > { %v5542_v20 = vadd.s32 4294967294, %v2429_v33  ;;  %v9957_v36 = vand.u32 2147483647, %v10093_v51  ;;  %v2587_v46 = vshll.u32 %v10027_v10, %v10094_v41  ;;  %v2588_v62 = vshrl.u32 %v10028_v3, %v10095_v11 }
 0x1fd   : > { %v2523_v14 = vsel %vm2521_vm7, %v2522_v56, %v8192_v49  ;;  %v2590_v32 = vshll.u32 %v10028_v3, %v10094_v41  ;;  %v2591_v37 = vshrl.u32 %v10029_v27, %v10095_v11  ;;  %v8242_v15 = vadd.s32 4294967294, %v3356_v45  ;;  %v10096_v56 = vld [vmem:[#allocation26_spill] sm:$0xff] }
 0x1fe   : > { %v3967_v12 = vand.u32 3, %v3966_v7  ;;  %vm5543_vm3 = vcmp.lt.s32.totalorder %v5542_v20, 0  ;;  %v2524_v40 = vadd.s32 %v2523_v14, %v2519_v28  ;;  %v2585_v17 = vshrl.u32 %v10027_v10, %v10095_v11 }
 0x1ff   : > { %v2432_v13 = vsel %vm5543_vm3, 0, %v5542_v20  ;;  %v8246_v61 = vor.u32 %v2588_v62, %v2587_v46  ;;  %v2592_v49 = vor.u32 %v2591_v37, %v2590_v32  ;;  %vm2356_vm4 = vcmp.eq.s32.totalorder %v8226_v4, 2  ;;  %v10097_v37 = vld [vmem:[#allocation36_spill] sm:$0xff] }
 0x200   : > { %v2417_v59 = vadd.s32 %v8108_v25, %v8106_v23  ;;  %v2433_v31 = vsub.s32 32, %v2432_v13  ;;  %v2437_v44 = vsub.s32 4294967266, %v2432_v13  ;;  %v2525_v29 = vadd.s32 536870912, %v2524_v40 }
 0x201   : > { %vm2353_vm0 = vcmp.eq.s32.totalorder %v8226_v4, 0  ;;  %v2447_v45 = vsub.s32 4, %v8164_v9  ;;  %v2574_v7 = vand.u32 8388607, %v9957_v36  ;;  %v2584_v33 = vshll.u32 %v10022_v43, %v10094_v41 }
 0x202   : > { %vm2599_vm11 = vcmp.lt.s32.totalorder %v10096_v56, 1  ;;  %vm2352_vm13 = vcmp.lt.s32.totalorder %v8226_v4, 2  ;;  %v2434_v20 = vshll.u32 %v8184_v26, %v2432_v13  ;;  %v2435_v23 = vshrl.u32 %v2417_v59, %v2433_v31  ;;  %v10098_v26 = vld [vmem:[#allocation34_spill] sm:$0xff] }
 0x203   : > { %v2438_v25 = vadd.s32 127, %v2437_v44  ;;  %v8260_v28 = vshrl.u32 %v2525_v29, 30  ;;  %vm2350_vm12 = vweird.f32 %v7056_v0  ;;  %vm3968_vm15 = vcmp.lt.s32.totalorder %v3967_v12, 2  ;;  %v10105_v44 = vld [vmem:[#allocation19_spill] sm:$0xff] }
 0x204   : > { %v2586_v46 = vor.u32 %v2585_v17, %v2584_v33  ;;  %vm2601_vm6 = vcmp.lt.s32.totalorder %v10096_v56, 3  ;;  %v2611_v41 = vsel %vm2599_vm11, %v8246_v61, %v2592_v49  ;;  %v2436_v14 = vor.u32 %v2435_v23, %v2434_v20 }
 0x205   : > { %v2439_v62 = vshll.u32 %v2438_v25, 23  ;;  %v2527_v32 = vshll.u32 %v8260_v28, 30  ;;  %v2613_v13 = vsel %vm2601_vm6, %v10098_v26, %v10097_v37  ;;  %vm3969_vm7 = vcmp.eq.s32.totalorder %v3967_v12, 0  ;;  %v10101_v26 = vld [vmem:[#allocation35_spill] sm:$0xff] }
 0x206   : > { %vm3972_vm3 = vcmp.eq.s32.totalorder %v3967_v12, 2  ;;  %v2448_v17 = vsel %vm2363_vm1, %v2447_v45, %v8164_v9  ;;  %v2575_v59 = vor.u32 8388608, %v2574_v7  ;;  %v5960_v31 = vpop.eup %5959  ;;  %vm8277_vm10 = vcmp.le.f32.partialorder %v2361_v63, 0.7853982 }
 0x207   : > { %v2440_v29 = vor.u32 4788187, %v2439_v62  ;;  %v8281_v33 = vsub.s32 %v2524_v40, %v2527_v32  ;;  %v2583_v20 = vshrl.u32 %v10022_v43, %v10095_v11  ;;  %vm2600_vm9 = vcmp.lt.s32.totalorder %v10096_v56, 2  ;;  %v5962_v23 = vpop.eup %5961  ;;  %v10110_v56 = vld [vmem:[#allocation53_spill] sm:$0xff] }
 0x208   : > { %v2357_v25 = vxor.u32 2147483648, %v5960_v31  ;;  %v2604_v9 = vsel %vm2602_vm8, %v2592_v49, 2102212464  ;;  %v2607_v63 = vsel %vm2599_vm11, %v2586_v46, %v8246_v61  ;;  %v2614_v45 = vsel %vm2600_vm9, %v2611_v41, %v2613_v13 }
 0x209   : > { %v2354_v7 = vxor.u32 2147483648, %v5962_v23  ;;  %v2441_v40 = vand.u32 2147483647, %v2440_v29  ;;  %v2443_v62 = vcvt.s32.f32 %v2436_v14  ;;  %v2530_v32 = vsub.s32 0, %v8281_v33 }
 0x20a   : > { %v3974_v11 = vsel %vm3972_vm3, %v2357_v25, %v5962_v23  ;;  %v2358_v37 = vsel %vm2356_vm4, %v2357_v25, %v5962_v23  ;;  %vm2466_vm8 = vcmp.lt.s32.totalorder %v10083_v8, 0  ;;  %v2609_v36 = vsel %vm2601_vm6, %v2592_v49, %v10101_v26 }
 0x20b   : > { %v2615_v35 = vshll.u32 %v2575_v59, 8  ;;  %v3971_v41 = vsel %vm3969_vm7, %v5960_v31, %v2354_v7  ;;  %v2355_v14 = vsel %vm2353_vm0, %v5960_v31, %v2354_v7  ;;  %v2444_v13 = vmul.f32 %v2443_v62, %v2441_v40  ;;  %v8322_v40 = vld [vmem:[%s7557_s27] ss:$0 sm:$0xff] }
 0x20c   : > { %v5545_v29 = vmin.u32 %v2530_v32, %v8281_v33  ;;  %v3975_v53 = vsel %vm3968_vm15, %v3971_v41, %v3974_v11  ;;  %v2359_v23 = vsel %vm2352_vm13, %v2355_v14, %v2358_v37  ;;  %v10102_v31 = vand.u32 2147483647, %v10083_v8 }
 0x20d   : > { %v8308_v25 = vmul.u32.u64.low %v2615_v35, %v2614_v45  ;;  %v8309_v30 = vmul.u32.u64.high %v2615_v35, %v2614_v45, %v8308_v25  ;;  %v3976_v49 = vsel %vm2350_vm12, nan, %v3975_v53  ;;  %v2360_v59 = vsel %vm2350_vm12, nan, %v2359_v23 }
 0x20e   : > { %v2445_v26 = vxor.u32 2147483648, %v2444_v13  ;;  %vm8317_vm4 = vcmp.le.f32.partialorder %v10102_v31, 0.7853982  ;;  %v2532_v12 = vclz %v5545_v29  ;;  %v5124_v4 = vmul.f32 %v8322_v40, %v3976_v49 }
 0x20f   : > { %v3503_v45 = vmul.f32 %v8322_v40, %v2360_v59  ;;  %v2603_v53 = vsel %vm2599_vm11, %v2583_v20, %v2586_v46  ;;  %v2610_v0 = vsel %vm2600_vm9, %v2607_v63, %v2609_v36  ;;  %vm5579_vm0 = vcmp.lt.s32.totalorder %v8242_v15, 0 }
 0x210   : > { %v2446_v62 = vsel %vm2363_vm1, %v2445_v26, %v2444_v13  ;;  %v5546_v32 = vadd.s32 4294967294, %v2532_v12  ;;  %v2550_v11 = vsub.s32 4, %v8260_v28  ;;  %v2605_v37 = vsel %vm2601_vm6, %v8246_v61, %v2604_v9 }
 0x211   : > { %v5145_v41 = vsel %vm9981_vm14, %v5124_v4, 0.0  ;;  %v3525_v14 = vsel %vm9981_vm14, %v3503_v45, 0.0  ;;  %v2449_v36 = vsel %vm8277_vm10, %v10076_v1, %v2446_v62  ;;  %v2450_v46 = vsel %vm8277_vm10, 0, %v2448_v17 }
 0x212   : > { %5146 = vadd.xlane.f32.xlu0 %v5145_v41  ;;  %3526 = vadd.xlane.f32.xlu1 %v3525_v14  ;;  %5963 = vcosq.f32 %v2449_v36  ;;  %vm5547_vm1 = vcmp.lt.s32.totalorder %v5546_v32, 0  ;;  %v8344_v20 = vmul.u32.u64.low %v2615_v35, %v2610_v0  ;;  %v8345_v63 = vmul.u32.u64.high %v2615_v35, %v2610_v0, %v8344_v20 }
 0x213   : > { %5965 = vsinq.f32 %v2449_v36  ;;  %v2520_v61 = vadd.s32 %v8191_v47, %v8189_v57  ;;  %v2535_v9 = vsel %vm5547_vm1, 0, %v5546_v32  ;;  %v2606_v13 = vsel %vm2600_vm9, %v2603_v53, %v2605_v37  ;;  %v10109_v57 = vld [vmem:[#allocation32_spill] sm:$0xff] }
 0x214   : > { %v2536_v29 = vsub.s32 32, %v2535_v9  ;;  %v2540_v23 = vsub.s32 4294967266, %v2535_v9  ;;  %v2551_v17 = vsel %vm2466_vm8, %v2550_v11, %v8260_v28  ;;  %v10106_v25 = vand.u32 2147483647, %v10105_v44 }
 0x215   : > { %v4070_v59 = vadd.s32 3, %v2450_v46  ;;  %vm2624_vm11 = vc.u32 %v8309_v30, %v8344_v20  ;;  %v2756_v47 = vsub.s32 4, %v10109_v57  ;;  %v2537_v31 = vshll.u32 %v8281_v33, %v2535_v9 }
 0x216   : > { %vm8357_vm10 = vcmp.le.f32.partialorder %v10106_v25, 0.7853982  ;;  %v2538_v28 = vshrl.u32 %v2520_v61, %v2536_v29  ;;  %v2541_v12 = vadd.s32 127, %v2540_v23  ;;  %v2625_v4 = vadd.s32 1, %v8345_v63 }
 0x217   : > { %v2758_v26 = vsel %vm8357_vm10, %v10105_v44, %v10110_v56  ;;  %v2454_v45 = vand.u32 3, %v2450_v46  ;;  %v2553_v53 = vsel %vm8317_vm4, 0, %v2551_v17  ;;  %v2622_v0 = vmul.u32 %v2615_v35, %v2606_v13 }
 0x218   : > { %5967 = vcosq.f32 %v2758_v26  ;;  %v2539_v62 = vor.u32 %v2538_v28, %v2537_v31  ;;  %v2542_v32 = vshll.u32 %v2541_v12, 23  ;;  %v2626_v11 = vsel %vm2624_vm11, %v2625_v4, %v8345_v63 }
 0x219   : > { %5969 = vsinq.f32 %v2758_v26  ;;  %v10111_v37 = vand.u32 2147483647, %v8115_v34  ;;  %v10112_v41 = vcvt.s32.f32 %v8113_v38  ;;  %v8382_v36 = vadd.s32 %v7961_v2, %v7977_v18 }
 0x21a   : > { %v2627_v46 = vadd.s32 %v2626_v11, %v2622_v0  ;;  %v4071_v61 = vand.u32 3, %v4070_v59  ;;  %v2543_v9 = vor.u32 4788187, %v2542_v32  ;;  %v2757_v63 = vsel %vm2672_vm5, %v2756_v47, %v10109_v57 }
 0x21b   : > { %v8377_v33 = vmul.f32 %v10112_v41, %v10111_v37  ;;  %v8391_v38 = vsel %vm5579_vm0, 0, %v8242_v15  ;;  %vm2455_vm9 = vcmp.lt.s32.totalorder %v2454_v45, 2  ;;  %v4174_v34 = vadd.s32 3, %v2553_v53  ;;  %v10116_v15 = vld [vmem:[#allocation40_spill] sm:$0xff] }
 0x21c   : > { %v2628_v13 = vadd.s32 536870912, %v2627_v46  ;;  %vm2453_vm13 = vweird.f32 %v10076_v1  ;;  %vm2456_vm12 = vcmp.eq.s32.totalorder %v2454_v45, 0  ;;  %v2544_v2 = vand.u32 2147483647, %v2543_v9  ;;  %v10139_v1 = vld [vmem:[#allocation47_spill] sm:$0xff] }
 0x21d   : > { %v2546_v18 = vcvt.s32.f32 %v2539_v62  ;;  %v10113_v29 = vand.u32 2147483647, %v10078_v21  ;;  %v2759_v25 = vsel %vm8357_vm10, 0, %v2757_v63  ;;  %v2859_v59 = vsub.s32 4, %v10116_v15 }
 0x21e   : > { %v2629_v17 = vshrl.u32 %v2628_v13, 30  ;;  %vm4072_vm5 = vcmp.lt.s32.totalorder %v4071_v61, 2  ;;  %vm4073_vm6 = vcmp.eq.s32.totalorder %v4071_v61, 0  ;;  %vm2459_vm7 = vcmp.eq.s32.totalorder %v2454_v45, 2 }
 0x21f   : > { %vm8396_vm15 = vcmp.le.f32.partialorder %v10113_v29, 0.7853982  ;;  %v2547_v47 = vmul.f32 %v2546_v18, %v2544_v2  ;;  %vm2569_vm3 = vcmp.lt.s32.totalorder %v10093_v51, 0  ;;  %v5964_v56 = vpop.eup %5963  ;;  %vm4076_vm0 = vcmp.eq.s32.totalorder %v4071_v61, 2 }
 0x220   : > { %v2861_v57 = vsel %vm8396_vm15, %v10078_v21, %v8082_v5  ;;  %v8408_v26 = vand.u32 3, %v4174_v34  ;;  %v8410_v31 = vand.u32 3, %v2553_v53  ;;  %v2630_v49 = vshll.u32 %v2629_v17, 30  ;;  %v5966_v28 = vpop.eup %5965 }
 0x221   : > { %v2460_v12 = vxor.u32 2147483648, %v5964_v56  ;;  %v2548_v4 = vxor.u32 2147483648, %v2547_v47  ;;  %v4382_v0 = vadd.s32 3, %v2759_v25  ;;  %5971 = vsinq.f32 %v2861_v57 }
 0x222   : > { %v2457_v62 = vxor.u32 2147483648, %v5966_v28  ;;  %v8412_v5 = vsub.s32 %v2627_v46, %v2630_v49  ;;  %v2860_v32 = vsel %vm2775_vm2, %v2859_v59, %v10116_v15  ;;  %5973 = vcosq.f32 %v2861_v57 }
 0x223   : > { %v4078_v11 = vsel %vm4076_vm0, %v2460_v12, %v5966_v28  ;;  %v2461_v37 = vsel %vm2459_vm7, %v2460_v12, %v5966_v28  ;;  %v2549_v53 = vsel %vm2466_vm8, %v2548_v4, %v2547_v47  ;;  %v2653_v41 = vsub.s32 4, %v2629_v17 }
 0x224   : > { %v4075_v9 = vsel %vm4073_vm6, %v5964_v56, %v2457_v62  ;;  %v2458_v63 = vsel %vm2456_vm12, %v5964_v56, %v2457_v62  ;;  %v2552_v46 = vsel %vm8317_vm4, %v10083_v8, %v2549_v53  ;;  %v2633_v34 = vsub.s32 0, %v8412_v5  ;;  %v8457_v53 = vpop.f32.mrf.mxu0 }
 0x225   : > { %v8426_v13 = vpop.eup %5967  ;;  %v4079_v2 = vsel %vm4072_vm5, %v4075_v9, %v4078_v11  ;;  %v2462_v18 = vsel %vm2455_vm9, %v2458_v63, %v2461_v37  ;;  %5975 = vcosq.f32 %v2552_v46  ;;  %v8430_v29 = vand.u32 3, %v2759_v25  ;;  %v10117_v11 = vld [vmem:[#allocation15_spill] sm:$0xff] }
 0x226   : > { %v5970_v15 = vpop.eup %5969  ;;  %v4080_v59 = vsel %vm2453_vm13, nan, %v4079_v2  ;;  %v2463_v57 = vsel %vm2453_vm13, nan, %v2462_v18  ;;  %5977 = vsinq.f32 %v2552_v46  ;;  %v5549_v7 = vmin.u32 %v2633_v34, %v8412_v5 }
 0x227   : > { %v5125_v47 = vmul.f32 %v8322_v40, %v4080_v59  ;;  %v3504_v61 = vmul.f32 %v8322_v40, %v2463_v57  ;;  %v4383_v56 = vand.u32 3, %v4382_v0  ;;  %v2862_v45 = vsel %vm8396_vm15, 0, %v2860_v32 }
 0x228   : > { %v2635_v25 = vclz %v5549_v7  ;;  %v2654_v49 = vsel %vm2569_vm3, %v2653_v41, %v2629_v17  ;;  %v2766_v28 = vxor.u32 2147483648, %v5970_v15  ;;  %v2769_v12 = vxor.u32 2147483648, %v8426_v13  ;;  %v786_v7 = vpop.f32.mrf.mxu0 }
 0x229   : > { %v5148_v4 = vsel %vm9981_vm14, %v5125_v47, 0.0  ;;  %v3528_v62 = vsel %vm9981_vm14, %v3504_v61, 0.0  ;;  %v698_v37 = vrot.slane %v10117_v11, 4  ;;  %v10118_v23 = vand.u32 2147483647, %v10093_v51 }
 0x22a   : > { %5149 = vadd.xlane.f32.xlu0 %v5148_v4  ;;  %3529 = vadd.xlane.f32.xlu1 %v3528_v62  ;;  %v2623_v17 = vadd.s32 %v8344_v20, %v8309_v30  ;;  %v5550_v32 = vadd.s32 4294967294, %v2635_v25  ;;  %vm2762_vm8 = vweird.f32 %v10105_v44  ;;  %vm4385_vm4 = vcmp.eq.s32.totalorder %v4383_v56, 0  ;;  %v8493_v14 = vpop.f32.mrf.mxu0  ;;  %v10123_v44 = vld [vmem:[#allocation46_spill] sm:$0xff] }
 0x22b   : > { %vm8450_vm2 = vcmp.le.f32.partialorder %v10118_v23, 0.7853982  ;;  %vm4388_vm1 = vcmp.eq.s32.totalorder %v4383_v56, 2  ;;  %v4486_v9 = vadd.s32 3, %v2862_v45  ;;  %vm4180_vm10 = vcmp.eq.s32.totalorder %v8408_v26, 2 }
 0x22c   : > { %v8461_v41 = vsel %vm8450_vm2, 0, %v2654_v49  ;;  %vm2562_vm11 = vcmp.eq.s32.totalorder %v8410_v31, 2  ;;  %vm5551_vm9 = vcmp.lt.s32.totalorder %v5550_v32, 0  ;;  %v4387_v30 = vsel %vm4385_vm4, %v8426_v13, %v2766_v28 }
 0x22d   : > { %v4390_v20 = vsel %vm4388_vm1, %v2769_v12, %v5970_v15  ;;  %vm2764_vm13 = vcmp.lt.s32.totalorder %v8430_v29, 2  ;;  %vm4177_vm12 = vcmp.eq.s32.totalorder %v8408_v26, 0  ;;  %vm2559_vm15 = vcmp.eq.s32.totalorder %v8410_v31, 0 }
 0x22e   : > { %v2638_v63 = vsel %vm5551_vm9, 0, %v5550_v32  ;;  %vm2765_vm5 = vcmp.eq.s32.totalorder %v8430_v29, 0  ;;  %v8471_v46 = vand.u32 3, %v2862_v45  ;;  %v699_v34 = vadd.f32 %v698_v37, %v10117_v11  ;;  %v8474_v2 = vpop.eup %5971  ;;  %v636_v37 = vpop.xlane.xlu1 %635 }
 0x22f   : > { %vm4176_vm6 = vcmp.lt.s32.totalorder %v8408_v26, 2  ;;  %vm2558_vm7 = vcmp.lt.s32.totalorder %v8410_v31, 2  ;;  %v2639_v18 = vsub.s32 32, %v2638_v63  ;;  %v2643_v59 = vsub.s32 4294967266, %v2638_v63  ;;  %v5974_v47 = vpop.eup %5973 }
 0x230   : > { %v4278_v57 = vadd.s32 3, %v8461_v41  ;;  %vm4384_vm0 = vcmp.lt.s32.totalorder %v4383_v56, 2  ;;  %vm2556_vm4 = vweird.f32 %v10083_v8  ;;  %v2767_v45 = vsel %vm2765_vm5, %v8426_v13, %v2766_v28 }
 0x231   : > { %v4391_v61 = vsel %vm4384_vm0, %v4387_v30, %v4390_v20  ;;  %vm2768_vm1 = vcmp.eq.s32.totalorder %v8430_v29, 2  ;;  %v8484_v25 = vand.u32 3, %v4486_v9  ;;  %v2640_v49 = vshll.u32 %v8412_v5, %v2638_v63 }
 0x232   : > { %v2641_v4 = vshrl.u32 %v2623_v17, %v2639_v18  ;;  %v2644_v62 = vadd.s32 127, %v2643_v59  ;;  %v2770_v11 = vsel %vm2768_vm1, %v2769_v12, %v5970_v15  ;;  %v2869_v56 = vxor.u32 2147483648, %v8474_v2  ;;  %v5976_v30 = vpop.eup %5975 }
 0x233   : > { %vm2868_vm9 = vcmp.eq.s32.totalorder %v8471_v46, 0  ;;  %v700_v23 = vrot.slane %v699_v34, 2  ;;  %v787_v32 = vadd.f32 %v786_v7, %v636_v37  ;;  %v8491_v20 = vand.u32 3, %v4278_v57  ;;  %v5978_v5 = vpop.eup %5977 }
 0x234   : > { %v2642_v13 = vor.u32 %v2641_v4, %v2640_v49  ;;  %v2645_v28 = vshll.u32 %v2644_v62, 23  ;;  %v2872_v9 = vxor.u32 2147483648, %v5974_v47  ;;  %v2563_v17 = vxor.u32 2147483648, %v5976_v30  ;;  %v638_v62 = vpop.xlane.xlu0 %637 }
 0x235   : > { %v8497_v15 = vsel %vm2762_vm8, nan, %v4391_v61  ;;  %v2771_v12 = vsel %vm2764_vm13, %v2767_v45, %v2770_v11  ;;  %v701_v63 = vadd.f32 %v700_v23, %v699_v34  ;;  %v2560_v18 = vxor.u32 2147483648, %v5978_v5  ;;  %v796_v11 = vpop.f32.mrf.mxu0 }
 0x236   : > { %v2646_v59 = vor.u32 4788187, %v2645_v28  ;;  %vm4488_vm5 = vcmp.lt.s32.totalorder %v8484_v25, 2  ;;  %vm4489_vm0 = vcmp.eq.s32.totalorder %v8484_v25, 0  ;;  %vm4492_vm1 = vcmp.eq.s32.totalorder %v8484_v25, 2 }
 0x237   : > { %v4182_v57 = vsel %vm4180_vm10, %v2563_v17, %v5978_v5  ;;  %v2564_v7 = vsel %vm2562_vm11, %v2563_v17, %v5978_v5  ;;  %v2870_v61 = vsel %vm2868_vm9, %v5974_v47, %v2869_v56  ;;  %v702_v29 = vrot.slane %v701_v63, 1 }
 0x238   : > { %v4179_v34 = vsel %vm4177_vm12, %v5976_v30, %v2560_v18  ;;  %v2561_v45 = vsel %vm2559_vm15, %v5976_v30, %v2560_v18  ;;  %v2647_v49 = vand.u32 2147483647, %v2646_v59  ;;  %v2649_v4 = vcvt.s32.f32 %v2642_v13  ;;  %v640_v18 = vpop.xlane.xlu1 %639 }
 0x239   : > { %vm2867_vm13 = vcmp.lt.s32.totalorder %v8471_v46, 2  ;;  %v4183_v37 = vsel %vm4176_vm6, %v4179_v34, %v4182_v57  ;;  %v2565_v23 = vsel %vm2558_vm7, %v2561_v45, %v2564_v7  ;;  %v4491_v28 = vsel %vm4489_vm0, %v5974_v47, %v2869_v56  ;;  %v8538_v7 = vpop.f32.mrf.mxu0 }
 0x23a   : > { %v8519_v5 = vadd.f32 %v702_v29, %v701_v63  ;;  %v4184_v17 = vsel %vm2556_vm4, nan, %v4183_v37  ;;  %v2566_v30 = vsel %vm2556_vm4, nan, %v2565_v23  ;;  %v2650_v13 = vmul.f32 %v2649_v4, %v2647_v49  ;;  %v642_v49 = vpop.xlane.xlu0 %641 }
 0x23b   : > { %vm2865_vm10 = vweird.f32 %v10078_v21  ;;  %vm2871_vm11 = vcmp.eq.s32.totalorder %v8471_v46, 2  ;;  %v5126_v26 = vmul.f32 %v8322_v40, %v4184_v17  ;;  %v3505_v31 = vmul.f32 %v8322_v40, %v2566_v30  ;;  %v806_v17 = vpop.f32.mrf.mxu0 }
 0x23c   : > { %v865_v47 = vadd.f32 %v787_v32, %v8519_v5  ;;  %v8531_v56 = vstv %s8489_s22  ;;  %v2651_v63 = vxor.u32 2147483648, %v2650_v13  ;;  %v4494_v8 = vsel %vm4492_vm1, %v2872_v9, %v8474_v2  ;;  %v644_v23 = vpop.xlane.xlu1 %643  ;;  %s9778_s22 = scalar_lea.vmem %s10231_s13, %s5770_s10  ;;  %s6313_s13 = smov [#allocation7]  }
 0x23d   : > { %v2873_v59 = vsel %vm2871_vm11, %v2872_v9, %v8474_v2  ;;  %v792_v57 = vadd.f32 %v8457_v53, %v638_v62  ;;  %v5151_v29 = vsel %vm9981_vm14, %v5126_v26, 0.0  ;;  %v3531_v34 = vsel %vm9981_vm14, %v3505_v31, 0.0  ;;  %s6218_s16 = sshll.u32 %s6313_s13, 4  ;;  %s6219_s16 = int_to_ptr.vmem [resolvable:$false] %s6218_s16 }
 0x23e   : > { %vm881_vm12 = vcmp.gt.f32.partialorder %v865_v47, 1e-16  ;;  %vm898_vm15 = vcmp.lt.f32.partialorder %v865_v47, %v8531_v56  ;;  %5152 = vadd.xlane.f32.xlu0 %v5151_v29  ;;  %3532 = vadd.xlane.f32.xlu1 %v3531_v34  ;;  %v2652_v32 = vsel %vm2569_vm3, %v2651_v63, %v2650_v13  ;;  %v2772_v45 = vsel %vm2762_vm8, nan, %v2771_v12 }
 0x23f   : > { %vm8547_vm6 = vmand %vm881_vm12, %vm898_vm15  ;;  %v866_v53 = vadd.f32 %v792_v57, %v8519_v5  ;;  %v797_v9 = vadd.f32 %v796_v11, %v640_v18  ;;  %v2655_v4 = vsel %vm8450_vm2, %v10093_v51, %v2652_v32  ;;  %v4495_v62 = vsel %vm4488_vm5, %v4491_v28, %v4494_v8 }
 0x240   : > { %v8559_v37 = vsel %vm8547_vm6, %v865_v47, 1.0  ;;  %v2962_v12 = vsub.s32 4, %v10123_v44  ;;  %5979 = vcosq.f32 %v2655_v4  ;;  %v2874_v0 = vsel %vm2867_vm13, %v2870_v61, %v2873_v59 }
 0x241   : > { %vm882_vm3 = vcmp.gt.f32.partialorder %v866_v53, 1e-16  ;;  %vm899_vm8 = vcmp.lt.f32.partialorder %v866_v53, %v8531_v56  ;;  %v867_v11 = vadd.f32 %v797_v9, %v8519_v5  ;;  %5981 = vsinq.f32 %v2655_v4  ;;  %v10135_v9 = vld [vmem:[#allocation29_spill] sm:$0xff] }
 0x242   : > { %vm8566_vm2 = vmand %vm882_vm3, %vm899_vm8  ;;  %vm10126_vm7 = vcmp.lt.s32.totalorder %v10089_v42, 0  ;;  %v802_v30 = vadd.f32 %v8493_v14, %v642_v49  ;;  %5983 = vrsqrt.f32 %v8559_v37  ;;  %v4496_v46 = vsel %vm2865_vm10, nan, %v4495_v62 }
 0x243   : > { %v2963_v28 = vsel %vm10126_vm7, %v2962_v12, %v10123_v44  ;;  %v8577_v13 = vsel %vm8566_vm2, %v866_v53, 1.0  ;;  %vm883_vm4 = vcmp.gt.f32.partialorder %v867_v11, 1e-16  ;;  %vm900_vm9 = vcmp.lt.f32.partialorder %v867_v11, %v8531_v56 }
 0x244   : > { %5985 = vrsqrt.f32 %v8577_v13  ;;  %vm8583_vm5 = vmand %vm883_vm4, %vm900_vm9  ;;  %v868_v14 = vadd.f32 %v802_v30, %v8519_v5  ;;  %v807_v18 = vadd.f32 %v806_v17, %v644_v23  ;;  %v8589_v26 = vand.u32 3, %v8461_v41  ;;  %v10136_v23 = vld [vmem:[#allocation45_spill] sm:$0xff] }
 0x245   : > { %v5128_v31 = vmul.f32 %v8322_v40, %v8497_v15  ;;  %v2875_v47 = vsel %vm2865_vm10, nan, %v2874_v0  ;;  %v10129_v63 = vand.u32 2147483647, %v10089_v42  ;;  %v3507_v57 = vmul.f32 %v8322_v40, %v2772_v45 }
 0x246   : > { %vm884_vm1 = vcmp.gt.f32.partialorder %v868_v14, 1e-16  ;;  %vm901_vm13 = vcmp.lt.f32.partialorder %v868_v14, %v8531_v56  ;;  %v869_v59 = vadd.f32 %v807_v18, %v8519_v5  ;;  %v5129_v15 = vmul.f32 %v8322_v40, %v4496_v46 }
 0x247   : > { %vm2877_vm0 = vcmp.le.f32.partialorder %v10129_v63, 0.7853982  ;;  %v8608_v21 = vsel %vm8583_vm5, %v867_v11, 1.0  ;;  %v3508_v29 = vmul.f32 %v8322_v40, %v2875_v47  ;;  %vm8613_vm10 = vmand %vm884_vm1, %vm901_vm13  ;;  %vm4281_vm15 = vcmp.eq.s32.totalorder %v8491_v20, 0 }
 0x248   : > { %v2965_v8 = vsel %vm2877_vm0, 0, %v2963_v28  ;;  %v2964_v34 = vsel %vm2877_vm0, %v10089_v42, %v8212_v54  ;;  %vm885_vm11 = vcmp.gt.f32.partialorder %v869_v59, 1e-16  ;;  %vm902_vm12 = vcmp.lt.f32.partialorder %v869_v59, %v8531_v56 }
 0x249   : > { %vm4284_vm3 = vcmp.eq.s32.totalorder %v8491_v20, 2  ;;  %vm2662_vm8 = vcmp.eq.s32.totalorder %v8589_v26, 0  ;;  %v4590_v45 = vadd.s32 3, %v2965_v8  ;;  %vm8621_vm7 = vmand %vm885_vm11, %vm902_vm12  ;;  %v10132_v53 = vmov 0 }
 0x24a   : > { %v10133_v53 = vsel %vm8621_vm7, 4294967295, %v10132_v53  ;;  %vm4280_vm4 = vcmp.lt.s32.totalorder %v8491_v20, 2  ;;  %vm2661_vm9 = vcmp.lt.s32.totalorder %v8589_v26, 2  ;;  %vm2665_vm0 = vcmp.eq.s32.totalorder %v8589_v26, 2 }
 0x24b   : > { %10134 = vst [vmem:[#allocation20_spill] sm:$0xff] %v10133_v53  ;;  %v8629_v54 = vsel %vm9981_vm14, %v5128_v31, 0.0  ;;  %5987 = vrsqrt.f32 %v8608_v21  ;;  %v9959_v49 = vand.u32 2147483647, %v10135_v9  ;;  %vm2659_vm1 = vweird.f32 %v10093_v51  ;;  %v10137_v31 = vld [vmem:[#allocation42_spill] sm:$0xff] }
 0x24c   : > { %v8635_v4 = vsel %vm9981_vm14, %v3507_v57, 0.0  ;;  %v8638_v62 = vsel %vm9981_vm14, %v5129_v15, 0.0  ;;  %5989 = vsinq.f32 %v2964_v34  ;;  %v8642_v44 = vsel %vm8613_vm10, %v868_v14, 1.0 }
 0x24d   : > { %v8645_v12 = vsel %vm9981_vm14, %v3508_v29, 0.0  ;;  %5991 = vcosq.f32 %v2964_v34  ;;  %v8649_v11 = vsel %vm8621_vm7, %v869_v59, 1.0  ;;  %v2997_v17 = vshrl.u32 %v10027_v10, %v10136_v23  ;;  %v5980_v14 = vpop.eup %5979 }
 0x24e   : > { %v8660_v0 = vstv %s8597_s24  ;;  %v8662_v28 = vand.u32 3, %v4590_v45  ;;  %v8664_v30 = vand.u32 3, %v2965_v8  ;;  %v8668_v46 = vand.u32 8388607, %v9959_v49  ;;  %v5982_v59 = vpop.eup %5981  ;;  %v8685_v45 = vld [vmem:[%s8657_s12] ss:$0 sm:$0xff] }
 0x24f   : > { %5993 = vrsqrt.f32 %v8642_v44  ;;  %v2995_v18 = vshrl.u32 %v10022_v43, %v10136_v23  ;;  %v2996_v47 = vshll.u32 %v10022_v43, %v10137_v31  ;;  %v3000_v63 = vshrl.u32 %v10028_v3, %v10136_v23  ;;  %v8682_v29 = vpop.eup %5983  ;;  %10138 = vst [vmem:[#allocation39_spill] sm:$0xff] %v8685_v45 }
 0x250   : > { %v2666_v57 = vxor.u32 2147483648, %v5980_v14  ;;  %5995 = vrsqrt.f32 %v8649_v11  ;;  %v2999_v8 = vshll.u32 %v10027_v10, %v10137_v31  ;;  %v3002_v15 = vshll.u32 %v10028_v3, %v10137_v31 }
 0x251   : > { %v2663_v34 = vxor.u32 2147483648, %v5982_v59  ;;  %v2998_v49 = vor.u32 %v2997_v17, %v2996_v47  ;;  %v3003_v35 = vshrl.u32 %v10029_v27, %v10136_v23  ;;  %vm3011_vm13 = vcmp.lt.s32.totalorder %v10139_v1, 1  ;;  %v8690_v41 = vpop.eup %5985 }
 0x252   : > { %v4286_v48 = vsel %vm4284_vm3, %v2666_v57, %v5982_v59  ;;  %v2667_v50 = vsel %vm2665_vm0, %v2666_v57, %v5982_v59  ;;  %v962_v31 = vmul.f32 %v8682_v29, %v8559_v37  ;;  %v2987_v16 = vor.u32 8388608, %v8668_v46 }
 0x253   : > { %v4283_v17 = vsel %vm4281_vm15, %v5980_v14, %v2663_v34  ;;  %v2664_v23 = vsel %vm2662_vm8, %v5980_v14, %v2663_v34  ;;  %v963_v47 = vmul.f32 %v8690_v41, %v8577_v13  ;;  %v8705_v60 = vor.u32 %v3000_v63, %v2999_v8 }
 0x254   : > { %v4287_v53 = vsel %vm4280_vm4, %v4283_v17, %v4286_v48  ;;  %v2668_v59 = vsel %vm2661_vm9, %v2664_v23, %v2667_v50  ;;  %v979_v37 = vmul.f32 %v8660_v0, %v962_v31  ;;  %v1273_v46 = vmul.f32 %v8685_v45, %v962_v31 }
 0x255   : > { %v4288_v57 = vsel %vm2659_vm1, nan, %v4287_v53  ;;  %v2669_v14 = vsel %vm2659_vm1, nan, %v2668_v59  ;;  %v980_v13 = vmul.f32 %v8660_v0, %v963_v47  ;;  %v8719_v63 = vmul.f32 %v8685_v45, %v963_v47 }
 0x256   : > { %v5127_v48 = vmul.f32 %v8322_v40, %v4288_v57  ;;  %v3506_v20 = vmul.f32 %v8322_v40, %v2669_v14  ;;  %v995_v50 = vmul.f32 0.3275911, %v979_v37  ;;  %v1187_v26 = vsub.f32 0.0, %v979_v37 }
 0x257   : > { %vm4593_vm11 = vcmp.eq.s32.totalorder %v8662_v28, 0  ;;  %vm2971_vm12 = vcmp.eq.s32.totalorder %v8664_v30, 0  ;;  %v1289_v8 = vmul.f32 0.3275911, %v1273_v46  ;;  %v1481_v53 = vsub.f32 0.0, %v1273_v46 }
 0x258   : > { %v996_v34 = vmul.f32 0.3275911, %v980_v13  ;;  %vm4596_vm15 = vcmp.eq.s32.totalorder %v8662_v28, 2  ;;  %vm2974_vm3 = vcmp.eq.s32.totalorder %v8664_v30, 2  ;;  %vm3013_vm8 = vcmp.lt.s32.totalorder %v10139_v1, 3  ;;  %v8728_v51 = vpop.eup %5987 }
 0x259   : > { %v5154_v31 = vsel %vm9981_vm14, %v5127_v48, 0.0  ;;  %v3534_v17 = vsel %vm9981_vm14, %v3506_v20, 0.0  ;;  %v1011_v23 = vadd.f32 1.0, %v995_v50  ;;  %v1203_v47 = vmul.f32 %v1187_v26, %v979_v37  ;;  %v5990_v59 = vpop.eup %5989  ;;  %v10141_v48 = vld [vmem:[#allocation48_spill] sm:$0xff] }
 0x25a   : > { %5155 = vadd.xlane.f32.xlu0 %v5154_v31  ;;  %3535 = vadd.xlane.f32.xlu1 %v3534_v17  ;;  %v1305_v57 = vadd.f32 1.0, %v1289_v8  ;;  %vm4592_vm4 = vcmp.lt.s32.totalorder %v8662_v28, 2  ;;  %vm2970_vm9 = vcmp.lt.s32.totalorder %v8664_v30, 2  ;;  %v8734_v14 = vor.u32 %v3003_v35, %v3002_v15  ;;  %v5992_v37 = vpop.eup %5991 }
 0x25b   : > { %v8738_v27 = vsel %vm3011_vm13, %v2995_v18, %v2998_v49  ;;  %v8744_v20 = vsel %vm3013_vm8, %v10141_v48, %v10140_v22  ;;  %5997 = vrcp.f32 %v1011_v23  ;;  %v1012_v50 = vadd.f32 1.0, %v996_v34  ;;  %v646_v22 = vpop.xlane.xlu0 %645 }
 0x25c   : > { %v1188_v26 = vsub.f32 0.0, %v980_v13  ;;  %v1290_v8 = vmul.f32 0.3275911, %v8719_v63  ;;  %vm2968_vm0 = vweird.f32 %v10089_v42  ;;  %5999 = vrcp.f32 %v1305_v57  ;;  %v8757_v31 = vpop.eup %5993 }
 0x25d   : > { %v964_v35 = vmul.f32 %v8728_v51, %v8608_v21  ;;  %v8753_v18 = vsel %vm3011_vm13, %v2998_v49, %v8705_v60  ;;  %v8755_v15 = vshll.u32 %v2987_v16, 8  ;;  %v1219_v34 = vmul.f32 1.442695, %v1203_v47  ;;  %v8759_v43 = vpop.eup %5995 }
 0x25e   : > { %v1497_v17 = vmul.f32 %v1481_v53, %v1273_v46  ;;  %v1306_v23 = vadd.f32 1.0, %v1290_v8  ;;  %v2972_v48 = vxor.u32 2147483648, %v5990_v59  ;;  %10142 = vst [vmem:[#allocation24_spill] sm:$0xff] %v8759_v43  ;;  %5158 = vadd.xlane.f32.xlu0 %v8629_v54  ;;  %3538 = vadd.xlane.f32.xlu1 %v8635_v4  ;;  %v1482_v21 = vsub.f32 0.0, %v8719_v63 }
 0x25f   : > { %v981_v49 = vmul.f32 %v8660_v0, %v964_v35  ;;  %v1275_v16 = vmul.f32 %v8685_v45, %v964_v35  ;;  %v2975_v57 = vxor.u32 2147483648, %v5992_v37  ;;  %6001 = vrcp.f32 %v1012_v50 }
 0x260   : > { %v1204_v3 = vmul.f32 %v1188_v26, %v980_v13  ;;  %vm10143_vm1 = vcmp.lt.s32.totalorder %v10139_v1, 4  ;;  %v8770_v53 = vadd.f32 %v8538_v7, %v646_v22  ;;  %v4595_v4 = vsel %vm4593_vm11, %v5992_v37, %v2972_v48 }
 0x261   : > { %v3016_v46 = vsel %vm10143_vm1, %v8734_v14, 2102212464  ;;  %v997_v47 = vmul.f32 0.3275911, %v981_v49  ;;  %v1291_v54 = vmul.f32 0.3275911, %v1275_v16  ;;  %v2973_v8 = vsel %vm2971_vm12, %v5992_v37, %v2972_v48 }
 0x262   : > { %v1513_v10 = vmul.f32 1.442695, %v1497_v17  ;;  %6003 = vrcp.f32 %v1306_v23  ;;  %v4598_v13 = vsel %vm4596_vm15, %v2975_v57, %v5990_v59  ;;  %v2976_v50 = vsel %vm2974_vm3, %v2975_v57, %v5990_v59  ;;  %5161 = vadd.xlane.f32.xlu0 %v8638_v62  ;;  %3541 = vadd.xlane.f32.xlu1 %v8645_v12 }
 0x263   : > { %6005 = vpow2.f32 %v1219_v34  ;;  %v1498_v7 = vmul.f32 %v1482_v21, %v8719_v63  ;;  %v1013_v26 = vadd.f32 1.0, %v997_v47  ;;  %v1307_v35 = vadd.f32 1.0, %v1291_v54 }
 0x264   : > { %v1189_v22 = vsub.f32 0.0, %v981_v49  ;;  %v4599_v37 = vsel %vm4592_vm4, %v4595_v4, %v4598_v13  ;;  %v2977_v17 = vsel %vm2970_vm9, %v2973_v8, %v2976_v50  ;;  %v965_v23 = vmul.f32 %v8757_v31, %v8642_v44 }
 0x265   : > { %v1221_v59 = vmul.f32 1.442695, %v1204_v3  ;;  %6007 = vrcp.f32 %v1013_v26  ;;  %v4600_v62 = vsel %vm2968_vm0, nan, %v4599_v37  ;;  %v2978_v12 = vsel %vm2968_vm0, nan, %v2977_v17 }
 0x266   : > { %6009 = vrcp.f32 %v1307_v35  ;;  %v1483_v63 = vsub.f32 0.0, %v1275_v16  ;;  %v5130_v34 = vmul.f32 %v8322_v40, %v4600_v62  ;;  %v3509_v28 = vmul.f32 %v8322_v40, %v2978_v12 }
 0x267   : > { %6011 = vpow2.f32 %v1513_v10  ;;  %v982_v30 = vmul.f32 %v8660_v0, %v965_v23  ;;  %v1276_v48 = vmul.f32 %v8685_v45, %v965_v23  ;;  %v966_v3 = vmul.f32 %v8759_v43, %v8649_v11 }
 0x268   : > { %v1515_v44 = vmul.f32 1.442695, %v1498_v7  ;;  %v1205_v21 = vmul.f32 %v1189_v22, %v981_v49  ;;  %v5163_v57 = vsel %vm9981_vm14, %v5130_v34, 0.0  ;;  %v3543_v42 = vsel %vm9981_vm14, %v3509_v28, 0.0  ;;  %v8801_v47 = vpop.eup %5997 }
 0x269   : > { %6013 = vpow2.f32 %v1221_v59  ;;  %5164 = vadd.xlane.f32.xlu0 %v5163_v57  ;;  %3544 = vadd.xlane.f32.xlu1 %v3543_v42  ;;  %v998_v40 = vmul.f32 0.3275911, %v982_v30  ;;  %v1292_v10 = vmul.f32 0.3275911, %v1276_v48  ;;  %v8806_v54 = vsel %vm3013_vm8, %v8705_v60, %v3016_v46  ;;  %v8808_v4 = vpop.eup %5999 }
 0x26a   : > { %v1043_v11 = vmul.f32 1.0614054, %v8801_v47  ;;  %v1499_v49 = vmul.f32 %v1483_v63, %v1275_v16  ;;  %v983_v8 = vmul.f32 %v8660_v0, %v966_v3  ;;  %v8813_v13 = vmul.f32 %v8685_v45, %v966_v3 }
 0x26b   : > { %v1337_v50 = vmul.f32 1.0614054, %v8808_v4  ;;  %v1014_v7 = vadd.f32 1.0, %v998_v40  ;;  %v1190_v26 = vsub.f32 0.0, %v982_v30  ;;  %v1308_v35 = vadd.f32 1.0, %v1292_v10 }
 0x26c   : > { %v1059_v22 = vadd.f32 -1.4531521, %v1043_v11  ;;  %6015 = vpow2.f32 %v1515_v44  ;;  %v1223_v37 = vmul.f32 1.442695, %v1205_v21  ;;  %v999_v46 = vmul.f32 0.3275911, %v983_v8  ;;  %v8816_v17 = vpop.eup %6001 }
 0x26d   : > { %v1353_v23 = vadd.f32 -1.4531521, %v1337_v50  ;;  %6017 = vrcp.f32 %v1014_v7  ;;  %v1484_v59 = vsub.f32 0.0, %v1276_v48  ;;  %v1293_v16 = vmul.f32 0.3275911, %v8813_v13 }
 0x26e   : > { %v1075_v62 = vmul.f32 %v8801_v47, %v1059_v22  ;;  %v1044_v12 = vmul.f32 1.0614054, %v8816_v17  ;;  %v1517_v63 = vmul.f32 1.442695, %v1499_v49  ;;  %6019 = vrcp.f32 %v1308_v35 }
 0x26f   : > { %v8821_v34 = vpop.eup %6003  ;;  %v1369_v28 = vmul.f32 %v8808_v4, %v1353_v23  ;;  %v1206_v3 = vmul.f32 %v1190_v26, %v982_v30  ;;  %v1015_v44 = vadd.f32 1.0, %v999_v46  ;;  %v1191_v21 = vsub.f32 0.0, %v983_v8 }
 0x270   : > { %v8824_v57 = vpop.eup %6005  ;;  %v1091_v42 = vadd.f32 1.4214138, %v1075_v62  ;;  %v1060_v40 = vadd.f32 -1.4531521, %v1044_v12  ;;  %v1338_v10 = vmul.f32 1.0614054, %v8821_v34  ;;  %6021 = vpow2.f32 %v1223_v37 }
 0x271   : > { %v1385_v11 = vadd.f32 1.4214138, %v1369_v28  ;;  %v1500_v50 = vmul.f32 %v1484_v59, %v1276_v48  ;;  %6023 = vrcp.f32 %v1015_v44  ;;  %v1309_v7 = vadd.f32 1.0, %v1293_v16 }
 0x272   : > { %v8827_v49 = vpop.eup %6007  ;;  %v1107_v35 = vmul.f32 %v8801_v47, %v1091_v42  ;;  %v1076_v22 = vmul.f32 %v8816_v17, %v1060_v40  ;;  %v1354_v30 = vadd.f32 -1.4531521, %v1338_v10  ;;  %6025 = vpow2.f32 %v1517_v63 }
 0x273   : > { %vm3012_vm11 = vcmp.lt.s32.totalorder %v10139_v1, 2  ;;  %v8832_v26 = vpop.eup %6009  ;;  %v1401_v46 = vmul.f32 %v8808_v4, %v1385_v11  ;;  %v1045_v37 = vmul.f32 1.0614054, %v8827_v49  ;;  %v1225_v23 = vmul.f32 1.442695, %v1206_v3 }
 0x274   : > { %v1207_v48 = vmul.f32 %v1191_v21, %v983_v8  ;;  %v8836_v59 = vpop.eup %6011  ;;  %v1123_v16 = vadd.f32 -0.28449672, %v1107_v35  ;;  %v1092_v62 = vadd.f32 1.4214138, %v1076_v22  ;;  %v1370_v12 = vmul.f32 %v8821_v34, %v1354_v30  ;;  %v10144_v22 = vld [vmem:[#allocation51_spill] sm:$0xff] }
 0x275   : > { %v1339_v28 = vmul.f32 1.0614054, %v8832_v26  ;;  %v1417_v44 = vadd.f32 -0.28449672, %v1401_v46  ;;  %v1061_v63 = vadd.f32 -1.4531521, %v1045_v37  ;;  %6027 = vrcp.f32 %v1309_v7 }
 0x276   : > { %v1519_v42 = vmul.f32 1.442695, %v1500_v50  ;;  %v6014_v40 = vpop.eup %6013  ;;  %v1139_v10 = vmul.f32 %v8801_v47, %v1123_v16  ;;  %v1108_v11 = vmul.f32 %v8816_v17, %v1092_v62  ;;  %v1386_v43 = vadd.f32 1.4214138, %v1370_v12 }
 0x277   : > { %v1355_v3 = vadd.f32 -1.4531521, %v1339_v28  ;;  %v1433_v8 = vmul.f32 %v8808_v4, %v1417_v44  ;;  %v1077_v21 = vmul.f32 %v8827_v49, %v1061_v63  ;;  %v1227_v35 = vmul.f32 1.442695, %v1207_v48 }
 0x278   : > { %v3021_v30 = vsel %vm3013_vm8, %v8734_v14, %v10144_v22  ;;  %v1124_v46 = vadd.f32 -0.28449672, %v1108_v11  ;;  %v1402_v50 = vmul.f32 %v8821_v34, %v1386_v43  ;;  %6029 = vpow2.f32 %v1225_v23 }
 0x279   : > { %v1371_v7 = vmul.f32 %v8832_v26, %v1355_v3  ;;  %v6016_v37 = vpop.eup %6015  ;;  %v1155_v16 = vadd.f32 0.2548296, %v1139_v10  ;;  %v1093_v62 = vadd.f32 1.4214138, %v1077_v21  ;;  %6031 = vpow2.f32 %v1519_v42 }
 0x27a   : > { %v1485_v12 = vsub.f32 0.0, %v8813_v13  ;;  %v8851_v28 = vpop.eup %6017  ;;  %v1449_v48 = vadd.f32 0.2548296, %v1433_v8  ;;  %v1140_v44 = vmul.f32 %v8816_v17, %v1124_v46  ;;  %v1418_v63 = vadd.f32 -0.28449672, %v1402_v50 }
 0x27b   : > { %v1387_v55 = vadd.f32 1.4214138, %v1371_v7  ;;  %v8854_v22 = vpop.eup %6019  ;;  %v1109_v43 = vmul.f32 %v8827_v49, %v1093_v62  ;;  %v1046_v11 = vmul.f32 1.0614054, %v8851_v28  ;;  %6033 = vpow2.f32 %v1227_v35 }
 0x27c   : > { %v8861_v23 = vsel %vm3012_vm11, %v8753_v18, %v3021_v30  ;;  %v1156_v42 = vadd.f32 0.2548296, %v1140_v44  ;;  %v1434_v10 = vmul.f32 %v8821_v34, %v1418_v63  ;;  %v3023_v8 = vsel %vm3011_vm13, %v8705_v60, %v8734_v14 }
 0x27d   : > { %v1403_v3 = vmul.f32 %v8832_v26, %v1387_v55  ;;  %v6022_v21 = vpop.eup %6021  ;;  %v1171_v46 = vmul.f32 %v8801_v47, %v1155_v16  ;;  %v1125_v50 = vadd.f32 -0.28449672, %v1109_v43  ;;  %v1062_v35 = vadd.f32 -1.4531521, %v1046_v11 }
 0x27e   : > { %v1340_v7 = vmul.f32 1.0614054, %v8854_v22  ;;  %v8871_v62 = vpop.eup %6023  ;;  %v1465_v18 = vmul.f32 %v8808_v4, %v1449_v48  ;;  %v1172_v30 = vmul.f32 %v8816_v17, %v1156_v42  ;;  %v1450_v44 = vadd.f32 0.2548296, %v1434_v10 }
 0x27f   : > { %v1419_v55 = vadd.f32 -0.28449672, %v1403_v3  ;;  %v6026_v63 = vpop.eup %6025  ;;  %v1141_v45 = vmul.f32 %v8827_v49, %v1125_v50  ;;  %v1078_v60 = vmul.f32 %v8851_v28, %v1062_v35  ;;  %v870_v47 = vadd.f32 %v8770_v53, %v8519_v5 }
 0x280   : > { %v1356_v14 = vadd.f32 -1.4531521, %v1340_v7  ;;  %v1466_v16 = vmul.f32 %v8821_v34, %v1450_v44  ;;  %v1047_v11 = vmul.f32 1.0614054, %v8871_v62  ;;  %v1501_v4 = vmul.f32 %v1485_v12, %v8813_v13 }
 0x281   : > { %v1435_v43 = vmul.f32 %v8832_v26, %v1419_v55  ;;  %v1157_v17 = vadd.f32 0.2548296, %v1141_v45  ;;  %v1094_v48 = vadd.f32 1.4214138, %v1078_v60  ;;  %v3026_v10 = vsel %vm3012_vm11, %v3023_v8, %v8744_v20 }
 0x282   : > { %v1372_v42 = vmul.f32 %v8854_v22, %v1356_v14  ;;  %v8887_v3 = vpop.eup %6027  ;;  %v1251_v53 = vmul.f32 %v8824_v57, %v1171_v46  ;;  %v1545_v34 = vmul.f32 %v8836_v59, %v1465_v18  ;;  %v1063_v35 = vadd.f32 -1.4531521, %v1047_v11 }
 0x283   : > { %v1451_v50 = vadd.f32 0.2548296, %v1435_v43  ;;  %v1252_v7 = vmul.f32 %v6014_v40, %v1172_v30  ;;  %v1110_v44 = vmul.f32 %v8851_v28, %v1094_v48  ;;  %vm886_vm13 = vcmp.gt.f32.partialorder %v870_v47, 1e-16  ;;  %v8898_v40 = vpop.f32.mrf.mxu0 }
 0x284   : > { %v1388_v13 = vadd.f32 1.4214138, %v1372_v42  ;;  %v1546_v45 = vmul.f32 %v6016_v37, %v1466_v16  ;;  %v1173_v12 = vmul.f32 %v8827_v49, %v1157_v17  ;;  %v1079_v55 = vmul.f32 %v8871_v62, %v1063_v35 }
 0x285   : > { %v1341_v20 = vmul.f32 1.0614054, %v8887_v3  ;;  %v6030_v8 = vpop.eup %6029  ;;  %v1467_v60 = vmul.f32 %v8832_v26, %v1451_v50  ;;  %v1126_v57 = vadd.f32 -0.28449672, %v1110_v44  ;;  %vm903_vm12 = vcmp.lt.f32.partialorder %v870_v47, %v8531_v56 }
 0x286   : > { %v1404_v59 = vmul.f32 %v8854_v22, %v1388_v13  ;;  %v6032_v46 = vpop.eup %6031  ;;  %v1561_v18 = vsub.f32 %v1251_v53, %v1545_v34  ;;  %v1095_v30 = vadd.f32 1.4214138, %v1079_v55  ;;  %v1521_v14 = vmul.f32 1.442695, %v1501_v4  ;;  %vm8901_vm15 = vmand %vm886_vm13, %vm903_vm12  ;;  %v648_v13 = vpop.xlane.xlu1 %647 }
 0x287   : > { %v1357_v37 = vadd.f32 -1.4531521, %v1341_v20  ;;  %v1142_v16 = vmul.f32 %v8851_v28, %v1126_v57  ;;  %v8907_v43 = vmul.u32.u64.low %v8755_v15, %v3026_v10  ;;  %v8908_v11 = vmul.u32.u64.high %v8755_v15, %v3026_v10, %v8907_v43  ;;  %v816_v55 = vpop.f32.mrf.mxu0 }
 0x288   : > { %v1420_v26 = vadd.f32 -0.28449672, %v1404_v59  ;;  %v8910_v17 = vpop.eup %6033  ;;  %v1562_v48 = vsub.f32 %v1252_v7, %v1546_v45  ;;  %v1253_v42 = vmul.f32 %v6022_v21, %v1173_v12  ;;  %v1111_v53 = vmul.f32 %v8871_v62, %v1095_v30 }
 0x289   : > { %v1373_v4 = vmul.f32 %v8887_v3, %v1357_v37  ;;  %v1547_v34 = vmul.f32 %v6026_v63, %v1467_v60  ;;  %v1158_v50 = vadd.f32 0.2548296, %v1142_v16  ;;  %v8917_v44 = vsel %vm8901_vm15, %v870_v47, 1.0 }
 0x28a   : > { %v1436_v35 = vmul.f32 %v8854_v22, %v1420_v26  ;;  %v10147_v10 = vsub.s32 4294967266, %v8391_v38  ;;  %v1127_v57 = vadd.f32 -0.28449672, %v1111_v53  ;;  %6035 = vrsqrt.f32 %v8917_v44 }
 0x28b   : > { %v1389_v7 = vadd.f32 1.4214138, %v1373_v4  ;;  %v1174_v21 = vmul.f32 %v8851_v28, %v1158_v50  ;;  %v8925_v63 = vmul.u32.u64.low %v8755_v15, %v8861_v23  ;;  %v8926_v12 = vmul.u32.u64.high %v8755_v15, %v8861_v23, %v8925_v63 }
 0x28c   : > { %v3365_v20 = vadd.s32 127, %v10147_v10  ;;  %v1452_v45 = vadd.f32 0.2548296, %v1436_v35  ;;  %6037 = vpow2.f32 %v1521_v14  ;;  %v3018_v60 = vsel %vm3012_vm11, %v8738_v27, %v8806_v54  ;;  %v10154_v10 = vld [vmem:[#allocation33_spill] sm:$0xff] }
 0x28d   : > { %v1405_v47 = vmul.f32 %v8887_v3, %v1389_v7  ;;  %v817_v59 = vadd.f32 %v816_v55, %v648_v13  ;;  %v1577_v30 = vmul.f32 %v8682_v29, %v1561_v18  ;;  %v1578_v37 = vmul.f32 %v8690_v41, %v1562_v48 }
 0x28e   : > { %v1563_v28 = vsub.f32 %v1253_v42, %v1547_v34  ;;  %v1468_v16 = vmul.f32 %v8854_v22, %v1452_v45  ;;  %v1143_v26 = vmul.f32 %v8871_v62, %v1127_v57  ;;  %vm3036_vm3 = vc.u32 %v8908_v11, %v8925_v63  ;;  %v10155_v57 = vld [vmem:[#allocation44_spill] sm:$0xff] }
 0x28f   : > { %v1421_v23 = vadd.f32 -0.28449672, %v1405_v47  ;;  %v871_v14 = vadd.f32 %v817_v59, %v8519_v5  ;;  %v10148_v43 = vsub.s32 32, %v8391_v38  ;;  %v1254_v27 = vmul.f32 %v6030_v8, %v1174_v21 }
 0x290   : > { %v1548_v54 = vmul.f32 %v6032_v46, %v1468_v16  ;;  %v3037_v29 = vadd.s32 1, %v8926_v12  ;;  %v3366_v18 = vshll.u32 %v3365_v20, 23  ;;  %v3034_v41 = vmul.u32 %v8755_v15, %v3018_v60 }
 0x291   : > { %v3362_v1 = vshrl.u32 %v8382_v36, %v10148_v43  ;;  %vm887_vm8 = vcmp.gt.f32.partialorder %v871_v14, 1e-16  ;;  %vm904_vm4 = vcmp.lt.f32.partialorder %v871_v14, %v8531_v56  ;;  %v1593_v22 = vsel %vm8547_vm6, %v1577_v30, 0.0 }
 0x292   : > { %v1594_v48 = vsel %vm8566_vm2, %v1578_v37, 0.0  ;;  %v1579_v42 = vmul.f32 %v8728_v51, %v1563_v28  ;;  %v3038_v36 = vsel %vm3036_vm3, %v3037_v29, %v8926_v12  ;;  %vm8951_vm9 = vmand %vm887_vm8, %vm904_vm4  ;;  %v1159_v46 = vadd.f32 0.2548296, %v1143_v26  ;;  %v10151_v51 = vld [vmem:[#allocation54_spill] sm:$0xff]  ;;  %v10158_v29 = vld [vmem:[#allocation57_spill] sm:$0xff] }
 0x293   : > { %v1437_v15 = vmul.f32 %v8887_v3, %v1421_v23  ;;  %v3039_v53 = vadd.s32 %v3038_v36, %v3034_v41  ;;  %v936_v4 = vsel %vm8951_vm9, %v871_v14, 1.0  ;;  %v3269_v2 = vxor.u32 2147483648, %v8377_v33 }
 0x294   : > { %v3361_v25 = vshll.u32 %v8142_v39, %v8391_v38  ;;  %v1564_v34 = vsub.f32 %v1254_v27, %v1548_v54  ;;  %6039 = vrsqrt.f32 %v936_v4  ;;  %vm3117_vm6 = vcmp.lt.s32.totalorder %v10151_v51, 4  ;;  %v10157_v27 = vld [vmem:[#allocation39_spill] sm:$0xff] }
 0x295   : > { %v10152_v50 = vand.u32 2147483647, %v8224_v24  ;;  %v10153_v35 = vcvt.s32.f32 %v8220_v19  ;;  %v3040_v55 = vadd.s32 536870912, %v3039_v53  ;;  %v3082_v20 = vand.u32 2147483647, %v10154_v10 }
 0x296   : > { %vm9980_vm2 = vcmp.lt.s32.totalorder %v10155_v57, 0  ;;  %v8970_v7 = vor.u32 %v3362_v1, %v3361_v25  ;;  %v8972_v21 = vor.u32 4788187, %v3366_v18  ;;  %v1609_v39 = vadd.f32 %v1594_v48, %v1593_v22 }
 0x297   : > { %v8966_v13 = vmul.f32 %v10153_v35, %v10152_v50  ;;  %v1595_v38 = vsel %vm8583_vm5, %v1579_v42, 0.0  ;;  %v1175_v45 = vmul.f32 %v8871_v62, %v1159_v46  ;;  %v1453_v24 = vadd.f32 0.2548296, %v1437_v15  ;;  %v8977_v19 = vpop.eup %6035  ;;  %v10162_v42 = vld [vmem:[#allocation55_spill] sm:$0xff] }
 0x298   : > { %v3041_v12 = vshrl.u32 %v3040_v55, 30  ;;  %v8982_v47 = vsel %vm3117_vm6, %v8053_v52, 920167782  ;;  %v10156_v60 = vor.u32 %v8019_v6, %v7914_v58  ;;  %v8994_v61 = vsel %vm9980_vm2, %v3269_v2, %v8377_v33 }
 0x299   : > { %v1580_v62 = vmul.f32 %v8757_v31, %v1564_v34  ;;  %v967_v28 = vmul.f32 %v8977_v19, %v8917_v44  ;;  %v9002_v58 = vand.u32 8388607, %v3082_v20  ;;  %v6038_v6 = vpop.eup %6037  ;;  %v1610_v23 = vadd.f32 %v1609_v39, %v1595_v38 }
 0x29a   : > { %v8989_v59 = vsel %vm3117_vm6, %v10156_v60, 1326507024  ;;  %v3042_v37 = vshll.u32 %v3041_v12, 30  ;;  %v3035_v33 = vadd.s32 %v8925_v63, %v8908_v11  ;;  %v9008_v31 = vmul.f32 %v8910_v17, %v1175_v45 }
 0x29b   : > { %v1469_v14 = vmul.f32 %v8887_v3, %v1453_v24  ;;  %v984_v44 = vmul.f32 %v8660_v0, %v967_v28  ;;  %v1596_v1 = vsel %vm8613_vm10, %v1580_v62, 0.0  ;;  %vm2981_vm5 = vcmp.lt.s32.totalorder %v10135_v9, 0 }
 0x29c   : > { %v9011_v43 = vsub.s32 %v3039_v53, %v3042_v37  ;;  %v1278_v54 = vmul.f32 %v10157_v27, %v967_v28  ;;  %v10159_v18 = vmov 2475754826   ;;  %v10160_v11 = vmov 2131351028  }
 0x29d   : > { %v3100_v41 = vshrl.u32 %v10159_v18, %v10158_v29  ;;  %v3103_v17 = vshrl.u32 %v10160_v11, %v10158_v29  ;;  %v3090_v3 = vor.u32 8388608, %v9002_v58  ;;  %v10161_v22 = vmov 683565275  }
 0x29e   : > { %v3045_v63 = vsub.s32 0, %v9011_v43  ;;  %v3098_v48 = vshrl.u32 %v10161_v22, %v10158_v29  ;;  %v3099_v32 = vshll.u32 %v10161_v22, %v10162_v42  ;;  %v1000_v36 = vmul.f32 0.3275911, %v984_v44 }
 0x29f   : > { %v1294_v46 = vmul.f32 0.3275911, %v1278_v54  ;;  %v3102_v15 = vshll.u32 %v10159_v18, %v10162_v42  ;;  %v10163_v53 = vmov 2102212464   ;;  %v9032_v25 = vadd.f32 %v1610_v23, %v1596_v1 }
 0x2a0   : > { %v3106_v2 = vshrl.u32 %v10163_v53, %v10158_v29  ;;  %v1549_v34 = vmul.f32 %v6038_v6, %v1469_v14  ;;  %v5565_v50 = vmin.u32 %v3045_v63, %v9011_v43  ;;  %v3105_v35 = vshll.u32 %v10160_v11, %v10162_v42 }
 0x2a1   : > { %v1016_v55 = vadd.f32 1.0, %v1000_v36  ;;  %v1310_v39 = vadd.f32 1.0, %v1294_v46  ;;  %v3101_v38 = vor.u32 %v3100_v41, %v3099_v32  ;;  %v3104_v45 = vor.u32 %v3103_v17, %v3102_v15  ;;  %v9037_v24 = vpop.eup %6039  ;;  %v5728_v46 = vpop.f32.mrf.mxu1 }
 0x2a2   : > { %v3047_v60 = vclz %v5565_v50  ;;  %v3065_v62 = vsub.s32 4, %v3041_v12  ;;  %v1192_v37 = vsub.f32 0.0, %v984_v44  ;;  %vm3114_vm10 = vcmp.lt.s32.totalorder %v10151_v51, 1 }
 0x2a3   : > { %6041 = vrcp.f32 %v1016_v55  ;;  %v968_v28 = vmul.f32 %v9037_v24, %v936_v4  ;;  %v3107_v58 = vor.u32 %v3106_v2, %v3105_v35  ;;  %vm3115_vm0 = vcmp.lt.s32.totalorder %v10151_v51, 2 }
 0x2a4   : > { %v1565_v6 = vsub.f32 %v9008_v31, %v1549_v34  ;;  %v5566_v23 = vadd.s32 4294967294, %v3047_v60  ;;  %6043 = vrcp.f32 %v1310_v39  ;;  %vm3116_vm1 = vcmp.lt.s32.totalorder %v10151_v51, 3 }
 0x2a5   : > { %v10164_v14 = vand.u32 2147483647, %v10135_v9  ;;  %v1486_v29 = vsub.f32 0.0, %v1278_v54  ;;  %v9051_v18 = vmul.f32 %v8660_v0, %v968_v28  ;;  %v9054_v4 = vmul.f32 %v10157_v27, %v968_v28 }
 0x2a6   : > { %v3118_v31 = vsel %vm3114_vm10, %v3098_v48, %v3101_v38  ;;  %vm5567_vm13 = vcmp.lt.s32.totalorder %v5566_v23, 0  ;;  %v3066_v41 = vsel %vm2981_vm5, %v3065_v62, %v3041_v12  ;;  %v1208_v11 = vmul.f32 %v1192_v37, %v984_v44  ;;  %v650_v48 = vpop.xlane.xlu0 %649  ;;  %v826_v62 = vpop.f32.mrf.mxu1 }
 0x2a7   : > { %vm9046_vm11 = vcmp.le.f32.partialorder %v10164_v14, 0.7853982  ;;  %v3122_v17 = vsel %vm3114_vm10, %v3101_v38, %v3104_v45  ;;  %v3050_v63 = vsel %vm5567_vm13, 0, %v5566_v23  ;;  %v1001_v22 = vmul.f32 0.3275911, %v9051_v18 }
 0x2a8   : > { %v3126_v42 = vsel %vm3114_vm10, %v3104_v45, %v3107_v58  ;;  %v3128_v27 = vsel %vm3116_vm1, %v8053_v52, %v8989_v59  ;;  %v3051_v32 = vsub.s32 32, %v3050_v63  ;;  %v3055_v36 = vsub.s32 4294967266, %v3050_v63 }
 0x2a9   : > { %v1295_v12 = vmul.f32 0.3275911, %v9054_v4  ;;  %v3124_v44 = vsel %vm3116_vm1, %v3107_v58, %v8982_v47  ;;  %v3052_v15 = vshll.u32 %v9011_v43, %v3050_v63  ;;  %v1502_v53 = vmul.f32 %v1486_v29, %v1278_v54  ;;  %v652_v54 = vpop.xlane.xlu1 %651 }
 0x2aa   : > { %v1017_v2 = vadd.f32 1.0, %v1001_v22  ;;  %v3119_v34 = vsel %vm3117_vm6, %v3107_v58, 2102212464  ;;  %v3053_v50 = vshrl.u32 %v3035_v33, %v3051_v32  ;;  %v3056_v35 = vadd.s32 127, %v3055_v36  ;;  %v10167_v33 = vld [vmem:[#allocation24_spill] sm:$0xff]  ;;  %v654_v14 = vpop.xlane.xlu0 %653 }
 0x2ab   : > { %v1311_v52 = vadd.f32 1.0, %v1295_v12  ;;  %v3129_v59 = vsel %vm3115_vm0, %v3126_v42, %v3128_v27  ;;  %v1229_v55 = vmul.f32 1.442695, %v1208_v11  ;;  %v3125_v39 = vsel %vm3115_vm0, %v3122_v17, %v3124_v44  ;;  %v9100_v12 = vpop.f32.mrf.mxu1 }
 0x2ac   : > { %6045 = vrcp.f32 %v1017_v2  ;;  %v3130_v47 = vshll.u32 %v3090_v3, 8  ;;  %v3054_v38 = vor.u32 %v3053_v50, %v3052_v15  ;;  %v3057_v60 = vshll.u32 %v3056_v35, 23 }
 0x2ad   : > { %6047 = vrcp.f32 %v1311_v52  ;;  %v3120_v43 = vsel %vm3116_vm1, %v3104_v45, %v3119_v34  ;;  %v9083_v37 = vmul.f32 %v10167_v33, %v1565_v6  ;;  %v1523_v28 = vmul.f32 1.442695, %v1502_v53 }
 0x2ae   : > { %v9085_v58 = vmul.u32.u64.low %v3130_v47, %v3129_v59  ;;  %v9086_v23 = vmul.u32.u64.high %v3130_v47, %v3129_v59, %v9085_v58  ;;  %v3058_v29 = vor.u32 4788187, %v3057_v60  ;;  %v3068_v3 = vsel %vm9046_vm11, 0, %v3066_v41  ;;  %v656_v59 = vpop.xlane.xlu1 %655 }
 0x2af   : > { %v9090_v11 = vmul.u32.u64.low %v3130_v47, %v3125_v39  ;;  %v9091_v17 = vmul.u32.u64.high %v3130_v47, %v3125_v39, %v9090_v11  ;;  %6049 = vpow2.f32 %v1229_v55  ;;  %v3121_v45 = vsel %vm3115_vm0, %v3118_v31, %v3120_v43  ;;  %v836_v55 = vpop.f32.mrf.mxu1 }
 0x2b0   : > { %v822_v6 = vadd.f32 %v8898_v40, %v650_v48  ;;  %v827_v63 = vadd.f32 %v826_v62, %v652_v54  ;;  %v9097_v22 = vpop.eup %6041  ;;  %v3059_v42 = vand.u32 2147483647, %v3058_v29  ;;  %v3061_v27 = vcvt.s32.f32 %v3054_v38 }
 0x2b1   : > { %v1193_v32 = vsub.f32 0.0, %v9051_v18  ;;  %v832_v36 = vadd.f32 %v5728_v46, %v654_v14  ;;  %v9102_v41 = vpop.eup %6043  ;;  %v1048_v44 = vmul.f32 1.0614054, %v9097_v22  ;;  %6051 = vpow2.f32 %v1523_v28 }
 0x2b2   : > { %vm3139_vm12 = vc.u32 %v9086_v23, %v9090_v11  ;;  %v872_v40 = vadd.f32 %v822_v6, %v8519_v5  ;;  %v3062_v51 = vmul.f32 %v3061_v27, %v3059_v42  ;;  %v1342_v31 = vmul.f32 1.0614054, %v9102_v41 }
 0x2b3   : > { %v3140_v48 = vadd.s32 1, %v9091_v17  ;;  %v873_v15 = vadd.f32 %v827_v63, %v8519_v5  ;;  %v1064_v46 = vadd.f32 -1.4531521, %v1048_v44  ;;  %v3137_v53 = vmul.u32 %v3130_v47, %v3121_v45 }
 0x2b4   : > { %vm888_vm3 = vcmp.gt.f32.partialorder %v872_v40, 1e-16  ;;  %vm905_vm8 = vcmp.lt.f32.partialorder %v872_v40, %v8531_v56  ;;  %v3063_v2 = vxor.u32 2147483648, %v3062_v51  ;;  %v1358_v34 = vadd.f32 -1.4531521, %v1342_v31 }
 0x2b5   : > { %v3141_v50 = vsel %vm3139_vm12, %v3140_v48, %v9091_v17  ;;  %vm9113_vm4 = vmand %vm888_vm3, %vm905_vm8  ;;  %v874_v52 = vadd.f32 %v832_v36, %v8519_v5  ;;  %v1080_v39 = vmul.f32 %v9097_v22, %v1064_v46  ;;  %vm889_vm6 = vcmp.gt.f32.partialorder %v873_v15, 1e-16 }
 0x2b6   : > { %v3142_v38 = vadd.s32 %v3141_v50, %v3137_v53  ;;  %v9121_v47 = vsel %vm9113_vm4, %v872_v40, 1.0  ;;  %v3064_v60 = vsel %vm2981_vm5, %v3063_v2, %v3062_v51  ;;  %v1374_v43 = vmul.f32 %v9102_v41, %v1358_v34 }
 0x2b7   : > { %6053 = vrsqrt.f32 %v9121_v47  ;;  %vm906_vm10 = vcmp.lt.f32.partialorder %v873_v15, %v8531_v56  ;;  %v3067_v54 = vsel %vm9046_vm11, %v10135_v9, %v3064_v60  ;;  %v1096_v62 = vadd.f32 1.4214138, %v1080_v39 }
 0x2b8   : > { %v3143_v33 = vadd.s32 536870912, %v3142_v38  ;;  %v837_v28 = vadd.f32 %v836_v55, %v656_v59  ;;  %6055 = vcosq.f32 %v3067_v54  ;;  %v1390_v14 = vadd.f32 1.4214138, %v1374_v43  ;;  %vm9143_vm1 = vmand %vm889_vm6, %vm906_vm10 }
 0x2b9   : > { %v9131_v58 = vpop.eup %6045  ;;  %vm890_vm0 = vcmp.gt.f32.partialorder %v874_v52, 1e-16  ;;  %vm907_vm5 = vcmp.lt.f32.partialorder %v874_v52, %v8531_v56  ;;  %6057 = vsinq.f32 %v3067_v54  ;;  %v1112_v17 = vmul.f32 %v9097_v22, %v1096_v62 }
 0x2ba   : > { %v9134_v29 = vpop.eup %6047  ;;  %v1049_v45 = vmul.f32 1.0614054, %v9131_v58  ;;  %v9138_v6 = vshrl.u32 %v3143_v33, 30  ;;  %v1597_v42 = vsel %vm8621_vm7, %v9083_v37, 0.0  ;;  %v4694_v27 = vadd.s32 3, %v3068_v3  ;;  %vm9158_vm11 = vmand %vm890_vm0, %vm907_vm5 }
 0x2bb   : > { %v1406_v36 = vmul.f32 %v9102_v41, %v1390_v14  ;;  %v1343_v44 = vmul.f32 1.0614054, %v9134_v29  ;;  %v9152_v40 = vand.u32 3, %v3068_v3  ;;  %v1128_v51 = vadd.f32 -0.28449672, %v1112_v17 }
 0x2bc   : > { %v1065_v31 = vadd.f32 -1.4531521, %v1049_v45  ;;  %v3145_v48 = vshll.u32 %v9138_v6, 30  ;;  %v6050_v53 = vpop.eup %6049  ;;  %v9164_v34 = vsel %vm9143_vm1, %v873_v15, 1.0  ;;  %v875_v3 = vadd.f32 %v837_v28, %v8519_v5 }
 0x2bd   : > { %v1422_v37 = vadd.f32 -0.28449672, %v1406_v36  ;;  %v1359_v2 = vadd.f32 -1.4531521, %v1343_v44  ;;  %v1144_v50 = vmul.f32 %v9097_v22, %v1128_v51  ;;  %v1209_v55 = vmul.f32 %v1193_v32, %v9051_v18 }
 0x2be   : > { %v1081_v59 = vmul.f32 %v9131_v58, %v1065_v31  ;;  %vm3084_vm7 = vcmp.lt.s32.totalorder %v10154_v10, 0  ;;  %v9173_v39 = vsub.s32 %v3142_v38, %v3145_v48  ;;  %v6052_v60 = vpop.eup %6051  ;;  %v4695_v43 = vand.u32 3, %v4694_v27 }
 0x2bf   : > { %v1438_v54 = vmul.f32 %v9102_v41, %v1422_v37  ;;  %v1487_v15 = vsub.f32 0.0, %v9054_v4  ;;  %v9179_v62 = vsel %vm9158_vm11, %v874_v52, 1.0  ;;  %v1160_v33 = vadd.f32 0.2548296, %v1144_v50 }
 0x2c0   : > { %v1375_v28 = vmul.f32 %v9134_v29, %v1359_v2  ;;  %v3148_v14 = vsub.s32 0, %v9173_v39  ;;  %6059 = vrsqrt.f32 %v9164_v34  ;;  %v1097_v32 = vadd.f32 1.4214138, %v1081_v59 }
 0x2c1   : > { %v1454_v18 = vadd.f32 0.2548296, %v1438_v54  ;;  %vm891_vm13 = vcmp.gt.f32.partialorder %v875_v3, 1e-16  ;;  %vm908_vm12 = vcmp.lt.f32.partialorder %v875_v3, %v8531_v56  ;;  %v9186_v38 = vadd.f32 %v9032_v25, %v1597_v42 }
 0x2c2   : > { %v1231_v17 = vmul.f32 1.442695, %v1209_v55  ;;  %vm9190_vm3 = vcmp.le.f32.partialorder %v3082_v20, 0.7853982  ;;  %v5569_v45 = vmin.u32 %v3148_v14, %v9173_v39  ;;  %6061 = vrsqrt.f32 %v9179_v62  ;;  %vm9208_vm5 = vmand %vm891_vm13, %vm908_vm12 }
 0x2c3   : > { %vm3073_vm6 = vcmp.lt.s32.totalorder %v9152_v40, 2  ;;  %vm3074_vm10 = vcmp.eq.s32.totalorder %v9152_v40, 0  ;;  %v1503_v25 = vmul.f32 %v1487_v15, %v9054_v4  ;;  %v3168_v63 = vsub.s32 4, %v9138_v6 }
 0x2c4   : > { %v9201_v42 = vpop.eup %6053  ;;  %vm3077_vm0 = vcmp.eq.s32.totalorder %v9152_v40, 2  ;;  %v1176_v20 = vmul.f32 %v9097_v22, %v1160_v33  ;;  %v1391_v27 = vadd.f32 1.4214138, %v1375_v28  ;;  %v3150_v36 = vclz %v5569_v45 }
 0x2c5   : > { %vm4696_vm2 = vcmp.lt.s32.totalorder %v4695_v43, 2  ;;  %vm4697_vm14 = vcmp.eq.s32.totalorder %v4695_v43, 0  ;;  %v1470_v4 = vmul.f32 %v9102_v41, %v1454_v18  ;;  %v1113_v51 = vmul.f32 %v9131_v58, %v1097_v32  ;;  %v6056_v31 = vpop.eup %6055 }
 0x2c6   : > { %vm4700_vm8 = vcmp.eq.s32.totalorder %v4695_v43, 2  ;;  %6063 = vpow2.f32 %v1231_v17  ;;  %v5570_v48 = vadd.s32 4294967294, %v3150_v36  ;;  %v969_v22 = vmul.f32 %v9201_v42, %v9121_v47  ;;  %v6058_v37 = vpop.eup %6057 }
 0x2c7   : > { %v3078_v2 = vxor.u32 2147483648, %v6056_v31  ;;  %v1525_v50 = vmul.f32 1.442695, %v1503_v25  ;;  %v3169_v59 = vsel %vm3084_vm7, %v3168_v63, %v9138_v6  ;;  %v9221_v55 = vsel %vm9208_vm5, %v875_v3, 1.0 }
 0x2c8   : > { %v3075_v41 = vxor.u32 2147483648, %v6058_v37  ;;  %v1256_v54 = vmul.f32 %v6050_v53, %v1176_v20  ;;  %v1407_v15 = vmul.f32 %v9134_v29, %v1391_v27  ;;  %vm5571_vm13 = vcmp.lt.s32.totalorder %v5570_v48, 0  ;;  %v9245_v27 = vld [vmem:[%s7557_s27] ss:$0 sm:$0xff] }
 0x2c9   : > { %v4702_v33 = vsel %vm4700_vm8, %v3078_v2, %v6058_v37  ;;  %v3079_v47 = vsel %vm3077_vm0, %v3078_v2, %v6058_v37  ;;  %v1550_v28 = vmul.f32 %v6052_v60, %v1470_v4  ;;  %v1129_v14 = vadd.f32 -0.28449672, %v1113_v51  ;;  %10181 = vst [vmem:[#allocation38_spill] sm:$0xff] %v9245_v27 }
 0x2ca   : > { %v4699_v18 = vsel %vm4697_vm14, %v6056_v31, %v3075_v41  ;;  %v3076_v6 = vsel %vm3074_vm10, %v6056_v31, %v3075_v41  ;;  %v3153_v32 = vsel %vm5571_vm13, 0, %v5570_v48  ;;  %v986_v3 = vmul.f32 %v8660_v0, %v969_v22 }
 0x2cb   : > { %v4703_v53 = vsel %vm4696_vm2, %v4699_v18, %v4702_v33  ;;  %v3080_v17 = vsel %vm3073_vm6, %v3076_v6, %v3079_v47  ;;  %v3138_v45 = vadd.s32 %v9090_v11, %v9086_v23  ;;  %v3171_v60 = vsel %vm9190_vm3, 0, %v3169_v59 }
 0x2cc   : > { %vm10179_vm12 = vweird.f32 %v10135_v9  ;;  %v1423_v20 = vadd.f32 -0.28449672, %v1407_v15  ;;  %6065 = vrsqrt.f32 %v9221_v55  ;;  %v1145_v11 = vmul.f32 %v9131_v58, %v1129_v14  ;;  %v9256_v14 = vld [vmem:[%s8657_s12] ss:$0 sm:$0xff]  ;;  %s538_s12 = scalar_lea.vmem [#allocation7], %s6490_s25 }
 0x2cd   : > { %v4704_v25 = vsel %vm10179_vm12, nan, %v4703_v53  ;;  %vm10180_vm14 = vmmov %vm10179_vm12  ;;  %v9242_v43 = vpop.eup %6059  ;;  %v3154_v36 = vsub.s32 32, %v3153_v32  ;;  %v1566_v4 = vsub.f32 %v1256_v54, %v1550_v28  ;;  %v3158_v51 = vsub.s32 4294967266, %v3153_v32  ;;  %s5320_s29 = sshll.u32 %s538_s12, 4  ;;  %s5321_s29 = int_to_ptr.vmem [resolvable:$true] %s5320_s29 }
 0x2ce   : > { %v3081_v63 = vsel %vm10180_vm14, nan, %v3080_v17  ;;  %v5131_v40 = vmul.f32 %v9245_v27, %v4704_v25  ;;  %v1002_v31 = vmul.f32 0.3275911, %v986_v3  ;;  %v1194_v9 = vsub.f32 0.0, %v986_v3  ;;  %s6214_s28 = scalar_lea.vmem %s5321_s29, 16  ;;  %p6221_p10 = scmp.lt.s32.totalorder %s5321_s29, %s6219_s16 }
 0x2cf   : > { %v3510_v23 = vmul.f32 %v9245_v27, %v3081_v63  ;;  %v9250_v48 = vpop.eup %6061  ;;  %vm10182_vm2 = vcmask 64512   ;;  %v3155_v59 = vshll.u32 %v9173_v39, %v3153_v32  ;;  %v3156_v41 = vshrl.u32 %v3138_v45, %v3154_v36  ;;  %p6215_p7 = scmp.ne.s32.totalorder %s5321_s29, %s6214_s28 }
 0x2d0   : > { %v5166_v37 = vsel %vm10182_vm2, %v5131_v40, 0.0  ;;  %vm10183_vm8 = vmmov %vm10182_vm2  ;;  %v3159_v15 = vadd.s32 127, %v3158_v51  ;;  %v1018_v33 = vadd.f32 1.0, %v1002_v31  ;;  %v1210_v47 = vmul.f32 %v1194_v9, %v986_v3  ;;  %v658_v9 = vpop.xlane.xlu0 %657 }
 0x2d1   : > { %v3546_v2 = vsel %vm10183_vm8, %v3510_v23, 0.0  ;;  %5167 = vadd.xlane.f32.xlu0 %v5166_v37  ;;  %v1280_v54 = vmul.f32 %v9256_v14, %v969_v22  ;;  %6067 = vpow2.f32 %v1525_v50  ;;  %v3157_v28 = vor.u32 %v3156_v41, %v3155_v59  ;;  %p6216_p2 = pnand %p6215_p7, %p10235_p12 }
 0x2d2   : > { %3547 = vadd.xlane.f32.xlu1 %v3546_v2  ;;  %v4798_v18 = vadd.s32 3, %v3171_v60  ;;  %v970_v6 = vmul.f32 %v9242_v43, %v9164_v34  ;;  %v3160_v53 = vshll.u32 %v3159_v15, 23  ;;  %6069 = vrcp.f32 %v1018_v33 }
 0x2d3   : > { %v1296_v17 = vmul.f32 0.3275911, %v1280_v54  ;;  %v971_v39 = vmul.f32 %v9250_v48, %v9179_v62  ;;  %v6064_v32 = vpop.eup %6063  ;;  %v1161_v45 = vadd.f32 0.2548296, %v1145_v11  ;;  %v1439_v3 = vmul.f32 %v9134_v29, %v1423_v20  ;;  %p6217_p1 = pneg %p6216_p2 }
 0x2d4   : > { %v1488_v25 = vsub.f32 0.0, %v1280_v54  ;;  %v987_v63 = vmul.f32 %v8660_v0, %v970_v6  ;;  %v9266_v22 = vmul.f32 %v8977_v19, %v1566_v4  ;;  %v3161_v50 = vor.u32 4788187, %v3160_v53 }
 0x2d5   : > { %v1233_v40 = vmul.f32 1.442695, %v1210_v47  ;;  %v1312_v23 = vadd.f32 1.0, %v1296_v17  ;;  %v1281_v31 = vmul.f32 %v9256_v14, %v970_v6  ;;  %v3164_v37 = vcvt.s32.f32 %v3157_v28 }
 0x2d6   : > { %v1504_v34 = vmul.f32 %v1488_v25, %v1280_v54  ;;  %v1003_v36 = vmul.f32 0.3275911, %v987_v63  ;;  %v1195_v51 = vsub.f32 0.0, %v987_v63  ;;  %v3162_v62 = vand.u32 2147483647, %v3161_v50  ;;  %v5734_v50 = vpop.f32.mrf.mxu1 }
 0x2d7   : > { %6071 = vrcp.f32 %v1312_v23  ;;  %v988_v20 = vmul.f32 %v8660_v0, %v971_v39  ;;  %v1297_v59 = vmul.f32 0.3275911, %v1281_v31  ;;  %v9271_v19 = vmul.f32 %v9256_v14, %v971_v39 }
 0x2d8   : > { %v1527_v11 = vmul.f32 1.442695, %v1504_v34  ;;  %v1019_v2 = vadd.f32 1.0, %v1003_v36  ;;  %v3165_v4 = vmul.f32 %v3164_v37, %v3162_v62  ;;  %v9273_v41 = vand.u32 3, %v3171_v60  ;;  %v846_v62 = vpop.f32.mrf.mxu1 }
 0x2d9   : > { %v1004_v15 = vmul.f32 0.3275911, %v988_v20  ;;  %v842_v33 = vadd.f32 %v9100_v12, %v658_v9  ;;  %v9276_v47 = vpop.eup %6065  ;;  %v9278_v54 = vand.u32 3, %v4798_v18  ;;  %6073 = vpow2.f32 %v1233_v40  ;;  %v660_v9 = vpop.xlane.xlu1 %659 }
 0x2da   : > { %v1211_v28 = vmul.f32 %v1195_v51, %v987_v63  ;;  %v1313_v6 = vadd.f32 1.0, %v1297_v59  ;;  %v1455_v53 = vadd.f32 0.2548296, %v1439_v3  ;;  %v3166_v17 = vxor.u32 2147483648, %v3165_v4 }
 0x2db   : > { %6075 = vrcp.f32 %v1019_v2  ;;  %v1020_v25 = vadd.f32 1.0, %v1004_v15  ;;  %v1177_v39 = vmul.f32 %v9131_v58, %v1161_v45  ;;  %v1298_v12 = vmul.f32 0.3275911, %v9271_v19 }
 0x2dc   : > { %6077 = vpow2.f32 %v1527_v11  ;;  %v3167_v18 = vsel %vm3084_vm7, %v3166_v17, %v3165_v4  ;;  %v1489_v63 = vsub.f32 0.0, %v1281_v31  ;;  %v972_v3 = vmul.f32 %v9276_v47, %v9221_v55 }
 0x2dd   : > { %6079 = vrcp.f32 %v1313_v6  ;;  %v3170_v40 = vsel %vm9190_vm3, %v10154_v10, %v3167_v18  ;;  %v1235_v23 = vmul.f32 1.442695, %v1211_v28  ;;  %v1196_v34 = vsub.f32 0.0, %v988_v20  ;;  %v662_v28 = vpop.xlane.xlu0 %661 }
 0x2de   : > { %6081 = vrcp.f32 %v1020_v25  ;;  %v6068_v36 = vpop.eup %6067  ;;  %v989_v58 = vmul.f32 %v8660_v0, %v972_v3  ;;  %v9294_v45 = vmul.f32 %v9256_v14, %v972_v3  ;;  %v876_v51 = vadd.f32 %v842_v33, %v8519_v5 }
 0x2df   : > { %6083 = vcosq.f32 %v3170_v40  ;;  %v9297_v37 = vpop.eup %6069  ;;  %v9299_v55 = vmul.f32 %v6064_v32, %v1177_v39  ;;  %v1471_v52 = vmul.f32 %v9134_v29, %v1455_v53  ;;  %v1314_v11 = vadd.f32 1.0, %v1298_v12 }
 0x2e0   : > { %6085 = vsinq.f32 %v3170_v40  ;;  %v1050_v2 = vmul.f32 1.0614054, %v9297_v37  ;;  %v1505_v59 = vmul.f32 %v1489_v63, %v1281_v31  ;;  %v1490_v4 = vsub.f32 0.0, %v9271_v19 }
 0x2e1   : > { %v1005_v15 = vmul.f32 0.3275911, %v989_v58  ;;  %v1197_v6 = vsub.f32 0.0, %v989_v58  ;;  %v1299_v33 = vmul.f32 0.3275911, %v9294_v45  ;;  %v847_v17 = vadd.f32 %v846_v62, %v660_v9 }
 0x2e2   : > { %vm892_vm7 = vcmp.gt.f32.partialorder %v876_v51, 1e-16  ;;  %v1066_v25 = vadd.f32 -1.4531521, %v1050_v2  ;;  %6087 = vpow2.f32 %v1235_v23  ;;  %v1212_v32 = vmul.f32 %v1196_v34, %v988_v20 }
 0x2e3   : > { %v1021_v39 = vadd.f32 1.0, %v1005_v15  ;;  %6089 = vrcp.f32 %v1314_v11  ;;  %v1315_v29 = vadd.f32 1.0, %v1299_v33  ;;  %vm909_vm3 = vcmp.lt.f32.partialorder %v876_v51, %v8531_v56 }
 0x2e4   : > { %v9305_v18 = vpop.eup %6071  ;;  %v852_v31 = vadd.f32 %v5734_v50, %v662_v28  ;;  %v1082_v53 = vmul.f32 %v9297_v37, %v1066_v25  ;;  %v1529_v63 = vmul.f32 1.442695, %v1505_v59  ;;  %vm9311_vm6 = vmand %vm892_vm7, %vm909_vm3  ;;  %v10184_v3 = vmov 0 }
 0x2e5   : > { %v1344_v12 = vmul.f32 1.0614054, %v9305_v18  ;;  %6091 = vrcp.f32 %v1021_v39  ;;  %v10185_v3 = vsel %vm9311_vm6, 4294967295, %v10184_v3  ;;  %vm4804_vm10 = vcmp.eq.s32.totalorder %v9278_v54, 2 }
 0x2e6   : > { %10186 = vst [vmem:[#allocation43_spill] sm:$0xff] %v10185_v3  ;;  %vm3180_vm0 = vcmp.eq.s32.totalorder %v9273_v41, 2  ;;  %v1506_v20 = vmul.f32 %v1490_v4, %v9271_v19  ;;  %v1213_v40 = vmul.f32 %v1197_v6, %v989_v58  ;;  %v9320_v50 = vsel %vm9311_vm6, %v876_v51, 1.0  ;;  %v9323_v34 = vpop.eup %6073 }
 0x2e7   : > { %v877_v23 = vadd.f32 %v847_v17, %v8519_v5  ;;  %vm4801_vm13 = vcmp.eq.s32.totalorder %v9278_v54, 0  ;;  %vm3177_vm12 = vcmp.eq.s32.totalorder %v9273_v41, 0  ;;  %v1098_v9 = vadd.f32 1.4214138, %v1082_v53 }
 0x2e8   : > { %v1360_v62 = vadd.f32 -1.4531521, %v1344_v12  ;;  %v1237_v11 = vmul.f32 1.442695, %v1212_v32  ;;  %6093 = vrcp.f32 %v1315_v29  ;;  %v9327_v2 = vpop.eup %6075  ;;  %vm4800_vm14 = vcmp.lt.s32.totalorder %v9278_v54, 2 }
 0x2e9   : > { %v1491_v19 = vsub.f32 0.0, %v9294_v45  ;;  %vm893_vm8 = vcmp.gt.f32.partialorder %v877_v23, 1e-16  ;;  %vm910_vm7 = vcmp.lt.f32.partialorder %v877_v23, %v8531_v56  ;;  %v878_v58 = vadd.f32 %v852_v31, %v8519_v5  ;;  %v9334_v51 = vpop.eup %6077 }
 0x2ea   : > { %v1114_v59 = vmul.f32 %v9297_v37, %v1098_v9  ;;  %v1376_v4 = vmul.f32 %v9305_v18, %v1360_v62  ;;  %v1051_v15 = vmul.f32 1.0614054, %v9327_v2  ;;  %6095 = vrsqrt.f32 %v9320_v50  ;;  %v9341_v28 = vpop.eup %6079  ;;  %vm9354_vm3 = vmand %vm893_vm8, %vm910_vm7 }
 0x2eb   : > { %v9343_v6 = vmul.f32 %v6068_v36, %v1471_v52  ;;  %6097 = vpow2.f32 %v1529_v63  ;;  %v9345_v33 = vmul.f32 1.442695, %v1506_v20  ;;  %v9347_v17 = vmul.f32 1.442695, %v1213_v40  ;;  %v9349_v25 = vpop.eup %6081 }
 0x2ec   : > { %v1130_v32 = vadd.f32 -0.28449672, %v1114_v59  ;;  %v1392_v39 = vadd.f32 1.4214138, %v1376_v4  ;;  %v1067_v29 = vadd.f32 -1.4531521, %v1051_v15  ;;  %6099 = vpow2.f32 %v1237_v11  ;;  %v6084_v36 = vpop.eup %6083 }
 0x2ed   : > { %v10187_v31 = vmov 0  ;;  %v1345_v52 = vmul.f32 1.0614054, %v9341_v28  ;;  %v1052_v53 = vmul.f32 1.0614054, %v9349_v25  ;;  %v9361_v12 = vmul.f32 %v1491_v19, %v9294_v45  ;;  %v6086_v63 = vpop.eup %6085 }
 0x2ee   : > { %v10188_v31 = vsel %vm9354_vm3, 4294967295, %v10187_v31  ;;  %vm894_vm2 = vcmp.gt.f32.partialorder %v878_v58, 1e-16  ;;  %v3181_v20 = vxor.u32 2147483648, %v6084_v36  ;;  %v1408_v40 = vmul.f32 %v9305_v18, %v1392_v39 }
 0x2ef   : > { %10189 = vst [vmem:[#allocation41_spill] sm:$0xff] %v10188_v31  ;;  %v1083_v9 = vmul.f32 %v9327_v2, %v1067_v29  ;;  %vm911_vm8 = vcmp.lt.f32.partialorder %v878_v58, %v8531_v56  ;;  %v3178_v62 = vxor.u32 2147483648, %v6086_v63  ;;  %v1146_v11 = vmul.f32 %v9297_v37, %v1130_v32  ;;  %v9375_v60 = vpop.eup %6087 }
 0x2f0   : > { %v1361_v59 = vadd.f32 -1.4531521, %v1345_v52  ;;  %v9369_v4 = vsel %vm9354_vm3, %v877_v23, 1.0  ;;  %v4806_v45 = vsel %vm4804_vm10, %v3181_v20, %v6086_v63  ;;  %v3182_v19 = vsel %vm3180_vm0, %v3181_v20, %v6086_v63  ;;  %vm9383_vm7 = vmand %vm894_vm2, %vm911_vm8  ;;  %v9387_v16 = vpop.eup %6089 }
 0x2f1   : > { %v1424_v15 = vadd.f32 -0.28449672, %v1408_v40  ;;  %v1068_v39 = vadd.f32 -1.4531521, %v1052_v53  ;;  %v4803_v29 = vsel %vm4801_vm13, %v6084_v36, %v3178_v62  ;;  %v3179_v32 = vsel %vm3177_vm12, %v6084_v36, %v3178_v62 }
 0x2f2   : > { %v1099_v52 = vadd.f32 1.4214138, %v1083_v9  ;;  %v1377_v23 = vmul.f32 %v9341_v28, %v1361_v59  ;;  %v10190_v26 = vmov 0  ;;  %v4807_v53 = vsel %vm4800_vm14, %v4803_v29, %v4806_v45  ;;  %v9395_v36 = vpop.eup %6091 }
 0x2f3   : > { %v10191_v26 = vsel %vm9383_vm7, 4294967295, %v10190_v26  ;;  %vm10193_vm10 = vcmp.lt.s32.totalorder %v9273_v41, 2  ;;  %v1440_v20 = vmul.f32 %v9305_v18, %v1424_v15  ;;  %6101 = vrsqrt.f32 %v9369_v4 }
 0x2f4   : > { %10192 = vst [vmem:[#allocation16_spill] sm:$0xff] %v10191_v26  ;;  %v3183_v63 = vsel %vm10193_vm10, %v3179_v32, %v3182_v19  ;;  %vm10194_vm0 = vweird.f32 %v10154_v10  ;;  %v1115_v62 = vmul.f32 %v9327_v2, %v1099_v52  ;;  %v1393_v59 = vadd.f32 1.4214138, %v1377_v23 }
 0x2f5   : > { %v4808_v40 = vsel %vm10194_vm0, nan, %v4807_v53  ;;  %vm10195_vm13 = vmmov %vm10194_vm0  ;;  %v1162_v45 = vadd.f32 0.2548296, %v1146_v11  ;;  %v9406_v19 = vsel %vm9383_vm7, %v878_v58, 1.0  ;;  %v9408_v15 = vpop.eup %6093  ;;  %v1084_v10 = vmul.f32 %v9349_v25, %v1068_v39 }
 0x2f6   : > { %v3184_v9 = vsel %vm10195_vm13, nan, %v3183_v63  ;;  %v5132_v54 = vmul.f32 %v9245_v27, %v4808_v40  ;;  %v1131_v29 = vadd.f32 -0.28449672, %v1115_v62  ;;  %v1409_v32 = vmul.f32 %v9341_v28, %v1393_v59 }
 0x2f7   : > { %v3511_v41 = vmul.f32 %v9245_v27, %v3184_v9  ;;  %v1346_v53 = vmul.f32 1.0614054, %v9387_v16  ;;  %vm10196_vm12 = vcmask 64512   ;;  %v1456_v63 = vadd.f32 0.2548296, %v1440_v20  ;;  %v9416_v40 = vpop.eup %6095 }
 0x2f8   : > { %v5169_v52 = vsel %vm10196_vm12, %v5132_v54, 0.0  ;;  %vm10197_vm14 = vmmov %vm10196_vm12  ;;  %v1053_v11 = vmul.f32 1.0614054, %v9395_v36  ;;  %10198 = vst [vmem:[#allocation21_spill] sm:$0xff] %v9416_v40  ;;  %v1147_v58 = vmul.f32 %v9327_v2, %v1131_v29  ;;  %v1425_v9 = vadd.f32 -0.28449672, %v1409_v32  ;;  %v6098_v30 = vpop.eup %6097 }
 0x2f9   : > { %v3549_v23 = vsel %vm10197_vm14, %v3511_v41, 0.0  ;;  %5170 = vadd.xlane.f32.xlu0 %v5169_v52  ;;  %v1100_v62 = vadd.f32 1.4214138, %v1084_v10  ;;  %v1362_v59 = vadd.f32 -1.4531521, %v1346_v53  ;;  %v973_v54 = vmul.f32 %v9416_v40, %v9320_v50  ;;  %v9423_v20 = vpop.eup %6099  ;;  %v10199_v10 = vld [vmem:[#allocation49_spill] sm:$0xff] }
 0x2fa   : > { %3550 = vadd.xlane.f32.xlu1 %v3549_v23  ;;  %v1069_v39 = vadd.f32 -1.4531521, %v1053_v11  ;;  %v1347_v26 = vmul.f32 1.0614054, %v9408_v15  ;;  %6103 = vrsqrt.f32 %v9406_v19  ;;  %v1178_v41 = vmul.f32 %v9297_v37, %v1162_v45  ;;  %v9436_v37 = vpop.f32.mrf.mxu1 }
 0x2fb   : > { %v1441_v52 = vmul.f32 %v9341_v28, %v1425_v9  ;;  %v1116_v29 = vmul.f32 %v9349_v25, %v1100_v62  ;;  %v1378_v32 = vmul.f32 %v9387_v16, %v1362_v59  ;;  %vm3393_vm2 = vcmp.lt.s32.totalorder %v10199_v10, 0 }
 0x2fc   : > { %v1472_v53 = vmul.f32 %v9305_v18, %v1456_v63  ;;  %v1085_v23 = vmul.f32 %v9395_v36, %v1069_v39  ;;  %v1363_v11 = vadd.f32 -1.4531521, %v1347_v26  ;;  %v9433_v50 = vmul.f32 %v8660_v0, %v973_v54 }
 0x2fd   : > { %v1163_v31 = vadd.f32 0.2548296, %v1147_v58  ;;  %v1132_v3 = vadd.f32 -0.28449672, %v1116_v29  ;;  %v1394_v27 = vadd.f32 1.4214138, %v1378_v32  ;;  %6105 = vpow2.f32 %v9345_v33 }
 0x2fe   : > { %v1457_v45 = vadd.f32 0.2548296, %v1441_v52  ;;  %v1101_v9 = vadd.f32 1.4214138, %v1085_v23  ;;  %v1379_v62 = vmul.f32 %v9408_v15, %v1363_v11  ;;  %v1006_v59 = vmul.f32 0.3275911, %v9433_v50 }
 0x2ff   : > { %v1567_v18 = vsub.f32 %v9299_v55, %v9343_v6  ;;  %v1258_v26 = vmul.f32 %v9323_v34, %v1178_v41  ;;  %v1410_v63 = vmul.f32 %v9387_v16, %v1394_v27  ;;  %v1533_v58 = vmul.f32 1.442695, %v9361_v12  ;;  %v664_v55 = vpop.xlane.xlu1 %663  ;;  %v856_v34 = vpop.f32.mrf.mxu1 }
 0x300   : > { %v1552_v39 = vmul.f32 %v9334_v51, %v1472_v53  ;;  %v1117_v33 = vmul.f32 %v9395_v36, %v1101_v9  ;;  %v1395_v29 = vadd.f32 1.4214138, %v1379_v62  ;;  %v1022_v52 = vadd.f32 1.0, %v1006_v59  ;;  %v9447_v32 = vpop.eup %6101 }
 0x301   : > { %v1179_v23 = vmul.f32 %v9327_v2, %v1163_v31  ;;  %v1148_v11 = vmul.f32 %v9349_v25, %v1132_v3  ;;  %v1426_v40 = vadd.f32 -0.28449672, %v1410_v63  ;;  %6107 = vpow2.f32 %v9347_v17 }
 0x302   : > { %v1473_v27 = vmul.f32 %v9341_v28, %v1457_v45  ;;  %v1133_v6 = vadd.f32 -0.28449672, %v1117_v33  ;;  %v1411_v51 = vmul.f32 %v9408_v15, %v1395_v29  ;;  %6109 = vrcp.f32 %v1022_v52 }
 0x303   : > { %v1583_v12 = vmul.f32 %v9037_v24, %v1567_v18  ;;  %v1442_v41 = vmul.f32 %v9387_v16, %v1426_v40  ;;  %6111 = vpow2.f32 %v1533_v58  ;;  %v1284_v2 = vmul.f32 %v9256_v14, %v973_v54 }
 0x304   : > { %v1568_v31 = vsub.f32 %v1258_v26, %v1552_v39  ;;  %v1427_v3 = vadd.f32 -0.28449672, %v1411_v51  ;;  %v974_v17 = vmul.f32 %v9447_v32, %v9369_v4  ;;  %v857_v53 = vadd.f32 %v856_v34, %v664_v55 }
 0x305   : > { %v10200_v28 = vxor.u32 2147483648, %v8966_v13  ;;  %v1164_v9 = vadd.f32 0.2548296, %v1148_v11  ;;  %v1458_v24 = vadd.f32 0.2548296, %v1442_v41  ;;  %v10202_v54 = vcvt.s32.f32 %v8970_v7 }
 0x306   : > { %v1300_v62 = vmul.f32 0.3275911, %v1284_v2  ;;  %v10201_v40 = vand.u32 2147483647, %v8972_v21  ;;  %v1259_v18 = vmul.f32 %v9375_v60, %v1179_v23  ;;  %v1553_v4 = vmul.f32 %v6098_v30, %v1473_v27 }
 0x307   : > { %v9464_v45 = vsel %vm3393_vm2, %v10200_v28, %v8966_v13  ;;  %v1149_v26 = vmul.f32 %v9395_v36, %v1133_v6  ;;  %v9474_v63 = vpop.eup %6103  ;;  %v10203_v13 = vsel %vm8901_vm15, %v9266_v22, 0.0  ;;  %v1443_v39 = vmul.f32 %v9408_v15, %v1427_v3 }
 0x308   : > { %v9470_v59 = vmul.f32 %v10202_v54, %v10201_v40  ;;  %v1613_v58 = vadd.f32 %v9186_v38, %v10203_v13  ;;  %v1316_v21 = vadd.f32 1.0, %v1300_v62  ;;  %v991_v7 = vmul.f32 %v8660_v0, %v974_v17 }
 0x309   : > { %v1599_v33 = vsel %vm8951_vm9, %v1583_v12, 0.0  ;;  %v1584_v30 = vmul.f32 %v9201_v42, %v1568_v31  ;;  %v1198_v60 = vsub.f32 0.0, %v9433_v50  ;;  %v879_v29 = vadd.f32 %v857_v53, %v8519_v5 }
 0x30a   : > { %v1180_v49 = vmul.f32 %v9349_v25, %v1164_v9  ;;  %v1474_v22 = vmul.f32 %v9387_v16, %v1458_v24  ;;  %6113 = vrcp.f32 %v1316_v21  ;;  %v1007_v38 = vmul.f32 0.3275911, %v991_v7  ;;  %v6106_v52 = vpop.eup %6105 }
 0x30b   : > { %v3372_v23 = vxor.u32 2147483648, %v9470_v59  ;;  %v1569_v11 = vsub.f32 %v1259_v18, %v1553_v4  ;;  %v1165_v55 = vadd.f32 0.2548296, %v1149_v26  ;;  %v1285_v8 = vmul.f32 %v9256_v14, %v974_v17 }
 0x30c   : > { %v1459_v34 = vadd.f32 0.2548296, %v1443_v39  ;;  %v1492_v27 = vsub.f32 0.0, %v1284_v2  ;;  %v1023_v42 = vadd.f32 1.0, %v1007_v38  ;;  %v975_v6 = vmul.f32 %v9474_v63, %v9406_v19 }
 0x30d   : > { %v1614_v51 = vadd.f32 %v1613_v58, %v1599_v33  ;;  %v1214_v25 = vmul.f32 %v1198_v60, %v9433_v50  ;;  %v1301_v12 = vmul.f32 0.3275911, %v1285_v8  ;;  %vm912_vm15 = vcmp.lt.f32.partialorder %v879_v29, %v8531_v56  ;;  %v666_v33 = vpop.xlane.xlu0 %665 }
 0x30e   : > { %v1600_v16 = vsel %vm9113_vm4, %v1584_v30, 0.0  ;;  %v1260_v41 = vmul.f32 %v9423_v20, %v1180_v49  ;;  %v1554_v31 = vmul.f32 %v6106_v52, %v1474_v22  ;;  %v992_v3 = vmul.f32 %v8660_v0, %v975_v6  ;;  %v6108_v17 = vpop.eup %6107 }
 0x30f   : > { %v1585_v53 = vmul.f32 %v9242_v43, %v1569_v11  ;;  %6115 = vrcp.f32 %v1023_v42  ;;  %v1317_v28 = vadd.f32 1.0, %v1301_v12  ;;  %v1286_v19 = vmul.f32 %v9256_v14, %v975_v6  ;;  %v9502_v9 = vpop.eup %6109 }
 0x310   : > { %v1181_v50 = vmul.f32 %v9395_v36, %v1165_v55  ;;  %v1475_v24 = vmul.f32 %v9408_v15, %v1459_v34  ;;  %v1508_v35 = vmul.f32 %v1492_v27, %v1284_v2  ;;  %v1008_v62 = vmul.f32 0.3275911, %v992_v3  ;;  %v6112_v40 = vpop.eup %6111 }
 0x311   : > { %v1615_v20 = vadd.f32 %v1614_v51, %v1600_v16  ;;  %v1054_v54 = vmul.f32 1.0614054, %v9502_v9  ;;  %v1241_v18 = vmul.f32 1.442695, %v1214_v25  ;;  %v1199_v4 = vsub.f32 0.0, %v991_v7 }
 0x312   : > { %v1570_v26 = vsub.f32 %v1260_v41, %v1554_v31  ;;  %6117 = vrcp.f32 %v1317_v28  ;;  %v1493_v43 = vsub.f32 0.0, %v1285_v8  ;;  %v1024_v13 = vadd.f32 1.0, %v1008_v62 }
 0x313   : > { %v1601_v58 = vsel %vm9143_vm1, %v1585_v53, 0.0  ;;  %v1070_v39 = vadd.f32 -1.4531521, %v1054_v54  ;;  %v1200_v21 = vsub.f32 0.0, %v992_v3  ;;  %v1302_v36 = vmul.f32 0.3275911, %v1286_v19 }
 0x314   : > { %v1261_v15 = vmul.f32 %v6108_v17, %v1181_v50  ;;  %v1555_v2 = vmul.f32 %v6112_v40, %v1475_v24  ;;  %v1535_v30 = vmul.f32 1.442695, %v1508_v35  ;;  %vm895_vm9 = vcmp.gt.f32.partialorder %v879_v29, 1e-16 }
 0x315   : > { %v1086_v60 = vmul.f32 %v9502_v9, %v1070_v39  ;;  %v1215_v49 = vmul.f32 %v1199_v4, %v991_v7  ;;  %6119 = vrcp.f32 %v1024_v13  ;;  %v1318_v22 = vadd.f32 1.0, %v1302_v36  ;;  %vm9512_vm4 = vmand %vm895_vm9, %vm912_vm15  ;;  %v10206_v7 = vld [vmem:[#allocation50_spill] sm:$0xff] }
 0x316   : > { %v1586_v1 = vmul.f32 %v9250_v48, %v1570_v26  ;;  %v1509_v52 = vmul.f32 %v1493_v43, %v1285_v8  ;;  %v9519_v11 = vsel %vm9512_vm4, %v879_v29, 1.0  ;;  %v862_v55 = vadd.f32 %v9436_v37, %v666_v33  ;;  %v10207_v8 = vld [vmem:[#allocation56_spill] sm:$0xff] }
 0x317   : > { %v9522_v34 = vpop.eup %6113  ;;  %vm3290_vm1 = vcmp.lt.s32.totalorder %v10206_v7, 0  ;;  %v1102_v27 = vadd.f32 1.4214138, %v1086_v60  ;;  %v1216_v42 = vmul.f32 %v1200_v21, %v992_v3  ;;  %6121 = vrcp.f32 %v1318_v22 }
 0x318   : > { %v1494_v6 = vsub.f32 0.0, %v1286_v19  ;;  %v1348_v51 = vmul.f32 1.0614054, %v9522_v34  ;;  %6123 = vrsqrt.f32 %v9519_v11  ;;  %v880_v48 = vadd.f32 %v862_v55, %v8519_v5 }
 0x319   : > { %v3271_v25 = vsub.s32 4, %v10207_v8  ;;  %v1571_v29 = vsub.f32 %v1261_v15, %v1555_v2  ;;  %v1118_v12 = vmul.f32 %v9502_v9, %v1102_v27  ;;  %6125 = vpow2.f32 %v1241_v18 }
 0x31a   : > { %v1243_v37 = vmul.f32 1.442695, %v1215_v49  ;;  %v1364_v16 = vadd.f32 -1.4531521, %v1348_v51  ;;  %v1537_v41 = vmul.f32 1.442695, %v1509_v52  ;;  %vm913_vm10 = vcmp.lt.f32.partialorder %v880_v48, %v8531_v56 }
 0x31b   : > { %vm896_vm8 = vcmp.gt.f32.partialorder %v880_v48, 1e-16  ;;  %v1616_v31 = vadd.f32 %v1615_v20, %v1601_v58  ;;  %6127 = vpow2.f32 %v1535_v30  ;;  %v1245_v3 = vmul.f32 1.442695, %v1216_v42 }
 0x31c   : > { %v1510_v17 = vmul.f32 %v1494_v6, %v1286_v19  ;;  %vm9531_vm0 = vmand %vm896_vm8, %vm913_vm10  ;;  %v9535_v5 = vpop.eup %6115  ;;  %v1602_v28 = vsel %vm9158_vm11, %v1586_v1, 0.0  ;;  %v1380_v50 = vmul.f32 %v9522_v34, %v1364_v16  ;;  %v10210_v24 = vand.u32 2147483647, %v10155_v57 }
 0x31d   : > { %vm10211_vm12 = vcmp.lt.s32.totalorder %v10155_v57, 0  ;;  %v1134_v35 = vadd.f32 -0.28449672, %v1118_v12  ;;  %v1055_v19 = vmul.f32 1.0614054, %v9535_v5  ;;  %6129 = vpow2.f32 %v1243_v37  ;;  %v10215_v12 = vld [vmem:[#allocation37_spill] sm:$0xff] }
 0x31e   : > { %vm3186_vm13 = vcmp.le.f32.partialorder %v10210_v24, 0.7853982  ;;  %v3272_v56 = vsel %vm10211_vm12, %v3271_v25, %v10207_v8  ;;  %v9549_v40 = vmul.f32 %v9276_v47, %v1571_v29  ;;  %v1396_v46 = vadd.f32 1.4214138, %v1380_v50 }
 0x31f   : > { %v3273_v62 = vsel %vm3186_vm13, %v10155_v57, %v8994_v61  ;;  %6131 = vpow2.f32 %v1537_v41  ;;  %v9553_v20 = vsel %vm9531_vm0, %v880_v48, 1.0  ;;  %v9555_v54 = vpop.eup %6117  ;;  %v1071_v18 = vadd.f32 -1.4531521, %v1055_v19 }
 0x320   : > { %6133 = vpow2.f32 %v1245_v3  ;;  %v1539_v4 = vmul.f32 1.442695, %v1510_v17  ;;  %v3274_v26 = vsel %vm3186_vm13, 0, %v3272_v56  ;;  %v3373_v61 = vsel %vm3290_vm1, %v3372_v23, %v9470_v59 }
 0x321   : > { %v1412_v47 = vmul.f32 %v9522_v34, %v1396_v46  ;;  %v1349_v43 = vmul.f32 1.0614054, %v9555_v54  ;;  %6135 = vcosq.f32 %v3273_v62  ;;  %v9564_v13 = vadd.f32 %v1616_v31, %v1602_v28 }
 0x322   : > { %v1150_v58 = vmul.f32 %v9502_v9, %v1134_v35  ;;  %v1087_v39 = vmul.f32 %v9535_v5, %v1071_v18  ;;  %6137 = vrsqrt.f32 %v9553_v20  ;;  %v9569_v21 = vpop.eup %6119  ;;  %v4902_v15 = vadd.s32 3, %v3274_v26 }
 0x323   : > { %v1428_v36 = vadd.f32 -0.28449672, %v1412_v47  ;;  %v1365_v33 = vadd.f32 -1.4531521, %v1349_v43  ;;  %6139 = vsinq.f32 %v3273_v62  ;;  %v1603_v59 = vsel %vm9208_vm5, %v9549_v40, 0.0 }
 0x324   : > { %v1103_v23 = vadd.f32 1.4214138, %v1087_v39  ;;  %v1056_v2 = vmul.f32 1.0614054, %v9569_v21  ;;  %6141 = vpow2.f32 %v1539_v4  ;;  %v9575_v30 = vpop.eup %6121  ;;  %v9579_v22 = vand.u32 3, %v3274_v26 }
 0x325   : > { %v1444_v60 = vmul.f32 %v9522_v34, %v1428_v36  ;;  %v1381_v49 = vmul.f32 %v9555_v54, %v1365_v33  ;;  %v10212_v1 = vand.u32 2147483647, %v10206_v7  ;;  %v9587_v55 = vpop.eup %6123  ;;  %v1166_v27 = vadd.f32 0.2548296, %v1150_v58 }
 0x326   : > { %v1119_v42 = vmul.f32 %v9535_v5, %v1103_v23  ;;  %v1072_v6 = vadd.f32 -1.4531521, %v1056_v2  ;;  %v1350_v51 = vmul.f32 1.0614054, %v9575_v30  ;;  %v6126_v48 = vpop.eup %6125  ;;  %v976_v25 = vmul.f32 %v9587_v55, %v9519_v11 }
 0x327   : > { %vm9583_vm11 = vcmp.le.f32.partialorder %v10212_v1, 0.7853982  ;;  %v1397_v8 = vadd.f32 1.4214138, %v1381_v49  ;;  %v9593_v29 = vand.u32 3, %v4902_v15  ;;  %v3374_v37 = vsub.s32 4, %v10215_v12 }
 0x328   : > { %v1135_v16 = vadd.f32 -0.28449672, %v1119_v42  ;;  %v1088_v41 = vmul.f32 %v9569_v21, %v1072_v6  ;;  %v1366_v31 = vadd.f32 -1.4531521, %v1350_v51  ;;  %v3376_v3 = vsel %vm9583_vm11, %v10206_v7, %v3373_v61  ;;  %v6128_v17 = vpop.eup %6127 }
 0x329   : > { %v1460_v28 = vadd.f32 0.2548296, %v1444_v60  ;;  %v1413_v50 = vmul.f32 %v9555_v54, %v1397_v8  ;;  %v993_v24 = vmul.f32 %v8660_v0, %v976_v25  ;;  %v1287_v11 = vmul.f32 %v9256_v14, %v976_v25 }
 0x32a   : > { %v1182_v56 = vmul.f32 %v9502_v9, %v1166_v27  ;;  %v1151_v35 = vmul.f32 %v9535_v5, %v1135_v16  ;;  %v1104_v19 = vadd.f32 1.4214138, %v1088_v41  ;;  %v1382_v62 = vmul.f32 %v9575_v30, %v1366_v31  ;;  %v6130_v46 = vpop.eup %6129 }
 0x32b   : > { %v1429_v18 = vadd.f32 -0.28449672, %v1413_v50  ;;  %v1009_v4 = vmul.f32 0.3275911, %v993_v24  ;;  %v1201_v26 = vsub.f32 0.0, %v993_v24  ;;  %v3375_v61 = vsel %vm3290_vm1, %v3374_v37, %v10215_v12 }
 0x32c   : > { %v6132_v47 = vpop.eup %6131  ;;  %v1120_v43 = vmul.f32 %v9569_v21, %v1104_v19  ;;  %v1398_v58 = vadd.f32 1.4214138, %v1382_v62  ;;  %v1303_v39 = vmul.f32 0.3275911, %v1287_v11  ;;  %6143 = vsinq.f32 %v3376_v3 }
 0x32d   : > { %v9610_v9 = vpop.eup %6133  ;;  %v1476_v36 = vmul.f32 %v9522_v34, %v1460_v28  ;;  %v1445_v33 = vmul.f32 %v9555_v54, %v1429_v18  ;;  %v1025_v15 = vadd.f32 1.0, %v1009_v4  ;;  %6145 = vcosq.f32 %v3376_v3 }
 0x32e   : > { %v9614_v23 = vpop.eup %6135  ;;  %v1167_v2 = vadd.f32 0.2548296, %v1151_v35  ;;  %v1136_v60 = vadd.f32 -0.28449672, %v1120_v43  ;;  %v1414_v49 = vmul.f32 %v9575_v30, %v1398_v58  ;;  %v1319_v1 = vadd.f32 1.0, %v1303_v39 }
 0x32f   : > { %v9617_v27 = vpop.eup %6137  ;;  %v1461_v42 = vadd.f32 0.2548296, %v1445_v33  ;;  %6147 = vrcp.f32 %v1025_v15  ;;  %v1217_v6 = vmul.f32 %v1201_v26, %v993_v24  ;;  %vm4905_vm14 = vcmp.eq.s32.totalorder %v9593_v29, 0 }
 0x330   : > { %v6140_v51 = vpop.eup %6139  ;;  %v1152_v34 = vmul.f32 %v9569_v21, %v1136_v60  ;;  %v1430_v8 = vadd.f32 -0.28449672, %v1414_v49  ;;  %6149 = vrcp.f32 %v1319_v1  ;;  %vm3277_vm15 = vweird.f32 %v10155_v57  ;;  %v10216_v49 = vld [vmem:[#allocation21_spill] sm:$0xff] }
 0x331   : > { %vm3280_vm9 = vcmp.eq.s32.totalorder %v9579_v22, 0  ;;  %v3377_v25 = vsel %vm9583_vm11, 0, %v3375_v61  ;;  %v6142_v12 = vpop.eup %6141  ;;  %v1262_v37 = vmul.f32 %v6126_v48, %v1182_v56  ;;  %v1556_v16 = vmul.f32 %v6128_v17, %v1476_v36 }
 0x332   : > { %v1495_v41 = vsub.f32 0.0, %v1287_v11  ;;  %v3284_v31 = vxor.u32 2147483648, %v9614_v23  ;;  %v1183_v3 = vmul.f32 %v9535_v5, %v1167_v2  ;;  %v1477_v28 = vmul.f32 %v9555_v54, %v1461_v42  ;;  %v10217_v42 = vld [vmem:[#allocation38_spill] sm:$0xff] }
 0x333   : > { %v1446_v50 = vmul.f32 %v9575_v30, %v1430_v8  ;;  %v977_v24 = vmul.f32 %v9617_v27, %v9553_v20  ;;  %vm3283_vm1 = vcmp.eq.s32.totalorder %v9579_v22, 2  ;;  %v1247_v35 = vmul.f32 1.442695, %v1217_v6 }
 0x334   : > { %v3281_v52 = vxor.u32 2147483648, %v6140_v51  ;;  %vm4908_vm8 = vcmp.eq.s32.totalorder %v9593_v29, 2  ;;  %vm3279_vm10 = vcmp.lt.s32.totalorder %v9579_v22, 2  ;;  %v5006_v48 = vadd.s32 3, %v3377_v25 }
 0x335   : > { %v1168_v17 = vadd.f32 0.2548296, %v1152_v34  ;;  %v1511_v56 = vmul.f32 %v1495_v41, %v1287_v11  ;;  %v994_v5 = vmul.f32 %v8660_v0, %v977_v24  ;;  %v1288_v54 = vmul.f32 %v9256_v14, %v977_v24 }
 0x336   : > { %v1462_v19 = vadd.f32 0.2548296, %v1446_v50  ;;  %v4907_v20 = vsel %vm4905_vm14, %v9614_v23, %v3281_v52  ;;  %v4910_v62 = vsel %vm4908_vm8, %v3284_v31, %v6140_v51  ;;  %v9639_v18 = vand.u32 3, %v3377_v25 }
 0x337   : > { %v1572_v4 = vsub.f32 %v1262_v37, %v1556_v16  ;;  %v9641_v26 = vmul.f32 %v6130_v46, %v1183_v3  ;;  %v9643_v61 = vmul.f32 %v6132_v47, %v1477_v28  ;;  %v1010_v43 = vmul.f32 0.3275911, %v994_v5 }
 0x338   : > { %6151 = vpow2.f32 %v1247_v35  ;;  %v1304_v11 = vmul.f32 0.3275911, %v1288_v54  ;;  %vm4904_vm13 = vcmp.lt.s32.totalorder %v9593_v29, 2  ;;  %v5007_v0 = vand.u32 3, %v5006_v48 }
 0x339   : > { %v1184_v14 = vmul.f32 %v9569_v21, %v1168_v17  ;;  %v1541_v58 = vmul.f32 1.442695, %v1511_v56  ;;  %v1026_v39 = vadd.f32 1.0, %v1010_v43  ;;  %v4911_v36 = vsel %vm4904_vm13, %v4907_v20, %v4910_v62  ;;  %v6144_v33 = vpop.eup %6143 }
 0x33a   : > { %v1478_v15 = vmul.f32 %v9575_v30, %v1462_v19  ;;  %v1320_v2 = vadd.f32 1.0, %v1304_v11  ;;  %v4912_v46 = vsel %vm3277_vm15, nan, %v4911_v36  ;;  %v3282_v47 = vsel %vm3280_vm9, %v9614_v23, %v3281_v52  ;;  %v6146_v60 = vpop.eup %6145 }
 0x33b   : > { %v9654_v29 = vmul.f32 %v10216_v49, %v1572_v4  ;;  %v1573_v21 = vsub.f32 %v9641_v26, %v9643_v61  ;;  %6153 = vrcp.f32 %v1026_v39  ;;  %v1202_v1 = vsub.f32 0.0, %v994_v5 }
 0x33c   : > { %vm3380_vm12 = vweird.f32 %v10206_v7  ;;  %vm3382_vm11 = vcmp.lt.s32.totalorder %v9639_v18, 2  ;;  %6155 = vrcp.f32 %v1320_v2  ;;  %v1496_v30 = vsub.f32 0.0, %v1288_v54  ;;  %v9663_v34 = vpop.eup %6147 }
 0x33d   : > { %v5133_v6 = vmul.f32 %v10217_v42, %v4912_v46  ;;  %v3285_v23 = vsel %vm3283_vm1, %v3284_v31, %v6140_v51  ;;  %v9666_v8 = vmul.f32 %v9610_v9, %v1184_v14  ;;  %6157 = vpow2.f32 %v1541_v58  ;;  %v9670_v16 = vpop.eup %6149  ;;  %v9696_v58 = vld [vmem:[%s7557_s27] ss:$0 sm:$0xff]  ;;  %s5307_s27 = scalar_lea.sflag [#allocation4], %s6490_s25 }
 0x33e   : > { %v3286_v25 = vsel %vm3279_vm10, %v3282_v47, %v3285_v23  ;;  %v3384_v37 = vxor.u32 2147483648, %v6144_v33  ;;  %v9672_v41 = vmul.f32 %v6142_v12, %v1478_v15  ;;  %v1057_v3 = vmul.f32 1.0614054, %v9663_v34 }
 0x33f   : > { %vm10218_vm14 = vcmask 64512   ;;  %v3287_v51 = vsel %vm3277_vm15, nan, %v3286_v25  ;;  %v1351_v31 = vmul.f32 1.0614054, %v9670_v16  ;;  %v1218_v9 = vmul.f32 %v1202_v1, %v994_v5 }
 0x340   : > { %v5172_v28 = vsel %vm10218_vm14, %v5133_v6, 0.0  ;;  %v3512_v50 = vmul.f32 %v10217_v42, %v3287_v51  ;;  %v3387_v22 = vxor.u32 2147483648, %v6146_v60  ;;  %v1073_v24 = vadd.f32 -1.4531521, %v1057_v3  ;;  %vm10219_vm8 = vmmov %vm10218_vm14 }
 0x341   : > { %5173 = vadd.xlane.f32.xlu0 %v5172_v28  ;;  %v1512_v35 = vmul.f32 %v1496_v30, %v1288_v54  ;;  %vm5008_vm9 = vcmp.lt.s32.totalorder %v5007_v0, 2  ;;  %vm5009_vm1 = vcmp.eq.s32.totalorder %v5007_v0, 0  ;;  %v1367_v12 = vadd.f32 -1.4531521, %v1351_v31 }
 0x342   : > { %v3552_v52 = vsel %vm10219_vm8, %v3512_v50, 0.0  ;;  %v5011_v48 = vsel %vm5009_vm1, %v6146_v60, %v3384_v37  ;;  %vm5012_vm10 = vcmp.eq.s32.totalorder %v5007_v0, 2  ;;  %v1089_v57 = vmul.f32 %v9663_v34, %v1073_v24 }
 0x343   : > { %3553 = vadd.xlane.f32.xlu1 %v3552_v52  ;;  %v5014_v17 = vsel %vm5012_vm10, %v3387_v22, %v6144_v33  ;;  %vm3383_vm15 = vcmp.eq.s32.totalorder %v9639_v18, 0  ;;  %vm3386_vm13 = vcmp.eq.s32.totalorder %v9639_v18, 2  ;;  %v1383_v56 = vmul.f32 %v9670_v16, %v1367_v12  ;;  %vm10229_vm10 = vmmov %vm10219_vm8  ;;  %v3518_v12 = vpop.xlane.xlu1 %3517 }
 0x344   : > { %v5015_v5 = vsel %vm5008_vm9, %v5011_v48, %v5014_v17  ;;  %v3385_v54 = vsel %vm3383_vm15, %v6146_v60, %v3384_v37  ;;  %v3388_v19 = vsel %vm3386_vm13, %v3387_v22, %v6144_v33  ;;  %v1105_v20 = vadd.f32 1.4214138, %v1089_v57  ;;  %v10223_v33 = vld [vmem:[#allocation58_spill] sm:$0xff] }
 0x345   : > { %v5016_v62 = vsel %vm3380_vm12, nan, %v5015_v5  ;;  %v3389_v4 = vsel %vm3382_vm11, %v3385_v54, %v3388_v19  ;;  %v10220_v43 = vand.u32 2147483647, %v10199_v10  ;;  %v6152_v0 = vpop.eup %6151  ;;  %v1399_v14 = vadd.f32 1.4214138, %v1383_v56  ;;  %vm10224_vm11 = vmmov %vm10219_vm8 }
 0x346   : > { %v5134_v39 = vmul.f32 %v9696_v58, %v5016_v62  ;;  %v3390_v36 = vsel %vm3380_vm12, nan, %v3389_v4  ;;  %v3477_v15 = vsub.s32 4, %v10223_v33  ;;  %v1121_v18 = vmul.f32 %v9663_v34, %v1105_v20  ;;  %vm10225_vm12 = vmmov %vm10219_vm8 }
 0x347   : > { %vm9691_vm14 = vcmp.le.f32.partialorder %v10220_v43, 0.7853982  ;;  %v1249_v2 = vmul.f32 1.442695, %v1218_v9  ;;  %v3513_v46 = vmul.f32 %v9696_v58, %v3390_v36  ;;  %v1415_v60 = vmul.f32 %v9670_v16, %v1399_v14 }
 0x348   : > { %v3479_v47 = vsel %vm9691_vm14, %v10199_v10, %v9464_v45  ;;  %v1543_v49 = vmul.f32 1.442695, %v1512_v35  ;;  %v5175_v1 = vsel %vm10224_vm11, %v5134_v39, 0.0  ;;  %v9710_v7 = vpop.eup %6153  ;;  %v1137_v30 = vadd.f32 -0.28449672, %v1121_v18 }
 0x349   : > { %6159 = vcosq.f32 %v3479_v47  ;;  %5176 = vadd.xlane.f32.xlu0 %v5175_v1  ;;  %v3555_v42 = vsel %vm10225_vm12, %v3513_v46, 0.0  ;;  %v3478_v6 = vsel %vm3393_vm2, %v3477_v15, %v10223_v33  ;;  %v9716_v23 = vpop.eup %6155  ;;  %v1618_v45 = vadd.f32 %v9564_v13, %v1603_v59 }
 0x34a   : > { %6161 = vsinq.f32 %v3479_v47  ;;  %v1431_v25 = vadd.f32 -0.28449672, %v1415_v60  ;;  %v1058_v37 = vmul.f32 1.0614054, %v9710_v7  ;;  %3556 = vadd.xlane.f32.xlu1 %v3555_v42  ;;  %v6158_v3 = vpop.eup %6157  ;;  %v1604_v51 = vsel %vm9311_vm6, %v9654_v29, 0.0 }
 0x34b   : > { %v1589_v31 = vmul.f32 %v9447_v32, %v1573_v21  ;;  %v1153_v44 = vmul.f32 %v9663_v34, %v1137_v30  ;;  %v1352_v40 = vmul.f32 1.0614054, %v9716_v23  ;;  %6163 = vpow2.f32 %v1249_v2 }
 0x34c   : > { %v1447_v13 = vmul.f32 %v9670_v16, %v1431_v25  ;;  %v1074_v59 = vadd.f32 -1.4531521, %v1058_v37  ;;  %v3480_v9 = vsel %vm9691_vm14, 0, %v3478_v6  ;;  %v1574_v50 = vsub.f32 %v9666_v8, %v9672_v41 }
 0x34d   : > { %v1169_v29 = vadd.f32 0.2548296, %v1153_v44  ;;  %v1368_v22 = vadd.f32 -1.4531521, %v1352_v40  ;;  %6165 = vpow2.f32 %v1543_v49  ;;  %v5110_v24 = vadd.s32 3, %v3480_v9 }
 0x34e   : > { %v1463_v26 = vadd.f32 0.2548296, %v1447_v13  ;;  %v1090_v32 = vmul.f32 %v9710_v7, %v1074_v59  ;;  %v1619_v35 = vadd.f32 %v1618_v45, %v1604_v51  ;;  %v1605_v52 = vsel %vm9354_vm3, %v1589_v31, 0.0 }
 0x34f   : > { %v1185_v61 = vmul.f32 %v9663_v34, %v1169_v29  ;;  %v1384_v21 = vmul.f32 %v9716_v23, %v1368_v22  ;;  %v1590_v8 = vmul.f32 %v9474_v63, %v1574_v50  ;;  %v3484_v56 = vand.u32 3, %v3480_v9 }
 0x350   : > { %v1479_v48 = vmul.f32 %v9670_v16, %v1463_v26  ;;  %v1106_v57 = vadd.f32 1.4214138, %v1090_v32  ;;  %v5111_v19 = vand.u32 3, %v5110_v24  ;;  %v1620_v20 = vadd.f32 %v1619_v35, %v1605_v52  ;;  %v3521_v52 = vpop.xlane.xlu0 %3520 }
 0x351   : > { %v1265_v41 = vmul.f32 %v6152_v0, %v1185_v61  ;;  %v1400_v17 = vadd.f32 1.4214138, %v1384_v21  ;;  %v1606_v11 = vsel %vm9383_vm7, %v1590_v8, 0.0  ;;  %vm3485_vm5 = vcmp.lt.s32.totalorder %v3484_v56, 2  ;;  %v1631_v61 = vld [vmem:[%s558_s0] sm:$0x1] }
 0x352   : > { %v1559_v5 = vmul.f32 %v6158_v3, %v1479_v48  ;;  %v1122_v54 = vmul.f32 %v9710_v7, %v1106_v57  ;;  %vm3486_vm6 = vcmp.eq.s32.totalorder %v3484_v56, 0  ;;  %vm3489_vm3 = vcmp.eq.s32.totalorder %v3484_v56, 2  ;;  %v1633_v21 = vld [vmem:[%s564_s26] sm:$0x1]  ;;  %v5138_v48 = vpop.xlane.xlu1 %5137  ;;  %s9815_s26 = scalar_lea.hbm %s10233_s18, %s5645_s30 }
 0x353   : > { %v1416_v34 = vmul.f32 %v9716_v23, %v1400_v17  ;;  %vm5112_vm2 = vcmp.lt.s32.totalorder %v5111_v19, 2  ;;  %vm5116_vm9 = vcmp.eq.s32.totalorder %v5111_v19, 2  ;;  %vm5113_vm1 = vcmp.eq.s32.totalorder %v5111_v19, 0 }
 0x354   : > { %v1138_v62 = vadd.f32 -0.28449672, %v1122_v54  ;;  %v1575_v14 = vsub.f32 %v1265_v41, %v1559_v5  ;;  %vm3483_vm7 = vweird.f32 %v10199_v10  ;;  %v1621_v28 = vadd.f32 %v1620_v20, %v1606_v11  ;;  %v5141_v57 = vpop.xlane.xlu0 %5140 }
 0x355   : > { %v1432_v16 = vadd.f32 -0.28449672, %v1416_v34 }
 0x356   : > { %v6160_v4 = vpop.eup %6159  ;;  %v1154_v63 = vmul.f32 %v9710_v7, %v1138_v62  ;;  %v1591_v47 = vmul.f32 %v9587_v55, %v1575_v14  ;;  %v3524_v41 = vpop.xlane.xlu1 %3523 }
 0x357   : > { %v6162_v39 = vpop.eup %6161  ;;  %v3490_v0 = vxor.u32 2147483648, %v6160_v4  ;;  %v1448_v36 = vmul.f32 %v9716_v23, %v1432_v16  ;;  %v5211_v16 = vmul.f32 %v5138_v48, %v5138_v48 }
 0x358   : > { %v3487_v33 = vxor.u32 2147483648, %v6162_v39  ;;  %v1170_v15 = vadd.f32 0.2548296, %v1154_v63  ;;  %v6164_v46 = vpop.eup %6163  ;;  %v1607_v44 = vsel %vm9512_vm4, %v1591_v47, 0.0  ;;  %vm1635_vm4 = vcmask 1040384   ;;  %v5144_v8 = vpop.xlane.xlu0 %5143 }
 0x359   : > { %v5118_v18 = vsel %vm5116_vm9, %v3490_v0, %v6162_v39  ;;  %v3491_v2 = vsel %vm3489_vm3, %v3490_v0, %v6162_v39  ;;  %v1464_v60 = vadd.f32 0.2548296, %v1448_v36  ;;  %v5212_v39 = vmul.f32 %v5141_v57, %v5141_v57 }
 0x35a   : > { %v5115_v49 = vsel %vm5113_vm1, %v6160_v4, %v3487_v33  ;;  %v3488_v1 = vsel %vm3486_vm6, %v6160_v4, %v3487_v33  ;;  %v6166_v30 = vpop.eup %6165  ;;  %v1186_v42 = vmul.f32 %v9710_v7, %v1170_v15  ;;  %v3527_v17 = vpop.xlane.xlu1 %3526  ;;  %v5196_v36 = vmul.f32 %v3518_v12, %v3518_v12  ;;  %v5187_v12 = vld [vmem:[%s9778_s22 + $0x30] sm:$0xff] }
 0x35b   : > { %v5119_v6 = vsel %vm5112_vm2, %v5115_v49, %v5118_v18  ;;  %v3492_v45 = vsel %vm3485_vm5, %v3488_v1, %v3491_v2  ;;  %v1480_v25 = vmul.f32 %v9716_v23, %v1464_v60  ;;  %v1622_v23 = vadd.f32 %v1621_v28, %v1607_v44  ;;  %v5181_v49 = vld [vmem:[%s9778_s22] sm:$0xff]  ;;  %v5182_v1 = vld [vmem:[%s9778_s22 + $0x8] sm:$0xff]  ;;  %v5184_v44 = vld [vmem:[%s9778_s22 + $0x18] sm:$0xff] }
 0x35c   : > { %v5120_v37 = vsel %vm3483_vm7, nan, %v5119_v6  ;;  %v3493_v3 = vsel %vm3483_vm7, nan, %v3492_v45  ;;  %v1266_v51 = vmul.f32 %v6164_v46, %v1186_v42  ;;  %v5147_v56 = vpop.xlane.xlu0 %5146  ;;  %v5198_v33 = vmul.f32 %v3524_v41, %v3524_v41  ;;  %v5183_v45 = vld [vmem:[%s9778_s22 + $0x10] sm:$0xff] }
 0x35d   : > { %v5135_v31 = vmul.f32 %v9696_v58, %v5120_v37  ;;  %v3514_v55 = vmul.f32 %v9696_v58, %v3493_v3  ;;  %v1560_v7 = vmul.f32 %v6166_v30, %v1480_v25  ;;  %v5197_v15 = vmul.f32 %v3521_v52, %v3521_v52 }
 0x35e   : > { %v3530_v5 = vpop.xlane.xlu1 %3529  ;;  %v5213_v18 = vmul.f32 %v5144_v8, %v5144_v8  ;;  %v5226_v2 = vadd.f32 %v5211_v16, %v5196_v36  ;;  %v5199_v46 = vmul.f32 %v3527_v17, %v3527_v17  ;;  %v5214_v47 = vmul.f32 %v5147_v56, %v5147_v56  ;;  %v5188_v8 = vld [vmem:[%s9778_s22 + $0x38] sm:$0xff] }
 0x35f   : > { %v5178_v10 = vsel %vm10219_vm8, %v5135_v31, 0.0  ;;  %v3558_v40 = vsel %vm10229_vm10, %v3514_v55, 0.0  ;;  %v1576_v13 = vsub.f32 %v1266_v51, %v1560_v7  ;;  %v5227_v60 = vadd.f32 %v5212_v39, %v5197_v15  ;;  %v5190_v15 = vld [vmem:[%s9778_s22 + $0x48] sm:$0xff] }
 0x360   : > { %5179 = vadd.xlane.f32.xlu0 %v5178_v10  ;;  %3559 = vadd.xlane.f32.xlu1 %v3558_v40  ;;  %v5150_v54 = vpop.xlane.xlu0 %5149  ;;  %v5228_v30 = vadd.f32 %v5213_v18, %v5198_v33  ;;  %v5200_v42 = vmul.f32 %v3530_v5, %v3530_v5  ;;  %v5241_v3 = vmul.f32 %v5226_v2, %v5181_v49 }
 0x361   : > { %v1592_v59 = vmul.f32 %v9617_v27, %v1576_v13  ;;  %v5215_v6 = vmul.f32 %v5150_v54, %v5150_v54  ;;  %v5229_v28 = vadd.f32 %v5214_v47, %v5199_v46  ;;  %v5242_v55 = vmul.f32 %v5227_v60, %v5182_v1 }
 0x362   : > { %v3533_v34 = vpop.xlane.xlu1 %3532  ;;  %v5243_v7 = vmul.f32 %v5228_v30, %v5183_v45 }
 0x363   : > { %v1608_v9 = vsel %vm9531_vm0, %v1592_v59, 0.0  ;;  %v5201_v51 = vmul.f32 %v3533_v34, %v3533_v34  ;;  %v5230_v10 = vadd.f32 %v5215_v6, %v5200_v42  ;;  %vm5256_vm0 = vcmask 7168   ;;  %v5191_v42 = vld [vmem:[%s9778_s22 + $0x50] sm:$0xff] }
 0x364   : > { %v1623_v58 = vadd.f32 %v1622_v23, %v1608_v9  ;;  %v5153_v19 = vpop.xlane.xlu0 %5152  ;;  %v5185_v23 = vld [vmem:[%s9778_s22 + $0x20] sm:$0xff] }
 0x365   : > { %v5216_v31 = vmul.f32 %v5153_v19, %v5153_v19 }
 0x366   : > { %v1624_v50 = vrot.slane %v1623_v58, 4  ;;  %v3536_v20 = vpop.xlane.xlu1 %3535 }
 0x367   : > { %v5202_v40 = vmul.f32 %v3536_v20, %v3536_v20 }
 0x368   : > { %v1625_v38 = vadd.f32 %v1624_v50, %v1623_v58  ;;  %v5156_v62 = vpop.xlane.xlu0 %5155  ;;  %v5257_v58 = vsel %vm5256_vm0, %v5241_v3, 0.0  ;;  %v5244_v50 = vmul.f32 %v5229_v28, %v5184_v44  ;;  %v5192_v28 = vld [vmem:[%s9778_s22 + $0x58] sm:$0xff] }
 0x369   : > { %v5217_v13 = vmul.f32 %v5156_v62, %v5156_v62  ;;  %v5189_v62 = vld [vmem:[%s9778_s22 + $0x40] sm:$0xff] }
 0x36a   : > { %v1626_v29 = vrot.slane %v1625_v38, 2  ;;  %v3539_v4 = vpop.xlane.xlu1 %3538  ;;  %v5262_v48 = vsel %vm5256_vm0, %v5244_v50, 0.0 }
 0x36b   : > { %v5203_v59 = vmul.f32 %v3539_v4, %v3539_v4 }
 0x36c   : > { %v1627_v22 = vadd.f32 %v1626_v29, %v1625_v38  ;;  %v5159_v43 = vpop.xlane.xlu0 %5158  ;;  %v5231_v38 = vadd.f32 %v5216_v31, %v5201_v51  ;;  %v5186_v29 = vld [vmem:[%s9778_s22 + $0x28] sm:$0xff] }
 0x36d   : > { %v5218_v9 = vmul.f32 %v5159_v43, %v5159_v43 }
 0x36e   : > { %v1628_v26 = vrot.slane %v1627_v22, 1  ;;  %v3542_v11 = vpop.xlane.xlu1 %3541  ;;  %v5246_v57 = vmul.f32 %v5231_v38, %v5186_v29 }
 0x36f   : > { %v5233_v52 = vadd.f32 %v5218_v9, %v5203_v59  ;;  %v5194_v59 = vld [vmem:[%s9778_s22 + $0x68] sm:$0xff] }
 0x370   : > { %v1629_v32 = vadd.f32 %v1628_v26, %v1627_v22  ;;  %v5162_v14 = vpop.xlane.xlu0 %5161  ;;  %v5204_v22 = vmul.f32 %v3542_v11, %v3542_v11  ;;  %v5266_v16 = vsel %vm5256_vm0, %v5246_v57, 0.0 }
 0x371   : > { %v5219_v26 = vmul.f32 %v5162_v14, %v5162_v14  ;;  %v5248_v14 = vmul.f32 %v5233_v52, %v5188_v8 }
 0x372   : > { %v1630_v27 = vmul.f32 14.399646, %v1629_v32  ;;  %v3545_v63 = vpop.xlane.xlu1 %3544 }
 0x373   : > { %v5205_v41 = vmul.f32 %v3545_v63, %v3545_v63  ;;  %v5234_v5 = vadd.f32 %v5219_v26, %v5204_v22  ;;  %v5270_v30 = vsel %vm5256_vm0, %v5248_v14, 0.0 }
 0x374   : > { %v1632_v53 = vadd.f32 %v1631_v61, %v1630_v27  ;;  %v5165_v0 = vpop.xlane.xlu0 %5164  ;;  %v5258_v27 = vsel %vm5256_vm0, %v5242_v55, 0.0 }
 0x375   : > { %v5220_v17 = vmul.f32 %v5165_v0, %v5165_v0  ;;  %v5249_v33 = vmul.f32 %v5234_v5, %v5189_v62 }
 0x376   : > { %v1634_v24 = vmul.f32 %v1633_v21, %v1632_v53  ;;  %v3548_v25 = vpop.xlane.xlu1 %3547  ;;  %v5260_v21 = vsel %vm5256_vm0, %v5243_v7, 0.0  ;;  %v5245_v53 = vmul.f32 %v5230_v10, %v5185_v23  ;;  %v5193_v7 = vld [vmem:[%s9778_s22 + $0x60] sm:$0xff] }
 0x377   : > { %v5206_v4 = vmul.f32 %v3548_v25, %v3548_v25  ;;  %v5235_v39 = vadd.f32 %v5220_v17, %v5205_v41  ;;  %v5272_v51 = vsel %vm5256_vm0, %v5249_v33, 0.0 }
 0x378   : > { %v1636_v35 = vsel %vm1635_vm4, %v1634_v24, 0.0  ;;  %v5168_v37 = vpop.xlane.xlu0 %5167  ;;  %v5232_v24 = vadd.f32 %v5217_v13, %v5202_v40  ;;  %v5264_v19 = vsel %vm5256_vm0, %v5245_v53, 0.0  ;;  %v5195_v53 = vld [vmem:[%s9778_s22 + $0x70] sm:$0xff]  ;;  %s6220_s22 = scalar_lea.vmem %s6219_s16, 32 }
 0x379   : > { %1637 = vadd.xlane.f32.xlu1 %v1636_v35  ;;  %v5259_v35 = vadd.f32 %v5258_v27, %v5257_v58  ;;  %v5221_v43 = vmul.f32 %v5168_v37, %v5168_v37  ;;  %v5250_v6 = vmul.f32 %v5235_v39, %v5190_v15  ;;  %p6222_p8 = scmp.lt.s32.totalorder %s6220_s22, %s6214_s28 }
 0x37a   : > { %v5247_v20 = vmul.f32 %v5232_v24, %v5187_v12 }
 0x37b   : > { %v5261_v56 = vadd.f32 %v5260_v21, %v5259_v35  ;;  %v5236_v47 = vadd.f32 %v5221_v43, %v5206_v4  ;;  %v5274_v10 = vsel %vm5256_vm0, %v5250_v6, 0.0  ;;  %p6223_p9 = por %p6222_p8, %p6221_p10 }
 0x37c   : > { %v5268_v46 = vsel %vm5256_vm0, %v5247_v20, 0.0 }
 0x37d   : > { %v5263_v11 = vadd.f32 %v5262_v48, %v5261_v56  ;;  %v5251_v31 = vmul.f32 %v5236_v47, %v5191_v42  ;;  %p6224_p13 = pnand %p6223_p9, %p6217_p1 }
 0x37f   : > { %v5265_v0 = vadd.f32 %v5264_v19, %v5263_v11  ;;  %v5276_v9 = vsel %vm5256_vm0, %v5251_v31, 0.0 }
 0x381   : > { %v5267_v1 = vadd.f32 %v5266_v16, %v5265_v0 }
 0x382   : > { %v5171_v61 = vpop.xlane.xlu0 %5170 }
 0x383   : > { %v3551_v32 = vpop.xlane.xlu1 %3550  ;;  %v5222_v63 = vmul.f32 %v5171_v61, %v5171_v61  ;;  %v5269_v3 = vadd.f32 %v5268_v46, %v5267_v1 }
 0x384   : > { %v5207_v36 = vmul.f32 %v3551_v32, %v3551_v32 }
 0x385   : > { %v5271_v44 = vadd.f32 %v5270_v30, %v5269_v3 }
 0x386   : > { %v5237_v45 = vadd.f32 %v5222_v63, %v5207_v36 }
 0x387   : > { %v5273_v23 = vadd.f32 %v5272_v51, %v5271_v44 }
 0x388   : > { %v5252_v40 = vmul.f32 %v5237_v45, %v5192_v28 }
 0x389   : > { %v5275_v50 = vadd.f32 %v5274_v10, %v5273_v23 }
 0x38a   : > { %v5278_v38 = vsel %vm5256_vm0, %v5252_v40, 0.0 }
 0x38b   : > { %v5277_v22 = vadd.f32 %v5276_v9, %v5275_v50 }
 0x38d   : > { %v5279_v24 = vadd.f32 %v5278_v38, %v5277_v22 }
 0x3ca   : > { %v5174_v34 = vpop.xlane.xlu0 %5173 }
 0x3cb   : > { %v5223_v49 = vmul.f32 %v5174_v34, %v5174_v34 }
 0x3cc   : > { %v3554_v54 = vpop.xlane.xlu1 %3553 }
 0x3cd   : > { %v5208_v60 = vmul.f32 %v3554_v54, %v3554_v54 }
 0x3cf   : > { %v5238_v55 = vadd.f32 %v5223_v49, %v5208_v60 }
 0x3d1   : > { %v5253_v58 = vmul.f32 %v5238_v55, %v5193_v7 }
 0x3d2   : > { %v5177_v2 = vpop.xlane.xlu0 %5176 }
 0x3d3   : > { %v3557_v18 = vpop.xlane.xlu1 %3556  ;;  %v5224_v37 = vmul.f32 %v5177_v2, %v5177_v2  ;;  %v5280_v21 = vsel %vm5256_vm0, %v5253_v58, 0.0 }
 0x3d4   : > { %v5209_v25 = vmul.f32 %v3557_v18, %v3557_v18  ;;  %v5281_v52 = vadd.f32 %v5280_v21, %v5279_v24 }
 0x3d6   : > { %v5239_v13 = vadd.f32 %v5224_v37, %v5209_v25 }
 0x3d8   : > { %v5254_v29 = vmul.f32 %v5239_v13, %v5194_v59 }
 0x3da   : > { %v5282_v12 = vsel %vm5256_vm0, %v5254_v29, 0.0 }
 0x3db   : > { %v5283_v57 = vadd.f32 %v5282_v12, %v5281_v52 }
 0x3e9   : > { %v3560_v26 = vpop.xlane.xlu1 %3559  ;;  %v5180_v32 = vpop.xlane.xlu0 %5179 }
 0x3ea   : > { %v5210_v61 = vmul.f32 %v3560_v26, %v3560_v26  ;;  %v5225_v27 = vmul.f32 %v5180_v32, %v5180_v32 }
 0x3ec   : > { %v5240_v35 = vadd.f32 %v5225_v27, %v5210_v61 }
 0x3ee   : > { %v5255_v48 = vmul.f32 %v5240_v35, %v5195_v53 }
 0x3f0   : > { %v5284_v8 = vsel %vm5256_vm0, %v5255_v48, 0.0 }
 0x3f1   : > { %v5285_v41 = vadd.f32 %v5284_v8, %v5283_v57 }
 0x3f3   : > { %5286 = vadd.xlane.f32.xlu0 %v5285_v41 }
 0x402   : > { %v1638_v17 = vpop.xlane.xlu1 %1637 }
 0x403   : > { %v1639_v56 = vrot.slane %v1638_v17, 4 }
 0x405   : > { %v1640_v5 = vadd.f32 %v1639_v56, %v1638_v17 }
 0x407   : > { %v1641_v54 = vrot.slane %v1640_v5, 2 }
 0x409   : > { %v1642_v34 = vadd.f32 %v1641_v54, %v1640_v5 }
 0x40b   : > { %v1643_v19 = vrot.slane %v1642_v34, 1 }
 0x40d   : > { %v1644_v20 = vadd.f32 %v1643_v19, %v1642_v34 }
 0x40f   : > { %5771 = vpush %v1644_v20 }
 0x440   : > { %s5772_s10 = spop %5771 }
 0x47c   : > { %v5287_v62 = vpop.xlane.xlu0 %5286 }
 0x47d   : > { %v5288_v4 = vrot.slane %v5287_v62, 4 }
 0x47f   : > { %v5289_v43 = vadd.f32 %v5288_v4, %v5287_v62 }
 0x481   : > { %v5290_v11 = vrot.slane %v5289_v43, 2 }
 0x483   : > { %v5291_v14 = vadd.f32 %v5290_v11, %v5289_v43 }
 0x485   : > { %v5292_v16 = vrot.slane %v5291_v14, 1 }
 0x487   : > { %v5293_v39 = vadd.f32 %v5292_v16, %v5291_v14 }
 0x489   : > { %5833 = vpush %v5293_v39 }
 0x4ba   : > { %s5834_s24 = spop %5833 }
 0x4bb   : > { %s5295_s11 = sadd.f32 %s5834_s24, %s5772_s10 }
 0x4bd   : > { %s5296_s20 = smul.f32 0.5, %s5295_s11 }
 0x4bf   : > { %v5297_v36 = vstv %s5296_s20 }
 0x4c0   : > { %5298 = vst [vmem:[%s538_s12] sm:$0x1] %v5297_v36 }
 0x4c1   : > { %6227 = shalt.err (!%p6224_p13)
}
 0x4c2   : > { %s6228_s10 = scalar_lea.hbm %s9815_s26, 16  ;;  %s6232_s30 = scalar_lea.hbm %s10234_s21, 32 }
 0x4c3   : > { %p6229_p4 = scmp.ne.s32.totalorder %s9815_s26, %s6228_s10  ;;  %p6233_p5 = scmp.lt.s32.totalorder %s9815_s26, %s10234_s21 }
 0x4c4   : > { %p6234_p0 = scmp.lt.s32.totalorder %s6232_s30, %s6228_s10 }
 0x4c5   : > { %p6230_p6 = pnand %p6229_p4, %p10235_p12 }
 0x4c6   : > { %p6235_p3 = por %p6234_p0, %p6233_p5 }
 0x4c7   : > { %p6231_p11 = pneg %p6230_p6 }
 0x4c9   : > { %p6236_p7 = pnand %p6235_p3, %p6231_p11 }
 0x4cb   : > { %6239 = shalt.err (!%p6236_p7)
}
 0x4cc   : > { %5841 = dma.vmem_to_hbm [thread:$0]  (%p10235_p12), %s5321_s29, 16, %s9815_s26, %s5307_s27  }
 0x4cd PF: > { %s10236_s20 = sld [smem:[#allocation11_spill]] }
 0x4ce   : > { %s10237_s0 = sld [smem:[#allocation14_spill]] }
 0x4cf   : > { %s10238_s23 = sld [smem:[#allocation12_spill]] }
 0x4d3   : > { %s5332_s18 = sand.u32 1, %s10236_s20  }
 0x4d4   : > { %p10239_p2 = scmp.ne.s32.totalorder %s10237_s0, 0  ;;  %s5333_s28 = scalar_lea.sflag [#allocation4], %s5332_s18 }
 0x4d5   : > { %p10240_p1 = scmp.ge.s32.totalorder %s10238_s23, 2 }
 0x4d7   : > { %p5852_p10 = pnand %p10240_p1, %p10239_p2 }
 0x4d9   : > { %p5853_p8 = pneg %p5852_p10 }
 0x4db   : > { %6273 = dma.done.wait (%p5853_p8), %s5333_s28, 16  }
 0x4dc   : > { %6275 = vsyncadd (%p5853_p8), %s5333_s28, 4294967280  ;;  %s27_s18 = sadd.s32 1, %s10238_s23   ;;  %s10241_s13 = smov %s6282_s14 }
 0x4dd   : > { %p24_p9 = scmp.ge.s32.totalorder %s27_s18, 4   ;;  %s10242_s14 = smov %s6286_s15 }
 0x4de   : > { %s10243_s15 = smov %s6477_s7  ;;  %s10244_s16 = smov %s6294_s17 }
 0x4df   : > { %s10245_s17 = smov %s10247_s19  ;;  %26 = sbr.rel (!%p24_p9) target bundleno = 12 (0xc), region = 142 }
 0x4e4   :  { %5337 = vsyncpa [#allocation3], 1 }
 0x4e5   :  { %5339 = vsyncpa [#allocation3 + $0x1], 1 }
 0x4e6   :  { %5340 = vsyncpa [#allocation4], 1 }
 0x4e7   :  { %5342 = vsyncpa [#allocation4 + $0x1], 1 }
 0x4e8   :  { %5343 = vsyncpa [#allocation5], 1 }
 0x4e9   :  { %5345 = vsyncpa [#allocation5 + $0x1], 1 }

</bundles_post_ra>
